<compile_context>
chip_gen: v7x
topology: tpu7x:2x2x1
jax: 0.10.0
libtpu: 0.0.40
codegen_flags: <defaults>
</compile_context>

<pallas_src>
import functools

import jax
import jax.numpy as jnp
from jax import lax
from jax.experimental import pallas as pl
from jax.experimental.pallas import tpu as pltpu

EMBED = 32           # embedding_size
HEADS = 4            # n_heads
NLAYERS = 2          # n_layers
HEAD_DIM = EMBED // HEADS

_VMEM = pl.BlockSpec(memory_space=pltpu.MemorySpace.VMEM)


# ----------------------------------------------------------------------------
# In-kernel helpers
# ----------------------------------------------------------------------------
def _layer_norm(x, g, b):
    mu = jnp.mean(x, axis=-1, keepdims=True)
    var = jnp.mean((x - mu) ** 2, axis=-1, keepdims=True)
    return (x - mu) * lax.rsqrt(var + 1e-5) * g + b


def _mgt_attention(x, S, Dm, M, wqkv, bqkv, R, RT):
    """One MGTConv on an [N, D] tile.

    S  [E, N]: one-hot of src (gather rows by src)
    Dm [E, N]: one-hot of dst (gather rows by dst)
    M  [N, E]: transpose of Dm (segment-sum over dst)
    R  [D, H]: per-head column-sum matrix; RT = R^T expands [E,H] -> [E,D]
    """
    qkv = jnp.dot(x, wqkv, preferred_element_type=jnp.float32) + bqkv          # [N, 3D]
    q = qkv[:, :EMBED]
    q_dst = jnp.dot(Dm, q, preferred_element_type=jnp.float32)                 # [E, D]
    kv_src = jnp.dot(S, qkv[:, EMBED:], preferred_element_type=jnp.float32)    # [E, 2D]
    k_src = kv_src[:, :EMBED]
    v_src = kv_src[:, EMBED:]
    logits = jnp.dot(q_dst * k_src, R, preferred_element_type=jnp.float32)     # [E, H]
    logits = logits * (1.0 / jnp.sqrt(float(HEAD_DIM)))
    # softmax over edges sharing a dst: shift by a per-head global max (exact),
    # per-segment normalization via dense matmuls.
    m = jnp.max(logits, axis=0, keepdims=True)                                 # [1, H]
    exp_e = jnp.exp(logits - m)                                                # [E, H]
    seg_sum = jnp.dot(M, exp_e, preferred_element_type=jnp.float32)            # [N, H]
    denom = jnp.dot(Dm, seg_sum, preferred_element_type=jnp.float32)           # [E, H]
    att = jnp.where(denom > 0.0, exp_e / denom, 0.0)                           # [E, H]
    msg = jnp.dot(att, RT, preferred_element_type=jnp.float32) * v_src         # [E, D]
    out = jnp.dot(M, msg, preferred_element_type=jnp.float32)                  # [N, D]
    return out, att


# ----------------------------------------------------------------------------
# Kernel A: full GNN stack for one graph (grid axis = graph index, "parallel")
# ----------------------------------------------------------------------------
def _gnn_stack_kernel(x_ref, S_ref, Dm_ref, M_ref, g_ref, b_ref,
                      wqkv_ref, bqkv_ref, R_ref, RT_ref, o_ref):
    x = x_ref[0]
    S = S_ref[0]
    Dm = Dm_ref[0]
    M = M_ref[0]
    g = g_ref[...]
    b = b_ref[...]
    R = R_ref[...]
    RT = RT_ref[...]
    for l in range(NLAYERS):                       # static unroll over GNN layers
        xn = _layer_norm(x, g, b)                  # layer_nrom1 before every conv
        x, _ = _mgt_attention(xn, S, Dm, M, wqkv_ref[l], bqkv_ref[l], R, RT)
    o_ref[0] = x


def gnn_stack(x_stack, S_stack, Dm_stack, M_stack, ln_g, ln_b,
              wqkv_stack, bqkv_stack, R, RT):
    T, N, D = x_stack.shape
    E = S_stack.shape[1]
    return pl.pallas_call(
        _gnn_stack_kernel,
        out_shape=jax.ShapeDtypeStruct((T, N, D), jnp.float32),
        grid=(T,),
        in_specs=[
            pl.BlockSpec((1, N, D), lambda t: (t, 0, 0)),
            pl.BlockSpec((1, E, N), lambda t: (t, 0, 0)),
            pl.BlockSpec((1, E, N), lambda t: (t, 0, 0)),
            pl.BlockSpec((1, N, E), lambda t: (t, 0, 0)),
            pl.BlockSpec((1, D), lambda t: (0, 0)),
            pl.BlockSpec((1, D), lambda t: (0, 0)),
            pl.BlockSpec((NLAYERS, D, 3 * D), lambda t: (0, 0, 0)),
            pl.BlockSpec((NLAYERS, 1, 3 * D), lambda t: (0, 0, 0)),
            pl.BlockSpec((D, HEADS), lambda t: (0, 0)),
            pl.BlockSpec((HEADS, D), lambda t: (0, 0)),
        ],
        out_specs=pl.BlockSpec((1, N, D), lambda t: (t, 0, 0)),
        compiler_params=pltpu.CompilerParams(dimension_semantics=("parallel",)),
    )(x_stack, S_stack, Dm_stack, M_stack,
      ln_g.reshape(1, D), ln_b.reshape(1, D), wqkv_stack, bqkv_stack, R, RT)


# ----------------------------------------------------------------------------
# Kernel B: fused bidirectional LSTM + padded-sequence mean
# ----------------------------------------------------------------------------
def _bilstm_mean_kernel(x_ref, len_ref, invt_ref, wih_ref, whh_ref, b_ref, o_ref,
                        *, tsteps, batch, hidden):
    H2 = 2 * hidden
    # Hoisted input projection: one matmul for all timesteps & both directions.
    # Column layout of the 8H gate axis: [i_f|i_b|f_f|f_b|g_f|g_b|o_f|o_b].
    gx = jnp.dot(x_ref[...], wih_ref[...], preferred_element_type=jnp.float32) + b_ref[...]
    whh = whh_ref[...]
    lens = len_ref[...]                                        # [B, 1] int32
    h = jnp.zeros((batch, H2), jnp.float32)                    # [h_f | h_b]
    c = jnp.zeros((batch, H2), jnp.float32)
    acc = jnp.zeros((batch, H2), jnp.float32)
    for t in range(tsteps):                                    # static unroll (T small)
        gates = gx[t * batch:(t + 1) * batch, :] + jnp.dot(
            h, whh, preferred_element_type=jnp.float32)        # [B, 8H]
        i_g = jax.nn.sigmoid(gates[:, 0 * H2:1 * H2])
        f_g = jax.nn.sigmoid(gates[:, 1 * H2:2 * H2])
        g_g = jnp.tanh(gates[:, 2 * H2:3 * H2])
        o_g = jax.nn.sigmoid(gates[:, 3 * H2:4 * H2])
        c_new = f_g * c + i_g * g_g
        h_new = o_g * jnp.tanh(c_new)
        valid = lens > t                                       # packed-sequence mask
        h = jnp.where(valid, h_new, h)
        c = jnp.where(valid, c_new, c)
        acc = acc + jnp.where(valid, h_new, 0.0)
    # mean over the 2 directions, then mean over the padded sequence (divide by
    # max(lens) == pad_packed_sequence length).  The backward-direction sum over
    # reversed time equals the sum over original time, so no output reversal needed.
    o_ref[...] = 0.5 * (acc[:, :hidden] + acc[:, hidden:]) * invt_ref[...]


def bilstm_mean(x_f, x_b, lens, inv_tmax, wih_comb, whh_comb, b_comb):
    t, bsz, d = x_f.shape
    x_comb = jnp.concatenate([x_f, x_b], axis=-1).reshape(t * bsz, 2 * d)
    return pl.pallas_call(
        functools.partial(_bilstm_mean_kernel, tsteps=t, batch=bsz, hidden=d),
        out_shape=jax.ShapeDtypeStruct((bsz, d), jnp.float32),
        in_specs=[_VMEM] * 6,
        out_specs=_VMEM,
    )(x_comb, lens.reshape(bsz, 1).astype(jnp.int32),
      inv_tmax.reshape(1, 1).astype(jnp.float32),
      wih_comb, whh_comb, b_comb.reshape(1, -1))


# ----------------------------------------------------------------------------
# Kernel C: clf MGTConv (infer) + row select + LayerNorm + MLP head
# ----------------------------------------------------------------------------
def _clf_head_kernel(x_ref, S_ref, Dm_ref, M_ref, wqkv_ref, bqkv_ref, R_ref, RT_ref,
                     sel_ref, lng_ref, lnb_ref, w1_ref, b1_ref, w2_ref, b2_ref,
                     w3_ref, b3_ref, pred_ref, att_ref):
    out, att = _mgt_attention(x_ref[...], S_ref[...], Dm_ref[...], M_ref[...],
                              wqkv_ref[...], bqkv_ref[...], R_ref[...], RT_ref[...])
    att_ref[...] = att
    xg = jnp.dot(sel_ref[...], out, preferred_element_type=jnp.float32)  # clf_out[clf_nodes]
    xn = _layer_norm(xg, lng_ref[...], lnb_ref[...])                     # layer_norm
    h = jnp.tanh(jnp.dot(xn, w1_ref[...], preferred_element_type=jnp.float32) + b1_ref[...])
    h = jnp.tanh(jnp.dot(h, w2_ref[...], preferred_element_type=jnp.float32) + b2_ref[...])
    pred_ref[...] = jax.nn.sigmoid(
        jnp.dot(h, w3_ref[...], preferred_element_type=jnp.float32) + b3_ref[...])


def clf_head(embedding, S, Dm, M, wqkv, bqkv, R, RT, sel,
             ln_g, ln_b, w1, b1, w2, b2, w3, b3):
    n, d = embedding.shape
    e = S.shape[0]
    m_rows = sel.shape[0]
    return pl.pallas_call(
        _clf_head_kernel,
        out_shape=(jax.ShapeDtypeStruct((m_rows, 1), jnp.float32),
                   jax.ShapeDtypeStruct((e, HEADS), jnp.float32)),
        in_specs=[_VMEM] * 17,
        out_specs=(_VMEM, _VMEM),
    )(embedding, S, Dm, M, wqkv, bqkv, R, RT, sel,
      ln_g.reshape(1, d), ln_b.reshape(1, d),
      w1, b1.reshape(1, -1), w2, b2.reshape(1, -1), w3, b3.reshape(1, -1))


# ----------------------------------------------------------------------------
# Plain-JAX glue (data-dependent gather / scatter, all O(E) or O(N))
# ----------------------------------------------------------------------------
def reverse_by_length(x_btd, lengths):
    """Per-row time reversal of the valid prefix; padded tail set to zero."""
    bsz, t, _ = x_btd.shape
    t_idx = jnp.arange(t)[None, :]
    rev_idx = jnp.clip(lengths[:, None] - 1 - t_idx, 0, t - 1)
    valid = t_idx < lengths[:, None]
    idx = jnp.broadcast_to(rev_idx[..., None], x_btd.shape)
    gathered = jnp.take_along_axis(x_btd, idx, axis=1)
    return jnp.where(valid[..., None], gathered, 0.0)


def segment_argmax_src(att, src, dst, num_nodes):
    """scatter_max(att.sum(1), dst) -> src of the argmax edge per node."""
    e = att.shape[0]
    att_sum = jnp.sum(att, axis=1)
    seg_max = jax.ops.segment_max(att_sum, dst, num_segments=num_nodes)
    is_max = att_sum >= seg_max[dst]
    cand = jnp.where(is_max, jnp.arange(e, dtype=jnp.int32), e)
    argmax = jax.ops.segment_min(cand, dst, num_segments=num_nodes)
    # TODO(synk): torch_scatter.scatter_max empty-segment argmax sentinel not
    # reproduced; nodes with no incoming edges pick an arbitrary (clamped) edge.
    argmax = jnp.minimum(argmax, e - 1)
    return src[argmax]


# ----------------------------------------------------------------------------
# Predict_model.forward
# ----------------------------------------------------------------------------
def predict_model_forward(params, embeddings, edges, node_type, edge_type,
                          clf_neighbors, clf_nodes):
    del node_type, edge_type                      # unused in the reference forward
    n = embeddings[0].shape[0]

    # Dense one-hot edge operators (assumes every graph has the same E; pad if not).
    # TODO(synk): these scale O(N*E) — keep a sparse segment-op path for large graphs.
    node_ids = jnp.arange(n, dtype=jnp.int32)
    S_list, Dm_list, M_list = [], [], []
    for edge in edges:
        src, dst = edge[0], edge[1]
        S_list.append((src[:, None] == node_ids[None, :]).astype(jnp.float32))
        Dm_list.append((dst[:, None] == node_ids[None, :]).astype(jnp.float32))
        M_list.append((node_ids[:, None] == dst[None, :]).astype(jnp.float32))
    x_stack = jnp.stack(embeddings)                                   # [T, N, D]

    gnn_out = gnn_stack(x_stack, jnp.stack(S_list), jnp.stack(Dm_list),
                        jnp.stack(M_list), params["ln1_g"], params["ln1_b"],
                        params["wqkv_stack"], params["bqkv_stack"],
                        params["R"], params["RT"])                    # [T, N, D]

    # embeds = cat([last graph, ..., first graph], dim=1)
    embeds = jnp.transpose(gnn_out[::-1], (1, 0, 2))                  # [N, T, D]
    temp = embeds[clf_neighbors]                                      # [K, T, D]
    lens = jnp.sum((jnp.sum((temp != 0).astype(jnp.int32), axis=2) != 0)
                   .astype(jnp.int32), axis=1)
    lens = jnp.minimum(lens, 5)                                       # clamp(max=5)
    t_max = jnp.maximum(jnp.max(lens), 1)                             # padded length
    inv_tmax = 1.0 / t_max.astype(jnp.float32)

    x_f = jnp.transpose(temp, (1, 0, 2))                              # [T, K, D]
    x_b = jnp.transpose(reverse_by_length(temp, lens), (1, 0, 2))     # reversed input
    seq_mean = bilstm_mean(x_f, x_b, lens, inv_tmax,
                           params["wih_comb"], params["whh_comb"], params["b_comb"])

    embedding = jnp.zeros_like(embeddings[-1]).at[clf_neighbors].set(seq_mean)

    sel = (clf_nodes[:, None] == node_ids[None, :]).astype(jnp.float32)   # [M, N]
    prediction, att = clf_head(embedding, S_list[-1], Dm_list[-1], M_list[-1],
                               params["wqkv_clf"], params["bqkv_clf"],
                               params["R"], params["RT"], sel,
                               params["ln_g"], params["ln_b"],
                               params["w1"], params["b1"], params["w2"], params["b2"],
                               params["w3"], params["b3"])

    src, dst = edges[-1][0], edges[-1][1]
    max_att_src = segment_argmax_src(att, src, dst, n)
    return prediction, max_att_src[clf_nodes]


# ----------------------------------------------------------------------------
# Parameter construction (fused / combined layouts)
# ----------------------------------------------------------------------------
def _interleave_gates(a_f, a_b, h):
    """Interleave two (.., 4H) gate tensors into (.., 8H): [i_f|i_b|f_f|f_b|g_f|g_b|o_f|o_b]."""
    parts = []
    for g in range(4):
        parts.append(a_f[..., g * h:(g + 1) * h])
        parts.append(a_b[..., g * h:(g + 1) * h])
    return jnp.concatenate(parts, axis=-1)


def make_bilstm_weights(wih_f, whh_f, b_f, wih_b, whh_b, b_b):
    h = whh_f.shape[0]
    wih_comb = jnp.concatenate(
        [_interleave_gates(wih_f, jnp.zeros_like(wih_f), h),
         _interleave_gates(jnp.zeros_like(wih_b), wih_b, h)], axis=0)   # [2D, 8H]
    whh_comb = jnp.concatenate(
        [_interleave_gates(whh_f, jnp.zeros_like(whh_f), h),
         _interleave_gates(jnp.zeros_like(whh_b), whh_b, h)], axis=0)   # [2H, 8H]
    b_comb = _interleave_gates(b_f, b_b, h)                             # [8H]
    return wih_comb, whh_comb, b_comb


def init_params(key):
    keys = iter(jax.random.split(key, 64))

    def dense(shape, scale=0.1):
        return scale * jax.random.normal(next(keys), shape, jnp.float32)

    def qkv_fused():
        wq, wk, wv = dense((EMBED, EMBED)), dense((EMBED, EMBED)), dense((EMBED, EMBED))
        return jnp.concatenate([wq, wk, wv], axis=1), jnp.zeros((1, 3 * EMBED), jnp.float32)

    layer_w, layer_b = zip(*[qkv_fused() for _ in range(NLAYERS)])
    wqkv_clf, bqkv_clf = qkv_fused()

    wih_f, whh_f = dense((EMBED, 4 * EMBED)), dense((EMBED, 4 * EMBED))
    wih_b, whh_b = dense((EMBED, 4 * EMBED)), dense((EMBED, 4 * EMBED))
    b_f = jnp.zeros((4 * EMBED,), jnp.float32)
    b_b = jnp.zeros((4 * EMBED,), jnp.float32)
    wih_comb, whh_comb, b_comb = make_bilstm_weights(wih_f, whh_f, b_f, wih_b, whh_b, b_b)

    head_ids = jnp.arange(EMBED) // HEAD_DIM
    R = (head_ids[:, None] == jnp.arange(HEADS)[None, :]).astype(jnp.float32)   # [D, H]

    return {
        "ln1_g": jnp.ones((EMBED,), jnp.float32), "ln1_b": jnp.zeros((EMBED,), jnp.float32),
        "ln_g": jnp.ones((EMBED,), jnp.float32), "ln_b": jnp.zeros((EMBED,), jnp.float32),
        "wqkv_stack": jnp.stack(layer_w), "bqkv_stack": jnp.stack(layer_b),
        "wqkv_clf": wqkv_clf, "bqkv_clf": bqkv_clf,
        "wih_comb": wih_comb, "whh_comb": whh_comb, "b_comb": b_comb,
        "R": R, "RT": R.T,
        "w1": dense((EMBED, 32)), "b1": jnp.zeros((32,), jnp.float32),
        "w2": dense((32, 16)), "b2": jnp.zeros((16,), jnp.float32),
        "w3": dense((16, 1)), "b3": jnp.zeros((1,), jnp.float32),
    }


if __name__ == "__main__":
    key = jax.random.PRNGKey(0)
    k_par, k_emb, k_edge = jax.random.split(key, 3)

    N, E, T = 64, 128, 3
    emb_keys = jax.random.split(k_emb, T)
    embeddings = [jax.random.normal(emb_keys[t], (N, EMBED), jnp.float32) for t in range(T)]

    # every node gets >= 1 incoming edge (dst covers all nodes)
    dst = jnp.tile(jnp.arange(N, dtype=jnp.int32), 2)                 # [E]
    edge_keys = jax.random.split(k_edge, T)
    edges = [jnp.stack([jax.random.randint(edge_keys[t], (E,), 0, N, dtype=jnp.int32), dst])
             for t in range(T)]
    edge_type = [jnp.zeros((E,), jnp.int32) for _ in range(T)]
    node_type = jnp.zeros((N,), jnp.int32)

    clf_neighbors = jnp.arange(0, 32, 2, dtype=jnp.int32)             # K = 16
    clf_nodes = jnp.arange(0, 16, 2, dtype=jnp.int32)                 # M = 8

    params = init_params(k_par)

    fwd = jax.jit(predict_model_forward)
    prediction, max_att_src = fwd(params, embeddings, edges, node_type, edge_type,
                                  clf_neighbors, clf_nodes)

    jax.block_until_ready((prediction, max_att_src))
    assert prediction.shape == (clf_nodes.shape[0], 1)
    assert max_att_src.shape == (clf_nodes.shape[0],)
    print("KERNEL_OK")
</pallas_src>

<mosaic_0001>
module attributes {stable_mosaic.version = 11 : i64} {
  func.func private @main(%arg0: i32) attributes {dimension_semantics = [#tpu.dimension_semantics<core_parallel>], iteration_bounds = array<i64: 2>, tpu.core_type = #tpu.core_type<sc_scalar_subcore>, window_params = []} {
    return
  }
}

module attributes {stable_mosaic.version = 11 : i64} {
  func.func private @main(%arg0: i32) attributes {dimension_semantics = [#tpu.dimension_semantics<core_parallel>], iteration_bounds = array<i64: 2>, tpu.core_type = #tpu.core_type<sc_scalar_subcore>, window_params = []} {
    return
  }
}

module attributes {stable_mosaic.version = 11 : i64} {
  func.func @_gnn_stack_kernel(%arg0: i32, %arg1: memref<1x64x32xf32, #tpu.memory_space<vmem>>, %arg2: memref<1x128x64xf32, #tpu.memory_space<vmem>>, %arg3: memref<1x128x64xf32, #tpu.memory_space<vmem>>, %arg4: memref<1x64x128xf32, #tpu.memory_space<vmem>>, %arg5: memref<1x32xf32, #tpu.memory_space<vmem>>, %arg6: memref<1x32xf32, #tpu.memory_space<vmem>>, %arg7: memref<2x32x96xf32, #tpu.memory_space<vmem>>, %arg8: memref<2x1x96xf32, #tpu.memory_space<vmem>>, %arg9: memref<32x4xf32, #tpu.memory_space<vmem>>, %arg10: memref<4x32xf32, #tpu.memory_space<vmem>>, %arg11: memref<1x64x32xf32, #tpu.memory_space<vmem>>) attributes {dimension_semantics = [#tpu.dimension_semantics<parallel>], iteration_bounds = array<i64: 3>, scalar_prefetch = 0 : i64, scratch_operands = 0 : i64, tpu.core_type = #tpu.core_type<tc>, window_params = [{transform_indices = @transform_0, window_bounds = array<i64: 1, 64, 32>}, {transform_indices = @transform_1, window_bounds = array<i64: 1, 128, 64>}, {transform_indices = @transform_2, window_bounds = array<i64: 1, 128, 64>}, {transform_indices = @transform_3, window_bounds = array<i64: 1, 64, 128>}, {pipeline_mode = #tpu.pipeline_mode<synchronous>, transform_indices = @transform_4, window_bounds = array<i64: 1, 32>}, {pipeline_mode = #tpu.pipeline_mode<synchronous>, transform_indices = @transform_5, window_bounds = array<i64: 1, 32>}, {pipeline_mode = #tpu.pipeline_mode<synchronous>, transform_indices = @transform_6, window_bounds = array<i64: 2, 32, 96>}, {pipeline_mode = #tpu.pipeline_mode<synchronous>, transform_indices = @transform_7, window_bounds = array<i64: 2, 1, 96>}, {pipeline_mode = #tpu.pipeline_mode<synchronous>, transform_indices = @transform_8, window_bounds = array<i64: 32, 4>}, {pipeline_mode = #tpu.pipeline_mode<synchronous>, transform_indices = @transform_9, window_bounds = array<i64: 4, 32>}, {transform_indices = @transform_10, window_bounds = array<i64: 1, 64, 32>}]} {
    %c0 = arith.constant 0 : index
    %c0_0 = arith.constant 0 : index
    %c0_1 = arith.constant 0 : index
    %0 = vector.load %arg1[%c0, %c0_0, %c0_1] : memref<1x64x32xf32, #tpu.memory_space<vmem>>, vector<1x64x32xf32>
    %1 = vector.shape_cast %0 : vector<1x64x32xf32> to vector<64x32xf32>
    %c0_2 = arith.constant 0 : index
    %c0_3 = arith.constant 0 : index
    %c0_4 = arith.constant 0 : index
    %2 = vector.load %arg2[%c0_2, %c0_3, %c0_4] : memref<1x128x64xf32, #tpu.memory_space<vmem>>, vector<1x128x64xf32>
    %3 = vector.shape_cast %2 : vector<1x128x64xf32> to vector<128x64xf32>
    %c0_5 = arith.constant 0 : index
    %c0_6 = arith.constant 0 : index
    %c0_7 = arith.constant 0 : index
    %4 = vector.load %arg3[%c0_5, %c0_6, %c0_7] : memref<1x128x64xf32, #tpu.memory_space<vmem>>, vector<1x128x64xf32>
    %5 = vector.shape_cast %4 : vector<1x128x64xf32> to vector<128x64xf32>
    %c0_8 = arith.constant 0 : index
    %c0_9 = arith.constant 0 : index
    %c0_10 = arith.constant 0 : index
    %6 = vector.load %arg4[%c0_8, %c0_9, %c0_10] : memref<1x64x128xf32, #tpu.memory_space<vmem>>, vector<1x64x128xf32>
    %7 = vector.shape_cast %6 : vector<1x64x128xf32> to vector<64x128xf32>
    %c0_11 = arith.constant 0 : index
    %c0_12 = arith.constant 0 : index
    %8 = vector.load %arg5[%c0_11, %c0_12] : memref<1x32xf32, #tpu.memory_space<vmem>>, vector<1x32xf32>
    %c0_13 = arith.constant 0 : index
    %c0_14 = arith.constant 0 : index
    %9 = vector.load %arg6[%c0_13, %c0_14] : memref<1x32xf32, #tpu.memory_space<vmem>>, vector<1x32xf32>
    %c0_15 = arith.constant 0 : index
    %c0_16 = arith.constant 0 : index
    %10 = vector.load %arg9[%c0_15, %c0_16] : memref<32x4xf32, #tpu.memory_space<vmem>>, vector<32x4xf32>
    %c0_17 = arith.constant 0 : index
    %c0_18 = arith.constant 0 : index
    %11 = vector.load %arg10[%c0_17, %c0_18] : memref<4x32xf32, #tpu.memory_space<vmem>>, vector<4x32xf32>
    %cst = arith.constant dense<0.000000e+00> : vector<64xf32>
    %12 = vector.multi_reduction <add>, %1, %cst [1] : vector<64x32xf32> to vector<64xf32>
    %13 = vector.shape_cast %12 : vector<64xf32> to vector<64x1xf32>
    %cst_19 = arith.constant 3.200000e+01 : f32
    %14 = vector.broadcast %cst_19 : f32 to vector<64x1xf32>
    %15 = arith.divf %13, %14 : vector<64x1xf32>
    %16 = vector.broadcast %15 : vector<64x1xf32> to vector<64x32xf32>
    %17 = arith.subf %1, %16 : vector<64x32xf32>
    %18 = arith.mulf %17, %17 : vector<64x32xf32>
    %cst_20 = arith.constant dense<0.000000e+00> : vector<64xf32>
    %19 = vector.multi_reduction <add>, %18, %cst_20 [1] : vector<64x32xf32> to vector<64xf32>
    %20 = vector.shape_cast %19 : vector<64xf32> to vector<64x1xf32>
    %cst_21 = arith.constant 3.200000e+01 : f32
    %21 = vector.broadcast %cst_21 : f32 to vector<64x1xf32>
    %22 = arith.divf %20, %21 : vector<64x1xf32>
    %23 = vector.broadcast %15 : vector<64x1xf32> to vector<64x32xf32>
    %24 = arith.subf %1, %23 : vector<64x32xf32>
    %cst_22 = arith.constant 9.99999974E-6 : f32
    %25 = vector.broadcast %cst_22 : f32 to vector<64x1xf32>
    %26 = arith.addf %22, %25 : vector<64x1xf32>
    %27 = math.rsqrt %26 : vector<64x1xf32>
    %28 = vector.broadcast %27 : vector<64x1xf32> to vector<64x32xf32>
    %29 = arith.mulf %24, %28 : vector<64x32xf32>
    %30 = vector.broadcast %8 : vector<1x32xf32> to vector<64x32xf32>
    %31 = arith.mulf %29, %30 : vector<64x32xf32>
    %32 = vector.broadcast %9 : vector<1x32xf32> to vector<64x32xf32>
    %33 = arith.addf %31, %32 : vector<64x32xf32>
    %c0_23 = arith.constant 0 : index
    %c0_24 = arith.constant 0 : index
    %c0_25 = arith.constant 0 : index
    %34 = vector.load %arg7[%c0_23, %c0_24, %c0_25] : memref<2x32x96xf32, #tpu.memory_space<vmem>>, vector<1x32x96xf32>
    %35 = vector.shape_cast %34 : vector<1x32x96xf32> to vector<32x96xf32>
    %c0_26 = arith.constant 0 : index
    %c0_27 = arith.constant 0 : index
    %c0_28 = arith.constant 0 : index
    %36 = vector.load %arg8[%c0_26, %c0_27, %c0_28] : memref<2x1x96xf32, #tpu.memory_space<vmem>>, vector<1x1x96xf32>
    %37 = vector.shape_cast %36 : vector<1x1x96xf32> to vector<1x96xf32>
    %cst_29 = arith.constant dense<0.000000e+00> : vector<64x96xf32>
    %38 = tpu.matmul %33, %35, %cst_29 {dimension_numbers = #tpu.dot_dimension_numbers<[1], [0], [0], [1], [0, 0, 1, 1], [], []>} : vector<64x32xf32>, vector<32x96xf32>, vector<64x96xf32> -> vector<64x96xf32>
    %39 = vector.broadcast %37 : vector<1x96xf32> to vector<64x96xf32>
    %40 = arith.addf %38, %39 : vector<64x96xf32>
    %41 = vector.extract_strided_slice %40 {offsets = [0, 0], sizes = [64, 32], strides = [1, 1]} : vector<64x96xf32> to vector<64x32xf32>
    %cst_30 = arith.constant dense<0.000000e+00> : vector<128x32xf32>
    %42 = tpu.matmul %5, %41, %cst_30 {dimension_numbers = #tpu.dot_dimension_numbers<[1], [0], [0], [1], [0, 0, 1, 1], [], []>} : vector<128x64xf32>, vector<64x32xf32>, vector<128x32xf32> -> vector<128x32xf32>
    %43 = vector.extract_strided_slice %40 {offsets = [0, 32], sizes = [64, 64], strides = [1, 1]} : vector<64x96xf32> to vector<64x64xf32>
    %cst_31 = arith.constant dense<0.000000e+00> : vector<128x64xf32>
    %44 = tpu.matmul %3, %43, %cst_31 {dimension_numbers = #tpu.dot_dimension_numbers<[1], [0], [0], [1], [0, 0, 1, 1], [], []>} : vector<128x64xf32>, vector<64x64xf32>, vector<128x64xf32> -> vector<128x64xf32>
    %45 = vector.extract_strided_slice %44 {offsets = [0, 0], sizes = [128, 32], strides = [1, 1]} : vector<128x64xf32> to vector<128x32xf32>
    %46 = vector.extract_strided_slice %44 {offsets = [0, 32], sizes = [128, 32], strides = [1, 1]} : vector<128x64xf32> to vector<128x32xf32>
    %47 = arith.mulf %42, %45 : vector<128x32xf32>
    %cst_32 = arith.constant dense<0.000000e+00> : vector<128x4xf32>
    %48 = tpu.matmul %47, %10, %cst_32 {dimension_numbers = #tpu.dot_dimension_numbers<[1], [0], [0], [1], [0, 0, 1, 1], [], []>} : vector<128x32xf32>, vector<32x4xf32>, vector<128x4xf32> -> vector<128x4xf32>
    %cst_33 = arith.constant 8.000000e+00 : f32
    %49 = math.sqrt %cst_33 : f32
    %cst_34 = arith.constant 1.000000e+00 : f32
    %50 = arith.divf %cst_34, %49 : f32
    %51 = vector.broadcast %50 : f32 to vector<128x4xf32>
    %52 = arith.mulf %48, %51 : vector<128x4xf32>
    %cst_35 = arith.constant dense<0xFF800000> : vector<4xf32>
    %53 = vector.multi_reduction <maximumf>, %52, %cst_35 [0] : vector<128x4xf32> to vector<4xf32>
    %54 = vector.shape_cast %53 : vector<4xf32> to vector<1x4xf32>
    %55 = vector.broadcast %54 : vector<1x4xf32> to vector<128x4xf32>
    %56 = arith.subf %52, %55 : vector<128x4xf32>
    %57 = math.exp %56 : vector<128x4xf32>
    %cst_36 = arith.constant dense<0.000000e+00> : vector<64x4xf32>
    %58 = tpu.matmul %7, %57, %cst_36 {dimension_numbers = #tpu.dot_dimension_numbers<[1], [0], [0], [1], [0, 0, 1, 1], [], []>} : vector<64x128xf32>, vector<128x4xf32>, vector<64x4xf32> -> vector<64x4xf32>
    %cst_37 = arith.constant dense<0.000000e+00> : vector<128x4xf32>
    %59 = tpu.matmul %5, %58, %cst_37 {dimension_numbers = #tpu.dot_dimension_numbers<[1], [0], [0], [1], [0, 0, 1, 1], [], []>} : vector<128x64xf32>, vector<64x4xf32>, vector<128x4xf32> -> vector<128x4xf32>
    %cst_38 = arith.constant 0.000000e+00 : f32
    %60 = vector.broadcast %cst_38 : f32 to vector<128x4xf32>
    %61 = arith.cmpf ogt, %59, %60 : vector<128x4xf32>
    %62 = arith.divf %57, %59 : vector<128x4xf32>
    %cst_39 = arith.constant 0.000000e+00 : f32
    %63 = vector.broadcast %cst_39 : f32 to vector<128x4xf32>
    %64 = arith.select %61, %62, %63 : vector<128x4xi1>, vector<128x4xf32>
    %cst_40 = arith.constant dense<0.000000e+00> : vector<128x32xf32>
    %65 = tpu.matmul %64, %11, %cst_40 {dimension_numbers = #tpu.dot_dimension_numbers<[1], [0], [0], [1], [0, 0, 1, 1], [], []>} : vector<128x4xf32>, vector<4x32xf32>, vector<128x32xf32> -> vector<128x32xf32>
    %66 = arith.mulf %65, %46 : vector<128x32xf32>
    %cst_41 = arith.constant dense<0.000000e+00> : vector<64x32xf32>
    %67 = tpu.matmul %7, %66, %cst_41 {dimension_numbers = #tpu.dot_dimension_numbers<[1], [0], [0], [1], [0, 0, 1, 1], [], []>} : vector<64x128xf32>, vector<128x32xf32>, vector<64x32xf32> -> vector<64x32xf32>
    %cst_42 = arith.constant dense<0.000000e+00> : vector<64xf32>
    %68 = vector.multi_reduction <add>, %67, %cst_42 [1] : vector<64x32xf32> to vector<64xf32>
    %69 = vector.shape_cast %68 : vector<64xf32> to vector<64x1xf32>
    %cst_43 = arith.constant 3.200000e+01 : f32
    %70 = vector.broadcast %cst_43 : f32 to vector<64x1xf32>
    %71 = arith.divf %69, %70 : vector<64x1xf32>
    %72 = vector.broadcast %71 : vector<64x1xf32> to vector<64x32xf32>
    %73 = arith.subf %67, %72 : vector<64x32xf32>
    %74 = arith.mulf %73, %73 : vector<64x32xf32>
    %cst_44 = arith.constant dense<0.000000e+00> : vector<64xf32>
    %75 = vector.multi_reduction <add>, %74, %cst_44 [1] : vector<64x32xf32> to vector<64xf32>
    %76 = vector.shape_cast %75 : vector<64xf32> to vector<64x1xf32>
    %cst_45 = arith.constant 3.200000e+01 : f32
    %77 = vector.broadcast %cst_45 : f32 to vector<64x1xf32>
    %78 = arith.divf %76, %77 : vector<64x1xf32>
    %79 = vector.broadcast %71 : vector<64x1xf32> to vector<64x32xf32>
    %80 = arith.subf %67, %79 : vector<64x32xf32>
    %cst_46 = arith.constant 9.99999974E-6 : f32
    %81 = vector.broadcast %cst_46 : f32 to vector<64x1xf32>
    %82 = arith.addf %78, %81 : vector<64x1xf32>
    %83 = math.rsqrt %82 : vector<64x1xf32>
    %84 = vector.broadcast %83 : vector<64x1xf32> to vector<64x32xf32>
    %85 = arith.mulf %80, %84 : vector<64x32xf32>
    %86 = vector.broadcast %8 : vector<1x32xf32> to vector<64x32xf32>
    %87 = arith.mulf %85, %86 : vector<64x32xf32>
    %88 = vector.broadcast %9 : vector<1x32xf32> to vector<64x32xf32>
    %89 = arith.addf %87, %88 : vector<64x32xf32>
    %c1 = arith.constant 1 : index
    %c0_47 = arith.constant 0 : index
    %c0_48 = arith.constant 0 : index
    %90 = vector.load %arg7[%c1, %c0_47, %c0_48] : memref<2x32x96xf32, #tpu.memory_space<vmem>>, vector<1x32x96xf32>
    %91 = vector.shape_cast %90 : vector<1x32x96xf32> to vector<32x96xf32>
    %c1_49 = arith.constant 1 : index
    %c0_50 = arith.constant 0 : index
    %c0_51 = arith.constant 0 : index
    %92 = vector.load %arg8[%c1_49, %c0_50, %c0_51] : memref<2x1x96xf32, #tpu.memory_space<vmem>>, vector<1x1x96xf32>
    %93 = vector.shape_cast %92 : vector<1x1x96xf32> to vector<1x96xf32>
    %cst_52 = arith.constant dense<0.000000e+00> : vector<64x96xf32>
    %94 = tpu.matmul %89, %91, %cst_52 {dimension_numbers = #tpu.dot_dimension_numbers<[1], [0], [0], [1], [0, 0, 1, 1], [], []>} : vector<64x32xf32>, vector<32x96xf32>, vector<64x96xf32> -> vector<64x96xf32>
    %95 = vector.broadcast %93 : vector<1x96xf32> to vector<64x96xf32>
    %96 = arith.addf %94, %95 : vector<64x96xf32>
    %97 = vector.extract_strided_slice %96 {offsets = [0, 0], sizes = [64, 32], strides = [1, 1]} : vector<64x96xf32> to vector<64x32xf32>
    %cst_53 = arith.constant dense<0.000000e+00> : vector<128x32xf32>
    %98 = tpu.matmul %5, %97, %cst_53 {dimension_numbers = #tpu.dot_dimension_numbers<[1], [0], [0], [1], [0, 0, 1, 1], [], []>} : vector<128x64xf32>, vector<64x32xf32>, vector<128x32xf32> -> vector<128x32xf32>
    %99 = vector.extract_strided_slice %96 {offsets = [0, 32], sizes = [64, 64], strides = [1, 1]} : vector<64x96xf32> to vector<64x64xf32>
    %cst_54 = arith.constant dense<0.000000e+00> : vector<128x64xf32>
    %100 = tpu.matmul %3, %99, %cst_54 {dimension_numbers = #tpu.dot_dimension_numbers<[1], [0], [0], [1], [0, 0, 1, 1], [], []>} : vector<128x64xf32>, vector<64x64xf32>, vector<128x64xf32> -> vector<128x64xf32>
    %101 = vector.extract_strided_slice %100 {offsets = [0, 0], sizes = [128, 32], strides = [1, 1]} : vector<128x64xf32> to vector<128x32xf32>
    %102 = vector.extract_strided_slice %100 {offsets = [0, 32], sizes = [128, 32], strides = [1, 1]} : vector<128x64xf32> to vector<128x32xf32>
    %103 = arith.mulf %98, %101 : vector<128x32xf32>
    %cst_55 = arith.constant dense<0.000000e+00> : vector<128x4xf32>
    %104 = tpu.matmul %103, %10, %cst_55 {dimension_numbers = #tpu.dot_dimension_numbers<[1], [0], [0], [1], [0, 0, 1, 1], [], []>} : vector<128x32xf32>, vector<32x4xf32>, vector<128x4xf32> -> vector<128x4xf32>
    %cst_56 = arith.constant 8.000000e+00 : f32
    %105 = math.sqrt %cst_56 : f32
    %cst_57 = arith.constant 1.000000e+00 : f32
    %106 = arith.divf %cst_57, %105 : f32
    %107 = vector.broadcast %106 : f32 to vector<128x4xf32>
    %108 = arith.mulf %104, %107 : vector<128x4xf32>
    %cst_58 = arith.constant dense<0xFF800000> : vector<4xf32>
    %109 = vector.multi_reduction <maximumf>, %108, %cst_58 [0] : vector<128x4xf32> to vector<4xf32>
    %110 = vector.shape_cast %109 : vector<4xf32> to vector<1x4xf32>
    %111 = vector.broadcast %110 : vector<1x4xf32> to vector<128x4xf32>
    %112 = arith.subf %108, %111 : vector<128x4xf32>
    %113 = math.exp %112 : vector<128x4xf32>
    %cst_59 = arith.constant dense<0.000000e+00> : vector<64x4xf32>
    %114 = tpu.matmul %7, %113, %cst_59 {dimension_numbers = #tpu.dot_dimension_numbers<[1], [0], [0], [1], [0, 0, 1, 1], [], []>} : vector<64x128xf32>, vector<128x4xf32>, vector<64x4xf32> -> vector<64x4xf32>
    %cst_60 = arith.constant dense<0.000000e+00> : vector<128x4xf32>
    %115 = tpu.matmul %5, %114, %cst_60 {dimension_numbers = #tpu.dot_dimension_numbers<[1], [0], [0], [1], [0, 0, 1, 1], [], []>} : vector<128x64xf32>, vector<64x4xf32>, vector<128x4xf32> -> vector<128x4xf32>
    %cst_61 = arith.constant 0.000000e+00 : f32
    %116 = vector.broadcast %cst_61 : f32 to vector<128x4xf32>
    %117 = arith.cmpf ogt, %115, %116 : vector<128x4xf32>
    %118 = arith.divf %113, %115 : vector<128x4xf32>
    %cst_62 = arith.constant 0.000000e+00 : f32
    %119 = vector.broadcast %cst_62 : f32 to vector<128x4xf32>
    %120 = arith.select %117, %118, %119 : vector<128x4xi1>, vector<128x4xf32>
    %cst_63 = arith.constant dense<0.000000e+00> : vector<128x32xf32>
    %121 = tpu.matmul %120, %11, %cst_63 {dimension_numbers = #tpu.dot_dimension_numbers<[1], [0], [0], [1], [0, 0, 1, 1], [], []>} : vector<128x4xf32>, vector<4x32xf32>, vector<128x32xf32> -> vector<128x32xf32>
    %122 = arith.mulf %121, %102 : vector<128x32xf32>
    %cst_64 = arith.constant dense<0.000000e+00> : vector<64x32xf32>
    %123 = tpu.matmul %7, %122, %cst_64 {dimension_numbers = #tpu.dot_dimension_numbers<[1], [0], [0], [1], [0, 0, 1, 1], [], []>} : vector<64x128xf32>, vector<128x32xf32>, vector<64x32xf32> -> vector<64x32xf32>
    %c0_65 = arith.constant 0 : index
    %c0_66 = arith.constant 0 : index
    %c0_67 = arith.constant 0 : index
    %124 = vector.load %arg11[%c0_65, %c0_66, %c0_67] : memref<1x64x32xf32, #tpu.memory_space<vmem>>, vector<1x64x32xf32>
    %125 = vector.shape_cast %124 : vector<1x64x32xf32> to vector<64x32xf32>
    %126 = vector.shape_cast %123 : vector<64x32xf32> to vector<1x64x32xf32>
    tpu.vector_store %arg11[%c0_65, %c0_66, %c0_67], %126 {strides = array<i32>} : memref<1x64x32xf32, #tpu.memory_space<vmem>>, vector<1x64x32xf32>,
    return
  }
  func.func @transform_0(%arg0: i32) -> (i32, i32, i32) {
    %c0_i32 = arith.constant 0 : i32
    %c0_i32_0 = arith.constant 0 : i32
    %c0_i32_1 = arith.constant 0 : i32
    return %arg0, %c0_i32, %c0_i32_0 : i32, i32, i32
  }
  func.func @transform_1(%arg0: i32) -> (i32, i32, i32) {
    %c0_i32 = arith.constant 0 : i32
    %c0_i32_0 = arith.constant 0 : i32
    %c0_i32_1 = arith.constant 0 : i32
    return %arg0, %c0_i32, %c0_i32_0 : i32, i32, i32
  }
  func.func @transform_2(%arg0: i32) -> (i32, i32, i32) {
    %c0_i32 = arith.constant 0 : i32
    %c0_i32_0 = arith.constant 0 : i32
    %c0_i32_1 = arith.constant 0 : i32
    return %arg0, %c0_i32, %c0_i32_0 : i32, i32, i32
  }
  func.func @transform_3(%arg0: i32) -> (i32, i32, i32) {
    %c0_i32 = arith.constant 0 : i32
    %c0_i32_0 = arith.constant 0 : i32
    %c0_i32_1 = arith.constant 0 : i32
    return %arg0, %c0_i32, %c0_i32_0 : i32, i32, i32
  }
  func.func @transform_4(%arg0: i32) -> (i32, i32) {
    %c0_i32 = arith.constant 0 : i32
    %c0_i32_0 = arith.constant 0 : i32
    %c0_i32_1 = arith.constant 0 : i32
    return %c0_i32, %c0_i32_0 : i32, i32
  }
  func.func @transform_5(%arg0: i32) -> (i32, i32) {
    %c0_i32 = arith.constant 0 : i32
    %c0_i32_0 = arith.constant 0 : i32
    %c0_i32_1 = arith.constant 0 : i32
    return %c0_i32, %c0_i32_0 : i32, i32
  }
  func.func @transform_6(%arg0: i32) -> (i32, i32, i32) {
    %c0_i32 = arith.constant 0 : i32
    %c0_i32_0 = arith.constant 0 : i32
    %c0_i32_1 = arith.constant 0 : i32
    %c0_i32_2 = arith.constant 0 : i32
    return %c0_i32, %c0_i32_0, %c0_i32_1 : i32, i32, i32
  }
  func.func @transform_7(%arg0: i32) -> (i32, i32, i32) {
    %c0_i32 = arith.constant 0 : i32
    %c0_i32_0 = arith.constant 0 : i32
    %c0_i32_1 = arith.constant 0 : i32
    %c0_i32_2 = arith.constant 0 : i32
    return %c0_i32, %c0_i32_0, %c0_i32_1 : i32, i32, i32
  }
  func.func @transform_8(%arg0: i32) -> (i32, i32) {
    %c0_i32 = arith.constant 0 : i32
    %c0_i32_0 = arith.constant 0 : i32
    %c0_i32_1 = arith.constant 0 : i32
    return %c0_i32, %c0_i32_0 : i32, i32
  }
  func.func @transform_9(%arg0: i32) -> (i32, i32) {
    %c0_i32 = arith.constant 0 : i32
    %c0_i32_0 = arith.constant 0 : i32
    %c0_i32_1 = arith.constant 0 : i32
    return %c0_i32, %c0_i32_0 : i32, i32
  }
  func.func @transform_10(%arg0: i32) -> (i32, i32, i32) {
    %c0_i32 = arith.constant 0 : i32
    %c0_i32_0 = arith.constant 0 : i32
    %c0_i32_1 = arith.constant 0 : i32
    return %arg0, %c0_i32, %c0_i32_0 : i32, i32, i32
  }
}

module attributes {stable_mosaic.version = 11 : i64} {
  func.func @_bilstm_mean_kernel(%arg0: memref<48x64xf32, #tpu.memory_space<vmem>>, %arg1: memref<16x1xi32, #tpu.memory_space<vmem>>, %arg2: memref<1x1xf32, #tpu.memory_space<vmem>>, %arg3: memref<64x256xf32, #tpu.memory_space<vmem>>, %arg4: memref<64x256xf32, #tpu.memory_space<vmem>>, %arg5: memref<1x256xf32, #tpu.memory_space<vmem>>, %arg6: memref<16x32xf32, #tpu.memory_space<vmem>>) attributes {dimension_semantics = [], scalar_prefetch = 0 : i64, scratch_operands = 0 : i64, tpu.core_type = #tpu.core_type<tc>} {
    %c0 = arith.constant 0 : index
    %c0_0 = arith.constant 0 : index
    %0 = vector.load %arg0[%c0, %c0_0] : memref<48x64xf32, #tpu.memory_space<vmem>>, vector<48x64xf32>
    %c0_1 = arith.constant 0 : index
    %c0_2 = arith.constant 0 : index
    %1 = vector.load %arg3[%c0_1, %c0_2] : memref<64x256xf32, #tpu.memory_space<vmem>>, vector<64x256xf32>
    %cst = arith.constant dense<0.000000e+00> : vector<48x256xf32>
    %2 = tpu.matmul %0, %1, %cst {dimension_numbers = #tpu.dot_dimension_numbers<[1], [0], [0], [1], [0, 0, 1, 1], [], []>} : vector<48x64xf32>, vector<64x256xf32>, vector<48x256xf32> -> vector<48x256xf32>
    %c0_3 = arith.constant 0 : index
    %c0_4 = arith.constant 0 : index
    %3 = vector.load %arg5[%c0_3, %c0_4] : memref<1x256xf32, #tpu.memory_space<vmem>>, vector<1x256xf32>
    %4 = vector.broadcast %3 : vector<1x256xf32> to vector<48x256xf32>
    %5 = arith.addf %2, %4 : vector<48x256xf32>
    %c0_5 = arith.constant 0 : index
    %c0_6 = arith.constant 0 : index
    %6 = vector.load %arg4[%c0_5, %c0_6] : memref<64x256xf32, #tpu.memory_space<vmem>>, vector<64x256xf32>
    %c0_7 = arith.constant 0 : index
    %c0_8 = arith.constant 0 : index
    %7 = vector.load %arg1[%c0_7, %c0_8] : memref<16x1xi32, #tpu.memory_space<vmem>>, vector<16x1xi32>
    %cst_9 = arith.constant 0.000000e+00 : f32
    %8 = vector.broadcast %cst_9 : f32 to vector<16x64xf32>
    %cst_10 = arith.constant 0.000000e+00 : f32
    %9 = vector.broadcast %cst_10 : f32 to vector<16x64xf32>
    %cst_11 = arith.constant 0.000000e+00 : f32
    %10 = vector.broadcast %cst_11 : f32 to vector<16x64xf32>
    %11 = vector.extract_strided_slice %5 {offsets = [0, 0], sizes = [16, 256], strides = [1, 1]} : vector<48x256xf32> to vector<16x256xf32>
    %cst_12 = arith.constant dense<0.000000e+00> : vector<16x256xf32>
    %12 = tpu.matmul %8, %6, %cst_12 {dimension_numbers = #tpu.dot_dimension_numbers<[1], [0], [0], [1], [0, 0, 1, 1], [], []>} : vector<16x64xf32>, vector<64x256xf32>, vector<16x256xf32> -> vector<16x256xf32>
    %13 = arith.addf %11, %12 : vector<16x256xf32>
    %14 = vector.extract_strided_slice %13 {offsets = [0, 0], sizes = [16, 64], strides = [1, 1]} : vector<16x256xf32> to vector<16x64xf32>
    %15 = arith.negf %14 : vector<16x64xf32>
    %16 = math.exp %15 : vector<16x64xf32>
    %cst_13 = arith.constant 1.000000e+00 : f32
    %17 = vector.broadcast %cst_13 : f32 to vector<16x64xf32>
    %18 = arith.addf %17, %16 : vector<16x64xf32>
    %19 = arith.divf %17, %18 : vector<16x64xf32>
    %20 = vector.extract_strided_slice %13 {offsets = [0, 64], sizes = [16, 64], strides = [1, 1]} : vector<16x256xf32> to vector<16x64xf32>
    %21 = arith.negf %20 : vector<16x64xf32>
    %22 = math.exp %21 : vector<16x64xf32>
    %cst_14 = arith.constant 1.000000e+00 : f32
    %23 = vector.broadcast %cst_14 : f32 to vector<16x64xf32>
    %24 = arith.addf %23, %22 : vector<16x64xf32>
    %25 = arith.divf %23, %24 : vector<16x64xf32>
    %26 = vector.extract_strided_slice %13 {offsets = [0, 128], sizes = [16, 64], strides = [1, 1]} : vector<16x256xf32> to vector<16x64xf32>
    %27 = math.tanh %26 : vector<16x64xf32>
    %28 = vector.extract_strided_slice %13 {offsets = [0, 192], sizes = [16, 64], strides = [1, 1]} : vector<16x256xf32> to vector<16x64xf32>
    %29 = arith.negf %28 : vector<16x64xf32>
    %30 = math.exp %29 : vector<16x64xf32>
    %cst_15 = arith.constant 1.000000e+00 : f32
    %31 = vector.broadcast %cst_15 : f32 to vector<16x64xf32>
    %32 = arith.addf %31, %30 : vector<16x64xf32>
    %33 = arith.divf %31, %32 : vector<16x64xf32>
    %34 = arith.mulf %25, %9 : vector<16x64xf32>
    %35 = arith.mulf %19, %27 : vector<16x64xf32>
    %36 = arith.addf %34, %35 : vector<16x64xf32>
    %37 = math.tanh %36 : vector<16x64xf32>
    %38 = arith.mulf %33, %37 : vector<16x64xf32>
    %c0_i32 = arith.constant 0 : i32
    %39 = vector.broadcast %c0_i32 : i32 to vector<16x1xi32>
    %40 = arith.cmpi sgt, %7, %39 : vector<16x1xi32>
    %41 = vector.shape_cast %40 : vector<16x1xi1> to vector<16x1xi1>
    %42 = vector.broadcast %41 : vector<16x1xi1> to vector<16x64xi1>
    %43 = arith.select %42, %38, %8 : vector<16x64xi1>, vector<16x64xf32>
    %44 = vector.shape_cast %40 : vector<16x1xi1> to vector<16x1xi1>
    %45 = vector.broadcast %44 : vector<16x1xi1> to vector<16x64xi1>
    %46 = arith.select %45, %36, %9 : vector<16x64xi1>, vector<16x64xf32>
    %cst_16 = arith.constant 0.000000e+00 : f32
    %47 = vector.shape_cast %40 : vector<16x1xi1> to vector<16x1xi1>
    %48 = vector.broadcast %47 : vector<16x1xi1> to vector<16x64xi1>
    %49 = vector.broadcast %cst_16 : f32 to vector<16x64xf32>
    %50 = arith.select %48, %38, %49 : vector<16x64xi1>, vector<16x64xf32>
    %51 = arith.addf %10, %50 : vector<16x64xf32>
    %52 = vector.extract_strided_slice %5 {offsets = [16, 0], sizes = [16, 256], strides = [1, 1]} : vector<48x256xf32> to vector<16x256xf32>
    %cst_17 = arith.constant dense<0.000000e+00> : vector<16x256xf32>
    %53 = tpu.matmul %43, %6, %cst_17 {dimension_numbers = #tpu.dot_dimension_numbers<[1], [0], [0], [1], [0, 0, 1, 1], [], []>} : vector<16x64xf32>, vector<64x256xf32>, vector<16x256xf32> -> vector<16x256xf32>
    %54 = arith.addf %52, %53 : vector<16x256xf32>
    %55 = vector.extract_strided_slice %54 {offsets = [0, 0], sizes = [16, 64], strides = [1, 1]} : vector<16x256xf32> to vector<16x64xf32>
    %56 = arith.negf %55 : vector<16x64xf32>
    %57 = math.exp %56 : vector<16x64xf32>
    %cst_18 = arith.constant 1.000000e+00 : f32
    %58 = vector.broadcast %cst_18 : f32 to vector<16x64xf32>
    %59 = arith.addf %58, %57 : vector<16x64xf32>
    %60 = arith.divf %58, %59 : vector<16x64xf32>
    %61 = vector.extract_strided_slice %54 {offsets = [0, 64], sizes = [16, 64], strides = [1, 1]} : vector<16x256xf32> to vector<16x64xf32>
    %62 = arith.negf %61 : vector<16x64xf32>
    %63 = math.exp %62 : vector<16x64xf32>
    %cst_19 = arith.constant 1.000000e+00 : f32
    %64 = vector.broadcast %cst_19 : f32 to vector<16x64xf32>
    %65 = arith.addf %64, %63 : vector<16x64xf32>
    %66 = arith.divf %64, %65 : vector<16x64xf32>
    %67 = vector.extract_strided_slice %54 {offsets = [0, 128], sizes = [16, 64], strides = [1, 1]} : vector<16x256xf32> to vector<16x64xf32>
    %68 = math.tanh %67 : vector<16x64xf32>
    %69 = vector.extract_strided_slice %54 {offsets = [0, 192], sizes = [16, 64], strides = [1, 1]} : vector<16x256xf32> to vector<16x64xf32>
    %70 = arith.negf %69 : vector<16x64xf32>
    %71 = math.exp %70 : vector<16x64xf32>
    %cst_20 = arith.constant 1.000000e+00 : f32
    %72 = vector.broadcast %cst_20 : f32 to vector<16x64xf32>
    %73 = arith.addf %72, %71 : vector<16x64xf32>
    %74 = arith.divf %72, %73 : vector<16x64xf32>
    %75 = arith.mulf %66, %46 : vector<16x64xf32>
    %76 = arith.mulf %60, %68 : vector<16x64xf32>
    %77 = arith.addf %75, %76 : vector<16x64xf32>
    %78 = math.tanh %77 : vector<16x64xf32>
    %79 = arith.mulf %74, %78 : vector<16x64xf32>
    %c1_i32 = arith.constant 1 : i32
    %80 = vector.broadcast %c1_i32 : i32 to vector<16x1xi32>
    %81 = arith.cmpi sgt, %7, %80 : vector<16x1xi32>
    %82 = vector.shape_cast %81 : vector<16x1xi1> to vector<16x1xi1>
    %83 = vector.broadcast %82 : vector<16x1xi1> to vector<16x64xi1>
    %84 = arith.select %83, %79, %43 : vector<16x64xi1>, vector<16x64xf32>
    %85 = vector.shape_cast %81 : vector<16x1xi1> to vector<16x1xi1>
    %86 = vector.broadcast %85 : vector<16x1xi1> to vector<16x64xi1>
    %87 = arith.select %86, %77, %46 : vector<16x64xi1>, vector<16x64xf32>
    %cst_21 = arith.constant 0.000000e+00 : f32
    %88 = vector.shape_cast %81 : vector<16x1xi1> to vector<16x1xi1>
    %89 = vector.broadcast %88 : vector<16x1xi1> to vector<16x64xi1>
    %90 = vector.broadcast %cst_21 : f32 to vector<16x64xf32>
    %91 = arith.select %89, %79, %90 : vector<16x64xi1>, vector<16x64xf32>
    %92 = arith.addf %51, %91 : vector<16x64xf32>
    %93 = vector.extract_strided_slice %5 {offsets = [32, 0], sizes = [16, 256], strides = [1, 1]} : vector<48x256xf32> to vector<16x256xf32>
    %cst_22 = arith.constant dense<0.000000e+00> : vector<16x256xf32>
    %94 = tpu.matmul %84, %6, %cst_22 {dimension_numbers = #tpu.dot_dimension_numbers<[1], [0], [0], [1], [0, 0, 1, 1], [], []>} : vector<16x64xf32>, vector<64x256xf32>, vector<16x256xf32> -> vector<16x256xf32>
    %95 = arith.addf %93, %94 : vector<16x256xf32>
    %96 = vector.extract_strided_slice %95 {offsets = [0, 0], sizes = [16, 64], strides = [1, 1]} : vector<16x256xf32> to vector<16x64xf32>
    %97 = arith.negf %96 : vector<16x64xf32>
    %98 = math.exp %97 : vector<16x64xf32>
    %cst_23 = arith.constant 1.000000e+00 : f32
    %99 = vector.broadcast %cst_23 : f32 to vector<16x64xf32>
    %100 = arith.addf %99, %98 : vector<16x64xf32>
    %101 = arith.divf %99, %100 : vector<16x64xf32>
    %102 = vector.extract_strided_slice %95 {offsets = [0, 64], sizes = [16, 64], strides = [1, 1]} : vector<16x256xf32> to vector<16x64xf32>
    %103 = arith.negf %102 : vector<16x64xf32>
    %104 = math.exp %103 : vector<16x64xf32>
    %cst_24 = arith.constant 1.000000e+00 : f32
    %105 = vector.broadcast %cst_24 : f32 to vector<16x64xf32>
    %106 = arith.addf %105, %104 : vector<16x64xf32>
    %107 = arith.divf %105, %106 : vector<16x64xf32>
    %108 = vector.extract_strided_slice %95 {offsets = [0, 128], sizes = [16, 64], strides = [1, 1]} : vector<16x256xf32> to vector<16x64xf32>
    %109 = math.tanh %108 : vector<16x64xf32>
    %110 = vector.extract_strided_slice %95 {offsets = [0, 192], sizes = [16, 64], strides = [1, 1]} : vector<16x256xf32> to vector<16x64xf32>
    %111 = arith.negf %110 : vector<16x64xf32>
    %112 = math.exp %111 : vector<16x64xf32>
    %cst_25 = arith.constant 1.000000e+00 : f32
    %113 = vector.broadcast %cst_25 : f32 to vector<16x64xf32>
    %114 = arith.addf %113, %112 : vector<16x64xf32>
    %115 = arith.divf %113, %114 : vector<16x64xf32>
    %116 = arith.mulf %107, %87 : vector<16x64xf32>
    %117 = arith.mulf %101, %109 : vector<16x64xf32>
    %118 = arith.addf %116, %117 : vector<16x64xf32>
    %119 = math.tanh %118 : vector<16x64xf32>
    %120 = arith.mulf %115, %119 : vector<16x64xf32>
    %c2_i32 = arith.constant 2 : i32
    %121 = vector.broadcast %c2_i32 : i32 to vector<16x1xi32>
    %122 = arith.cmpi sgt, %7, %121 : vector<16x1xi32>
    %cst_26 = arith.constant 0.000000e+00 : f32
    %123 = vector.shape_cast %122 : vector<16x1xi1> to vector<16x1xi1>
    %124 = vector.broadcast %123 : vector<16x1xi1> to vector<16x64xi1>
    %125 = vector.broadcast %cst_26 : f32 to vector<16x64xf32>
    %126 = arith.select %124, %120, %125 : vector<16x64xi1>, vector<16x64xf32>
    %127 = arith.addf %92, %126 : vector<16x64xf32>
    %128 = vector.extract_strided_slice %127 {offsets = [0, 0], sizes = [16, 32], strides = [1, 1]} : vector<16x64xf32> to vector<16x32xf32>
    %129 = vector.extract_strided_slice %127 {offsets = [0, 32], sizes = [16, 32], strides = [1, 1]} : vector<16x64xf32> to vector<16x32xf32>
    %130 = arith.addf %128, %129 : vector<16x32xf32>
    %cst_27 = arith.constant 5.000000e-01 : f32
    %131 = vector.broadcast %cst_27 : f32 to vector<16x32xf32>
    %132 = arith.mulf %131, %130 : vector<16x32xf32>
    %c0_28 = arith.constant 0 : index
    %c0_29 = arith.constant 0 : index
    %133 = vector.load %arg2[%c0_28, %c0_29] : memref<1x1xf32, #tpu.memory_space<vmem>>, vector<1x1xf32>
    %134 = vector.broadcast %133 : vector<1x1xf32> to vector<16x32xf32>
    %135 = arith.mulf %132, %134 : vector<16x32xf32>
    %c0_30 = arith.constant 0 : index
    %c0_31 = arith.constant 0 : index
    %136 = vector.load %arg6[%c0_30, %c0_31] : memref<16x32xf32, #tpu.memory_space<vmem>>, vector<16x32xf32>
    tpu.vector_store %arg6[%c0_30, %c0_31], %135 {strides = array<i32>} : memref<16x32xf32, #tpu.memory_space<vmem>>, vector<16x32xf32>,
    return
  }
}

module attributes {stable_mosaic.version = 11 : i64} {
  func.func @_clf_head_kernel(%arg0: memref<64x32xf32, #tpu.memory_space<vmem>>, %arg1: memref<128x64xf32, #tpu.memory_space<vmem>>, %arg2: memref<128x64xf32, #tpu.memory_space<vmem>>, %arg3: memref<64x128xf32, #tpu.memory_space<vmem>>, %arg4: memref<32x96xf32, #tpu.memory_space<vmem>>, %arg5: memref<1x96xf32, #tpu.memory_space<vmem>>, %arg6: memref<32x4xf32, #tpu.memory_space<vmem>>, %arg7: memref<4x32xf32, #tpu.memory_space<vmem>>, %arg8: memref<8x64xf32, #tpu.memory_space<vmem>>, %arg9: memref<1x32xf32, #tpu.memory_space<vmem>>, %arg10: memref<1x32xf32, #tpu.memory_space<vmem>>, %arg11: memref<32x32xf32, #tpu.memory_space<vmem>>, %arg12: memref<1x32xf32, #tpu.memory_space<vmem>>, %arg13: memref<32x16xf32, #tpu.memory_space<vmem>>, %arg14: memref<1x16xf32, #tpu.memory_space<vmem>>, %arg15: memref<16x1xf32, #tpu.memory_space<vmem>>, %arg16: memref<1x1xf32, #tpu.memory_space<vmem>>, %arg17: memref<8x1xf32, #tpu.memory_space<vmem>>, %arg18: memref<128x4xf32, #tpu.memory_space<vmem>>) attributes {dimension_semantics = [], scalar_prefetch = 0 : i64, scratch_operands = 0 : i64, tpu.core_type = #tpu.core_type<tc>} {
    %c0 = arith.constant 0 : index
    %c0_0 = arith.constant 0 : index
    %0 = vector.load %arg0[%c0, %c0_0] : memref<64x32xf32, #tpu.memory_space<vmem>>, vector<64x32xf32>
    %c0_1 = arith.constant 0 : index
    %c0_2 = arith.constant 0 : index
    %1 = vector.load %arg1[%c0_1, %c0_2] : memref<128x64xf32, #tpu.memory_space<vmem>>, vector<128x64xf32>
    %c0_3 = arith.constant 0 : index
    %c0_4 = arith.constant 0 : index
    %2 = vector.load %arg2[%c0_3, %c0_4] : memref<128x64xf32, #tpu.memory_space<vmem>>, vector<128x64xf32>
    %c0_5 = arith.constant 0 : index
    %c0_6 = arith.constant 0 : index
    %3 = vector.load %arg3[%c0_5, %c0_6] : memref<64x128xf32, #tpu.memory_space<vmem>>, vector<64x128xf32>
    %c0_7 = arith.constant 0 : index
    %c0_8 = arith.constant 0 : index
    %4 = vector.load %arg4[%c0_7, %c0_8] : memref<32x96xf32, #tpu.memory_space<vmem>>, vector<32x96xf32>
    %c0_9 = arith.constant 0 : index
    %c0_10 = arith.constant 0 : index
    %5 = vector.load %arg5[%c0_9, %c0_10] : memref<1x96xf32, #tpu.memory_space<vmem>>, vector<1x96xf32>
    %c0_11 = arith.constant 0 : index
    %c0_12 = arith.constant 0 : index
    %6 = vector.load %arg6[%c0_11, %c0_12] : memref<32x4xf32, #tpu.memory_space<vmem>>, vector<32x4xf32>
    %c0_13 = arith.constant 0 : index
    %c0_14 = arith.constant 0 : index
    %7 = vector.load %arg7[%c0_13, %c0_14] : memref<4x32xf32, #tpu.memory_space<vmem>>, vector<4x32xf32>
    %cst = arith.constant dense<0.000000e+00> : vector<64x96xf32>
    %8 = tpu.matmul %0, %4, %cst {dimension_numbers = #tpu.dot_dimension_numbers<[1], [0], [0], [1], [0, 0, 1, 1], [], []>} : vector<64x32xf32>, vector<32x96xf32>, vector<64x96xf32> -> vector<64x96xf32>
    %9 = vector.broadcast %5 : vector<1x96xf32> to vector<64x96xf32>
    %10 = arith.addf %8, %9 : vector<64x96xf32>
    %11 = vector.extract_strided_slice %10 {offsets = [0, 0], sizes = [64, 32], strides = [1, 1]} : vector<64x96xf32> to vector<64x32xf32>
    %cst_15 = arith.constant dense<0.000000e+00> : vector<128x32xf32>
    %12 = tpu.matmul %2, %11, %cst_15 {dimension_numbers = #tpu.dot_dimension_numbers<[1], [0], [0], [1], [0, 0, 1, 1], [], []>} : vector<128x64xf32>, vector<64x32xf32>, vector<128x32xf32> -> vector<128x32xf32>
    %13 = vector.extract_strided_slice %10 {offsets = [0, 32], sizes = [64, 64], strides = [1, 1]} : vector<64x96xf32> to vector<64x64xf32>
    %cst_16 = arith.constant dense<0.000000e+00> : vector<128x64xf32>
    %14 = tpu.matmul %1, %13, %cst_16 {dimension_numbers = #tpu.dot_dimension_numbers<[1], [0], [0], [1], [0, 0, 1, 1], [], []>} : vector<128x64xf32>, vector<64x64xf32>, vector<128x64xf32> -> vector<128x64xf32>
    %15 = vector.extract_strided_slice %14 {offsets = [0, 0], sizes = [128, 32], strides = [1, 1]} : vector<128x64xf32> to vector<128x32xf32>
    %16 = vector.extract_strided_slice %14 {offsets = [0, 32], sizes = [128, 32], strides = [1, 1]} : vector<128x64xf32> to vector<128x32xf32>
    %17 = arith.mulf %12, %15 : vector<128x32xf32>
    %cst_17 = arith.constant dense<0.000000e+00> : vector<128x4xf32>
    %18 = tpu.matmul %17, %6, %cst_17 {dimension_numbers = #tpu.dot_dimension_numbers<[1], [0], [0], [1], [0, 0, 1, 1], [], []>} : vector<128x32xf32>, vector<32x4xf32>, vector<128x4xf32> -> vector<128x4xf32>
    %cst_18 = arith.constant 8.000000e+00 : f32
    %19 = math.sqrt %cst_18 : f32
    %cst_19 = arith.constant 1.000000e+00 : f32
    %20 = arith.divf %cst_19, %19 : f32
    %21 = vector.broadcast %20 : f32 to vector<128x4xf32>
    %22 = arith.mulf %18, %21 : vector<128x4xf32>
    %cst_20 = arith.constant dense<0xFF800000> : vector<4xf32>
    %23 = vector.multi_reduction <maximumf>, %22, %cst_20 [0] : vector<128x4xf32> to vector<4xf32>
    %24 = vector.shape_cast %23 : vector<4xf32> to vector<1x4xf32>
    %25 = vector.broadcast %24 : vector<1x4xf32> to vector<128x4xf32>
    %26 = arith.subf %22, %25 : vector<128x4xf32>
    %27 = math.exp %26 : vector<128x4xf32>
    %cst_21 = arith.constant dense<0.000000e+00> : vector<64x4xf32>
    %28 = tpu.matmul %3, %27, %cst_21 {dimension_numbers = #tpu.dot_dimension_numbers<[1], [0], [0], [1], [0, 0, 1, 1], [], []>} : vector<64x128xf32>, vector<128x4xf32>, vector<64x4xf32> -> vector<64x4xf32>
    %cst_22 = arith.constant dense<0.000000e+00> : vector<128x4xf32>
    %29 = tpu.matmul %2, %28, %cst_22 {dimension_numbers = #tpu.dot_dimension_numbers<[1], [0], [0], [1], [0, 0, 1, 1], [], []>} : vector<128x64xf32>, vector<64x4xf32>, vector<128x4xf32> -> vector<128x4xf32>
    %cst_23 = arith.constant 0.000000e+00 : f32
    %30 = vector.broadcast %cst_23 : f32 to vector<128x4xf32>
    %31 = arith.cmpf ogt, %29, %30 : vector<128x4xf32>
    %32 = arith.divf %27, %29 : vector<128x4xf32>
    %cst_24 = arith.constant 0.000000e+00 : f32
    %33 = vector.broadcast %cst_24 : f32 to vector<128x4xf32>
    %34 = arith.select %31, %32, %33 : vector<128x4xi1>, vector<128x4xf32>
    %cst_25 = arith.constant dense<0.000000e+00> : vector<128x32xf32>
    %35 = tpu.matmul %34, %7, %cst_25 {dimension_numbers = #tpu.dot_dimension_numbers<[1], [0], [0], [1], [0, 0, 1, 1], [], []>} : vector<128x4xf32>, vector<4x32xf32>, vector<128x32xf32> -> vector<128x32xf32>
    %36 = arith.mulf %35, %16 : vector<128x32xf32>
    %cst_26 = arith.constant dense<0.000000e+00> : vector<64x32xf32>
    %37 = tpu.matmul %3, %36, %cst_26 {dimension_numbers = #tpu.dot_dimension_numbers<[1], [0], [0], [1], [0, 0, 1, 1], [], []>} : vector<64x128xf32>, vector<128x32xf32>, vector<64x32xf32> -> vector<64x32xf32>
    %c0_27 = arith.constant 0 : index
    %c0_28 = arith.constant 0 : index
    %38 = vector.load %arg18[%c0_27, %c0_28] : memref<128x4xf32, #tpu.memory_space<vmem>>, vector<128x4xf32>
    tpu.vector_store %arg18[%c0_27, %c0_28], %34 {strides = array<i32>} : memref<128x4xf32, #tpu.memory_space<vmem>>, vector<128x4xf32>,
    %c0_29 = arith.constant 0 : index
    %c0_30 = arith.constant 0 : index
    %39 = vector.load %arg8[%c0_29, %c0_30] : memref<8x64xf32, #tpu.memory_space<vmem>>, vector<8x64xf32>
    %cst_31 = arith.constant dense<0.000000e+00> : vector<8x32xf32>
    %40 = tpu.matmul %39, %37, %cst_31 {dimension_numbers = #tpu.dot_dimension_numbers<[1], [0], [0], [1], [0, 0, 1, 1], [], []>} : vector<8x64xf32>, vector<64x32xf32>, vector<8x32xf32> -> vector<8x32xf32>
    %c0_32 = arith.constant 0 : index
    %c0_33 = arith.constant 0 : index
    %41 = vector.load %arg9[%c0_32, %c0_33] : memref<1x32xf32, #tpu.memory_space<vmem>>, vector<1x32xf32>
    %c0_34 = arith.constant 0 : index
    %c0_35 = arith.constant 0 : index
    %42 = vector.load %arg10[%c0_34, %c0_35] : memref<1x32xf32, #tpu.memory_space<vmem>>, vector<1x32xf32>
    %cst_36 = arith.constant dense<0.000000e+00> : vector<8xf32>
    %43 = vector.multi_reduction <add>, %40, %cst_36 [1] : vector<8x32xf32> to vector<8xf32>
    %44 = vector.shape_cast %43 : vector<8xf32> to vector<8x1xf32>
    %cst_37 = arith.constant 3.200000e+01 : f32
    %45 = vector.broadcast %cst_37 : f32 to vector<8x1xf32>
    %46 = arith.divf %44, %45 : vector<8x1xf32>
    %47 = vector.broadcast %46 : vector<8x1xf32> to vector<8x32xf32>
    %48 = arith.subf %40, %47 : vector<8x32xf32>
    %49 = arith.mulf %48, %48 : vector<8x32xf32>
    %cst_38 = arith.constant dense<0.000000e+00> : vector<8xf32>
    %50 = vector.multi_reduction <add>, %49, %cst_38 [1] : vector<8x32xf32> to vector<8xf32>
    %51 = vector.shape_cast %50 : vector<8xf32> to vector<8x1xf32>
    %cst_39 = arith.constant 3.200000e+01 : f32
    %52 = vector.broadcast %cst_39 : f32 to vector<8x1xf32>
    %53 = arith.divf %51, %52 : vector<8x1xf32>
    %54 = vector.broadcast %46 : vector<8x1xf32> to vector<8x32xf32>
    %55 = arith.subf %40, %54 : vector<8x32xf32>
    %cst_40 = arith.constant 9.99999974E-6 : f32
    %56 = vector.broadcast %cst_40 : f32 to vector<8x1xf32>
    %57 = arith.addf %53, %56 : vector<8x1xf32>
    %58 = math.rsqrt %57 : vector<8x1xf32>
    %59 = vector.broadcast %58 : vector<8x1xf32> to vector<8x32xf32>
    %60 = arith.mulf %55, %59 : vector<8x32xf32>
    %61 = vector.broadcast %41 : vector<1x32xf32> to vector<8x32xf32>
    %62 = arith.mulf %60, %61 : vector<8x32xf32>
    %63 = vector.broadcast %42 : vector<1x32xf32> to vector<8x32xf32>
    %64 = arith.addf %62, %63 : vector<8x32xf32>
    %c0_41 = arith.constant 0 : index
    %c0_42 = arith.constant 0 : index
    %65 = vector.load %arg11[%c0_41, %c0_42] : memref<32x32xf32, #tpu.memory_space<vmem>>, vector<32x32xf32>
    %cst_43 = arith.constant dense<0.000000e+00> : vector<8x32xf32>
    %66 = tpu.matmul %64, %65, %cst_43 {dimension_numbers = #tpu.dot_dimension_numbers<[1], [0], [0], [1], [0, 0, 1, 1], [], []>} : vector<8x32xf32>, vector<32x32xf32>, vector<8x32xf32> -> vector<8x32xf32>
    %c0_44 = arith.constant 0 : index
    %c0_45 = arith.constant 0 : index
    %67 = vector.load %arg12[%c0_44, %c0_45] : memref<1x32xf32, #tpu.memory_space<vmem>>, vector<1x32xf32>
    %68 = vector.broadcast %67 : vector<1x32xf32> to vector<8x32xf32>
    %69 = arith.addf %66, %68 : vector<8x32xf32>
    %70 = math.tanh %69 : vector<8x32xf32>
    %c0_46 = arith.constant 0 : index
    %c0_47 = arith.constant 0 : index
    %71 = vector.load %arg13[%c0_46, %c0_47] : memref<32x16xf32, #tpu.memory_space<vmem>>, vector<32x16xf32>
    %cst_48 = arith.constant dense<0.000000e+00> : vector<8x16xf32>
    %72 = tpu.matmul %70, %71, %cst_48 {dimension_numbers = #tpu.dot_dimension_numbers<[1], [0], [0], [1], [0, 0, 1, 1], [], []>} : vector<8x32xf32>, vector<32x16xf32>, vector<8x16xf32> -> vector<8x16xf32>
    %c0_49 = arith.constant 0 : index
    %c0_50 = arith.constant 0 : index
    %73 = vector.load %arg14[%c0_49, %c0_50] : memref<1x16xf32, #tpu.memory_space<vmem>>, vector<1x16xf32>
    %74 = vector.broadcast %73 : vector<1x16xf32> to vector<8x16xf32>
    %75 = arith.addf %72, %74 : vector<8x16xf32>
    %76 = math.tanh %75 : vector<8x16xf32>
    %c0_51 = arith.constant 0 : index
    %c0_52 = arith.constant 0 : index
    %77 = vector.load %arg15[%c0_51, %c0_52] : memref<16x1xf32, #tpu.memory_space<vmem>>, vector<16x1xf32>
    %cst_53 = arith.constant dense<0.000000e+00> : vector<8x1xf32>
    %78 = tpu.matmul %76, %77, %cst_53 {dimension_numbers = #tpu.dot_dimension_numbers<[1], [0], [0], [1], [0, 0, 1, 1], [], []>} : vector<8x16xf32>, vector<16x1xf32>, vector<8x1xf32> -> vector<8x1xf32>
    %c0_54 = arith.constant 0 : index
    %c0_55 = arith.constant 0 : index
    %79 = vector.load %arg16[%c0_54, %c0_55] : memref<1x1xf32, #tpu.memory_space<vmem>>, vector<1x1xf32>
    %80 = vector.broadcast %79 : vector<1x1xf32> to vector<8x1xf32>
    %81 = arith.addf %78, %80 : vector<8x1xf32>
    %82 = arith.negf %81 : vector<8x1xf32>
    %83 = math.exp %82 : vector<8x1xf32>
    %cst_56 = arith.constant 1.000000e+00 : f32
    %84 = vector.broadcast %cst_56 : f32 to vector<8x1xf32>
    %85 = arith.addf %84, %83 : vector<8x1xf32>
    %86 = arith.divf %84, %85 : vector<8x1xf32>
    %c0_57 = arith.constant 0 : index
    %c0_58 = arith.constant 0 : index
    %87 = vector.load %arg17[%c0_57, %c0_58] : memref<8x1xf32, #tpu.memory_space<vmem>>, vector<8x1xf32>
    tpu.vector_store %arg17[%c0_57, %c0_58], %86 {strides = array<i32>} : memref<8x1xf32, #tpu.memory_space<vmem>>, vector<8x1xf32>,
    return
  }
}

</mosaic_0001>

<bundles_post_ra>
// kernel: predict_model_forward.3
= control target key start
LH: loop header
LB: loop body
LE: loop exit
PB: predicated region body
PF: predicated region fallthrough
CT: control target
= control target key end

     0   :  { %s5567_s13 = smov 0   ;;  %s6584_s0 = inlined_call_operand.vmem [shape: f32[3,64,32], index: 0, kind: input, shape index: {}]   ;;  %s6585_s1 = inlined_call_operand.vmem [shape: f32[3,128,64], index: 1, kind: input, shape index: {}]   ;;  %s6586_s2 = inlined_call_operand.vmem [shape: f32[3,128,64], index: 2, kind: input, shape index: {}]   ;;  %s6587_s3 = inlined_call_operand.vmem [shape: f32[3,64,128], index: 3, kind: input, shape index: {}]   ;;  %s6588_s4 = inlined_call_operand.vmem [shape: f32[1,32], index: 4, kind: input, shape index: {}]   ;;  %s6589_s5 = inlined_call_operand.vmem [shape: f32[1,32], index: 5, kind: input, shape index: {}]   ;;  %s6590_s6 = inlined_call_operand.vmem [shape: f32[2,32,96], index: 6, kind: input, shape index: {}]   ;;  %s6591_s7 = inlined_call_operand.vmem [shape: f32[2,1,96], index: 7, kind: input, shape index: {}]   ;;  %s6592_s8 = inlined_call_operand.vmem [shape: f32[32,4], index: 8, kind: input, shape index: {}]   ;;  %s6593_s9 = inlined_call_operand.vmem [shape: f32[4,32], index: 9, kind: input, shape index: {}]   ;;  %s6594_s10 = inlined_call_operand.vmem [shape: f32[3,64,32], index: 10, kind: output, shape index: {}]  }
   0x1 LB: > { %s3860_s14 = sadd.s32 4294967295, %s5509_s13   ;;  %p3864_p0 = scmp.ge.s32.totalorder %s5509_s13, 1  ;;  %s5509_s13 = sphi %s5567_s13, %s20_s13  }
   0x2   : > { %p342_p1 = scmp.lt.s32.totalorder %s5509_s13, 4 }
   0x4   : > { %p343_p2 = pnand %p3864_p0, %p342_p1 }
   0x5   : > { %p395_p3 = scmp.lt.s32.totalorder (!%p343_p2), %s3860_s14, 2  ;;  %vm475_vm0 = vcmask (!%p343_p2), 261120   ;;  %v609_v56 = vld [vmem:[%s6590_s6] sm:$0xff] (!%p343_p2)  ;;  %v610_v57 = vld [vmem:[%s6590_s6 + $0x8] sm:$0xff] (!%p343_p2)  ;;  %v611_v59 = vld [vmem:[%s6590_s6 + $0x10] sm:$0xff] (!%p343_p2)  ;;  %s5511_s17 = smov (!%p343_p2), 96  }
   0x6   : > { %346 = sbr.rel (%p343_p2) target bundleno = 4264 (0x10a8), region = 60  ;;  %v4979_v58 = vpack.c.bf16 (!%p343_p2), %v610_v57, %v609_v56  ;;  %v612_v60 = vld [vmem:[%s6590_s6 + $0x18] sm:$0xff] (!%p343_p2)  ;;  %vm749_vm1 = vcmask (!%p343_p2), 523264   ;;  %vm1393_vm2 = vcmask (!%p343_p2), 31744   ;;  %vm1841_vm3 = vcmask (!%p343_p2), 1043456  }
   0x7   : > { %v4983_v61 = vpack.c.bf16 (!%p343_p2), %v612_v60, %v611_v59 }
   0x8   : > { %4980 = vmatprep.subr.bf16.mxu0 (!%p343_p2), %v4979_v58 }
   0x9   : > { %4982 = vmatpush3.bf16.msra.mxu0 (!%p343_p2), %v4979_v58 }
   0xa   : > { %4984 = vmatprep.subr.bf16.mxu0 (!%p343_p2), %v4983_v61 }
   0xd   : > { %s6596_s14 = smov (!%p395_p3, %s3860_s14), 2  ;;  %4986 = vmatpush3.bf16.msra.mxu0 %v4983_v61 }
   0xe   : > { %s5578_s15 = sshll.u32 %s6596_s14, 6  ;;  %s4065_s16 = sshll.u32 %s6596_s14, 7 }
   0xf   : > { %s399_s18 = scalar_lea.vmem %s6584_s0, %s5578_s15  ;;  %s5674_s20 = scalar_lea.vmem %s6585_s1, %s4065_s16 }
  0x10   : > { %v420_v0 = vld [vmem:[%s399_s18] sm:$0xff]  ;;  %v422_v1 = vld [vmem:[%s399_s18 + $0x10] sm:$0xff]  ;;  %v421_v2 = vld [vmem:[%s399_s18 + $0x8] sm:$0xff]  ;;  %s5679_s14 = scalar_lea.vmem %s6586_s2, %s4065_s16  ;;  %s5852_s16 = scalar_lea.vmem %s6587_s3, %s5578_s15 }
  0x11   : > { %v476_v3 = vsel %vm475_vm0, %v420_v0, 0.0  ;;  %v482_v4 = vsel %vm475_vm0, %v422_v1, 0.0  ;;  %v423_v5 = vld [vmem:[%s399_s18 + $0x18] sm:$0xff]  ;;  %v479_v6 = vsel %vm475_vm0, %v421_v2, 0.0  ;;  %v424_v8 = vld [vmem:[%s399_s18 + $0x20] sm:$0xff]  ;;  %v425_v9 = vld [vmem:[%s399_s18 + $0x28] sm:$0xff]  ;;  %s419_s21 = scalar_lea.vmem %s6594_s10, %s5578_s15 }
  0x12   : > { %477 = vadd.xlane.f32.xlu0 %v476_v3  ;;  %483 = vadd.xlane.f32.xlu1 %v482_v4  ;;  %v485_v7 = vsel %vm475_vm0, %v423_v5, 0.0  ;;  %v488_v10 = vsel %vm475_vm0, %v424_v8, 0.0  ;;  %v491_v11 = vsel %vm475_vm0, %v425_v9, 0.0  ;;  %v426_v12 = vld [vmem:[%s399_s18 + $0x30] sm:$0xff]  ;;  %v427_v13 = vld [vmem:[%s399_s18 + $0x38] sm:$0xff] }
  0x13   : > { %v494_v14 = vsel %vm475_vm0, %v426_v12, 0.0  ;;  %v497_v15 = vsel %vm475_vm0, %v427_v13, 0.0 }
  0x16   : > { %480 = vadd.xlane.f32.xlu0 %v479_v6  ;;  %486 = vadd.xlane.f32.xlu1 %v485_v7 }
  0x1a   : > { %489 = vadd.xlane.f32.xlu0 %v488_v10  ;;  %492 = vadd.xlane.f32.xlu1 %v491_v11 }
  0x1e   : > { %495 = vadd.xlane.f32.xlu0 %v494_v14  ;;  %498 = vadd.xlane.f32.xlu1 %v497_v15 }
  0x9f   : > { %v478_v16 = vpop.xlane.xlu0 %477  ;;  %v484_v17 = vpop.xlane.xlu1 %483 }
  0xa0   : > { %v501_v18 = vmul.f32 0.03125, %v478_v16  ;;  %v503_v19 = vmul.f32 0.03125, %v484_v17 }
  0xa2   : > { %v5592_v20 = vsub.f32 %v420_v0, %v501_v18  ;;  %v5594_v21 = vsub.f32 %v422_v1, %v503_v19 }
  0xa3   : > { %v481_v22 = vpop.xlane.xlu0 %480  ;;  %v487_v23 = vpop.xlane.xlu1 %486 }
  0xa4   : > { %v502_v24 = vmul.f32 0.03125, %v481_v22  ;;  %v504_v25 = vmul.f32 0.03125, %v487_v23  ;;  %v517_v26 = vmul.f32 %v5592_v20, %v5592_v20  ;;  %v519_v27 = vmul.f32 %v5594_v21, %v5594_v21  ;;  %v3875_v22 = vld [vmem:[%s6588_s4] ss:$0 sm:$0xff] }
  0xa6   : > { %v5600_v28 = vsub.f32 %v421_v2, %v502_v24  ;;  %v5602_v29 = vsub.f32 %v423_v5, %v504_v25  ;;  %v525_v30 = vsel %vm475_vm0, %v517_v26, 0.0  ;;  %v531_v33 = vsel %vm475_vm0, %v519_v27, 0.0  ;;  %v3876_v26 = vld [vmem:[%s6589_s5] ss:$0 sm:$0xff] }
  0xa7   : > { %526 = vadd.xlane.f32.xlu0 %v525_v30  ;;  %v490_v31 = vpop.xlane.xlu0 %489  ;;  %v493_v32 = vpop.xlane.xlu1 %492 }
  0xa8   : > { %v505_v34 = vmul.f32 0.03125, %v490_v31  ;;  %v506_v35 = vmul.f32 0.03125, %v493_v32  ;;  %v518_v36 = vmul.f32 %v5600_v28, %v5600_v28  ;;  %v520_v37 = vmul.f32 %v5602_v29, %v5602_v29 }
  0xaa   : > { %v5610_v38 = vsub.f32 %v424_v8, %v505_v34  ;;  %v5612_v39 = vsub.f32 %v425_v9, %v506_v35  ;;  %v528_v40 = vsel %vm475_vm0, %v518_v36, 0.0  ;;  %v534_v43 = vsel %vm475_vm0, %v520_v37, 0.0 }
  0xab   : > { %532 = vadd.xlane.f32.xlu0 %v531_v33  ;;  %529 = vadd.xlane.f32.xlu1 %v528_v40  ;;  %v496_v41 = vpop.xlane.xlu0 %495  ;;  %v499_v42 = vpop.xlane.xlu1 %498 }
  0xac   : > { %v507_v44 = vmul.f32 0.03125, %v496_v41  ;;  %v508_v45 = vmul.f32 0.03125, %v499_v42  ;;  %v521_v46 = vmul.f32 %v5610_v38, %v5610_v38  ;;  %v522_v47 = vmul.f32 %v5612_v39, %v5612_v39 }
  0xae   : > { %v5620_v48 = vsub.f32 %v426_v12, %v507_v44  ;;  %v5622_v49 = vsub.f32 %v427_v13, %v508_v45  ;;  %v537_v50 = vsel %vm475_vm0, %v521_v46, 0.0  ;;  %v540_v51 = vsel %vm475_vm0, %v522_v47, 0.0 }
  0xaf   : > { %535 = vadd.xlane.f32.xlu1 %v534_v43  ;;  %538 = vadd.xlane.f32.xlu0 %v537_v50 }
  0xb0   : > { %v523_v52 = vmul.f32 %v5620_v48, %v5620_v48  ;;  %v524_v53 = vmul.f32 %v5622_v49, %v5622_v49 }
  0xb2   : > { %v543_v54 = vsel %vm475_vm0, %v523_v52, 0.0  ;;  %v546_v55 = vsel %vm475_vm0, %v524_v53, 0.0 }
  0xb3   : > { %541 = vadd.xlane.f32.xlu1 %v540_v51  ;;  %544 = vadd.xlane.f32.xlu0 %v543_v54 }
  0xb7   : > { %547 = vadd.xlane.f32.xlu1 %v546_v55 }
 0x134   : > { %v527_v62 = vpop.xlane.xlu0 %526 }
 0x135   : > { %v549_v63 = vmul.f32 0.03125, %v527_v62 }
 0x137   : > { %v557_v0 = vadd.f32 1e-05, %v549_v63 }
 0x138   : > { %v530_v1 = vpop.xlane.xlu1 %529  ;;  %v533_v2 = vpop.xlane.xlu0 %532 }
 0x139   : > { %5300 = vrsqrt.f32 %v557_v0  ;;  %v550_v3 = vmul.f32 0.03125, %v530_v1  ;;  %v551_v4 = vmul.f32 0.03125, %v533_v2 }
 0x13b   : > { %v558_v5 = vadd.f32 1e-05, %v550_v3  ;;  %v559_v6 = vadd.f32 1e-05, %v551_v4 }
 0x13c   : > { %v536_v7 = vpop.xlane.xlu1 %535  ;;  %v539_v8 = vpop.xlane.xlu0 %538 }
 0x13d   : > { %5302 = vrsqrt.f32 %v558_v5  ;;  %v552_v9 = vmul.f32 0.03125, %v536_v7  ;;  %v553_v10 = vmul.f32 0.03125, %v539_v8 }
 0x13e   : > { %5304 = vrsqrt.f32 %v559_v6 }
 0x13f   : > { %v560_v11 = vadd.f32 1e-05, %v552_v9  ;;  %v561_v12 = vadd.f32 1e-05, %v553_v10  ;;  %v5683_v9 = vld [vmem:[%s5679_s14] sm:$0xff] }
 0x140   : > { %v542_v13 = vpop.xlane.xlu1 %541  ;;  %v545_v14 = vpop.xlane.xlu0 %544  ;;  %v428_v10 = vld [vmem:[%s5674_s20] sm:$0xff]  ;;  %4443 = vmatprep.mubr.msk.f32.mxu1 %vm749_vm1, %v5683_v9 }
 0x141   : > { %5306 = vrsqrt.f32 %v560_v11  ;;  %v554_v15 = vmul.f32 0.03125, %v542_v13  ;;  %v555_v16 = vmul.f32 0.03125, %v545_v14 }
 0x142   : > { %5308 = vrsqrt.f32 %v561_v12 }
 0x143   : > { %v5301_v17 = vpop.eup %5300  ;;  %v562_v18 = vadd.f32 1e-05, %v554_v15  ;;  %v563_v19 = vadd.f32 1e-05, %v555_v16 }
 0x144   : > { %v548_v23 = vpop.xlane.xlu1 %547  ;;  %v573_v24 = vmul.f32 %v5301_v17, %v5592_v20 }
 0x145   : > { %5310 = vrsqrt.f32 %v562_v18  ;;  %v556_v25 = vmul.f32 0.03125, %v548_v23  ;;  %v5702_v23 = vld [vmem:[%s5679_s14 + $0x18] sm:$0xff] }
 0x146   : > { %5312 = vrsqrt.f32 %v563_v19  ;;  %v587_v27 = vmul.f32 %v3875_v22, %v573_v24  ;;  %v5692_v19 = vld [vmem:[%s5679_s14 + $0x8] sm:$0xff]  ;;  %v5705_v24 = vld [vmem:[%s5679_s14 + $0x20] sm:$0xff] }
 0x147   : > { %v5303_v30 = vpop.eup %5302  ;;  %v564_v31 = vadd.f32 1e-05, %v556_v25  ;;  %v5712_v25 = vld [vmem:[%s5679_s14 + $0x28] sm:$0xff] }
 0x148   : > { %v5305_v32 = vpop.eup %5304  ;;  %v601_v33 = vadd.f32 %v3876_v26, %v587_v27  ;;  %v574_v34 = vmul.f32 %v5303_v30, %v5600_v28  ;;  %v5722_v27 = vld [vmem:[%s5679_s14 + $0x38] sm:$0xff]  ;;  %v5725_v30 = vld [vmem:[%s5679_s14 + $0x40] sm:$0xff] }
 0x149   : > { %5314 = vrsqrt.f32 %v564_v31  ;;  %v575_v35 = vmul.f32 %v5305_v32, %v5594_v21  ;;  %v5732_v31 = vld [vmem:[%s5679_s14 + $0x48] sm:$0xff]  ;;  %v5735_v32 = vld [vmem:[%s5679_s14 + $0x50] sm:$0xff] }
 0x14a   : > { %4415 = vmatprep.mubr.msk.f32.mxu0 %vm475_vm0, %v601_v33  ;;  %v588_v20 = vmul.f32 %v3875_v22, %v574_v34  ;;  %v5742_v33 = vld [vmem:[%s5679_s14 + $0x58] sm:$0xff]  ;;  %v5745_v34 = vld [vmem:[%s5679_s14 + $0x60] sm:$0xff] }
 0x14b   : > { %v5307_v36 = vpop.eup %5306  ;;  %v589_v37 = vmul.f32 %v3875_v22, %v575_v35  ;;  %v470_v35 = vld [vmem:[%s6592_s8] sm:$0xff] }
 0x14c   : > { %v5309_v40 = vpop.eup %5308  ;;  %v602_v41 = vadd.f32 %v3876_v26, %v588_v20  ;;  %v576_v42 = vmul.f32 %v5307_v36, %v5602_v29  ;;  %v471_v20 = vld [vmem:[%s6592_s8 + $0x8] sm:$0xff]  ;;  %v472_v36 = vld [vmem:[%s6592_s8 + $0x10] sm:$0xff] }
 0x14d   : > { %v603_v43 = vadd.f32 %v3876_v26, %v589_v37  ;;  %v577_v44 = vmul.f32 %v5309_v40, %v5610_v38  ;;  %v5758_v37 = vpack.c.bf16 %v471_v20, %v470_v35  ;;  %v473_v40 = vld [vmem:[%s6592_s8 + $0x18] sm:$0xff] }
 0x14e   : > { %4416 = vmatmul.mubr.msk.f32.vlgmr.msra.gmra.mrb[0].mxu0 %vm475_vm0, %v602_v41  ;;  %v590_v45 = vmul.f32 %v3875_v22, %v576_v42  ;;  %v5766_v41 = vld [vmem:[%s5679_s14 + $0x68] sm:$0xff]  ;;  %v5768_v42 = vpack.c.bf16 %v473_v40, %v472_v36 }
 0x14f   : > { %v5311_v46 = vpop.eup %5310  ;;  %4418 = vmatprep.mubr.msk.f32.mxu0 %vm475_vm0, %v603_v43  ;;  %v591_v28 = vmul.f32 %v3875_v22, %v577_v44  ;;  %v5771_v43 = vld [vmem:[%s5679_s14 + $0x70] sm:$0xff]  ;;  %v5781_v44 = vld [vmem:[%s5679_s14 + $0x78] sm:$0xff] }
 0x150   : > { %v5313_v21 = vpop.eup %5312  ;;  %v604_v47 = vadd.f32 %v3876_v26, %v590_v45  ;;  %v578_v50 = vmul.f32 %v5311_v46, %v5612_v39 }
 0x151   : > { %v605_v51 = vadd.f32 %v3876_v26, %v591_v28  ;;  %v579_v52 = vmul.f32 %v5313_v21, %v5620_v48  ;;  %v3877_v48 = vld [vmem:[%s6591_s7] ss:$0 sm:$0xff] }
 0x152   : > { %4419 = vmatmul.mubr.msk.f32.gmra.mrb[2].mxu0 %vm475_vm0, %v604_v47  ;;  %v592_v29 = vmul.f32 %v3875_v22, %v578_v50 }
 0x153   : > { %v5315_v53 = vpop.eup %5314  ;;  %4421 = vmatprep.mubr.msk.f32.mxu0 %vm475_vm0, %v605_v51  ;;  %v593_v38 = vmul.f32 %v3875_v22, %v579_v52 }
 0x154   : > { %v606_v54 = vadd.f32 %v3876_v26, %v592_v29  ;;  %v580_v55 = vmul.f32 %v5315_v53, %v5622_v49 }
 0x155   : > { %v607_v56 = vadd.f32 %v3876_v26, %v593_v38 }
 0x156   : > { %4422 = vmatmul.mubr.msk.f32.gmra.mrb[4].mxu0 %vm475_vm0, %v606_v54  ;;  %v594_v57 = vmul.f32 %v3875_v22, %v580_v55  ;;  %v5695_v22 = vld [vmem:[%s5679_s14 + $0x10] sm:$0xff] }
 0x157   : > { %4424 = vmatprep.mubr.msk.f32.mxu0 %vm475_vm0, %v607_v56 }
 0x158   : > { %v608_v39 = vadd.f32 %v3876_v26, %v594_v57  ;;  %v5715_v26 = vld [vmem:[%s5679_s14 + $0x30] sm:$0xff] }
 0x15a   : > { %4425 = vmatmul.mubr.msk.f32.gmra.mrb[6].mxu0 %vm475_vm0, %v608_v39 }
 0x15b   : > { %4483 = vmatprep.mubr.msk.f32.mxu0 %vm749_vm1, %v428_v10 }
 0x221   : > { %v4417_v58 = vpop.f32.mrb[0].mxu0 }
 0x222   : > { %v716_v59 = vadd.f32 %v4417_v58, %v3877_v48  ;;  %v710_v60 = vpop.f32.mrb[1].mxu0  ;;  %v430_v58 = vld [vmem:[%s5674_s20 + $0x10] sm:$0xff] }
 0x223   : > { %v711_v61 = vadd.f32 %v3877_v48, %v710_v60  ;;  %v432_v60 = vld [vmem:[%s5674_s20 + $0x20] sm:$0xff] }
 0x225   : > { %v5260_v62 = vpack.i.bf16 %v716_v59, %v711_v61  ;;  %v4420_v49 = vpop.f32.mrb[2].mxu0  ;;  %v4987_v63 = vpack.c.bf16 %v716_v59, %v711_v61  ;;  %v431_v59 = vld [vmem:[%s5674_s20 + $0x18] sm:$0xff]  ;;  %v433_v61 = vld [vmem:[%s5674_s20 + $0x28] sm:$0xff] }
 0x226   : > { %v726_v0 = vadd.f32 %v4420_v49, %v3877_v48  ;;  %v720_v1 = vpop.f32.mrb[3].mxu0  ;;  %v435_v49 = vld [vmem:[%s5674_s20 + $0x38] sm:$0xff] }
 0x227   : > { %v721_v2 = vadd.f32 %v3877_v48, %v720_v1  ;;  %5261 = vrot.lane.b32.xlu0 %v5260_v62, %s5511_s17  ;;  %4988 = vmatprep.subr.bf16.mxu1 %v4987_v63  ;;  %v434_v62 = vld [vmem:[%s5674_s20 + $0x30] sm:$0xff] }
 0x228   : > { %4990 = vmatpush3.bf16.msra.mxu1 %v4987_v63  ;;  %v436_v63 = vld [vmem:[%s5674_s20 + $0x40] sm:$0xff]  ;;  %v438_v1 = vld [vmem:[%s5674_s20 + $0x50] sm:$0xff] }
 0x229   : > { %v5265_v3 = vpack.i.bf16 %v726_v0, %v721_v2  ;;  %v4991_v4 = vpack.c.bf16 %v726_v0, %v721_v2  ;;  %v4423_v5 = vpop.f32.mrb[4].mxu0  ;;  %v437_v0 = vld [vmem:[%s5674_s20 + $0x48] sm:$0xff]  ;;  %v439_v2 = vld [vmem:[%s5674_s20 + $0x58] sm:$0xff] }
 0x22a   : > { %v736_v6 = vadd.f32 %v4423_v5, %v3877_v48  ;;  %v730_v7 = vpop.f32.mrb[5].mxu0  ;;  %v442_v5 = vld [vmem:[%s5674_s20 + $0x70] sm:$0xff] }
 0x22b   : > { %v731_v8 = vadd.f32 %v3877_v48, %v730_v7  ;;  %5266 = vrot.lane.b32.xlu1 %v5265_v3, %s5511_s17  ;;  %4992 = vmatprep.subr.bf16.mxu1 %v4991_v4  ;;  %v440_v3 = vld [vmem:[%s5674_s20 + $0x60] sm:$0xff] }
 0x22c   : > { %4994 = vmatpush3.bf16.msra.mxu1 %v4991_v4  ;;  %v441_v4 = vld [vmem:[%s5674_s20 + $0x68] sm:$0xff] }
 0x22d   : > { %v5270_v11 = vpack.i.bf16 %v736_v6, %v731_v8  ;;  %v4995_v12 = vpack.c.bf16 %v736_v6, %v731_v8  ;;  %v4426_v13 = vpop.f32.mrb[6].mxu0  ;;  %v443_v6 = vld [vmem:[%s5674_s20 + $0x78] sm:$0xff] }
 0x22e   : > { %v746_v14 = vadd.f32 %v4426_v13, %v3877_v48  ;;  %v740_v15 = vpop.f32.mrb[7].mxu0 }
 0x22f   : > { %v741_v16 = vadd.f32 %v3877_v48, %v740_v15  ;;  %5271 = vrot.lane.b32.xlu1 %v5270_v11, %s5511_s17  ;;  %4996 = vmatprep.subr.bf16.mxu1 %v4995_v12  ;;  %v429_v48 = vld [vmem:[%s5674_s20 + $0x8] sm:$0xff] }
 0x230   : > { %4998 = vmatpush3.bf16.msra.mxu1 %v4995_v12 }
 0x231   : > { %v5275_v17 = vpack.i.bf16 %v746_v14, %v741_v16  ;;  %v4999_v18 = vpack.c.bf16 %v746_v14, %v741_v16 }
 0x233   : > { %5276 = vrot.lane.b32.xlu1 %v5275_v17, %s5511_s17  ;;  %5000 = vmatprep.subr.bf16.mxu1 %v4999_v18 }
 0x234   : > { %5002 = vmatpush3.bf16.msra.mxu1 %v4999_v18 }
 0x235   : > { %5020 = vmatprep.subr.bf16.mxu1 %v5758_v37 }
 0x237   : > { %4444 = vmatmul.mubr.msk.f32.vlgmr.msra.gmra.mrb[0].mxu1 %vm749_vm1, %v5692_v19 }
 0x238   : > { %4446 = vmatprep.mubr.msk.f32.mxu1 %vm749_vm1, %v5695_v22  ;;  %5022 = vmatpush3.bf16.msra.mxu1 %v5758_v37 }
 0x239   : > { %5024 = vmatprep.subr.bf16.mxu1 %v5768_v42 }
 0x23b   : > { %4447 = vmatmul.mubr.msk.f32.gmra.mrb[2].mxu1 %vm749_vm1, %v5702_v23 }
 0x23c   : > { %4449 = vmatprep.mubr.msk.f32.mxu1 %vm749_vm1, %v5705_v24  ;;  %5026 = vmatpush3.bf16.msra.mxu1 %v5768_v42 }
 0x23f   : > { %4450 = vmatmul.mubr.msk.f32.gmra.mrb[4].mxu1 %vm749_vm1, %v5712_v25 }
 0x240   : > { %4452 = vmatprep.mubr.msk.f32.mxu1 %vm749_vm1, %v5715_v26 }
 0x243   : > { %4453 = vmatmul.mubr.msk.f32.gmra.mrb[6].mxu1 %vm749_vm1, %v5722_v27 }
 0x244   : > { %4455 = vmatprep.mubr.msk.f32.mxu1 %vm749_vm1, %v5725_v30 }
 0x247   : > { %4456 = vmatmul.mubr.msk.f32.gmra.mrb[8].mxu1 %vm749_vm1, %v5732_v31 }
 0x248   : > { %4458 = vmatprep.mubr.msk.f32.mxu1 %vm749_vm1, %v5735_v32 }
 0x24b   : > { %4459 = vmatmul.mubr.msk.f32.gmra.mrb[10].mxu1 %vm749_vm1, %v5742_v33 }
 0x24c   : > { %4461 = vmatprep.mubr.msk.f32.mxu1 %vm749_vm1, %v5745_v34 }
 0x24f   : > { %4462 = vmatmul.mubr.msk.f32.gmra.mrb[12].mxu1 %vm749_vm1, %v5766_v41 }
 0x250   : > { %4464 = vmatprep.mubr.msk.f32.mxu1 %vm749_vm1, %v5771_v43 }
 0x253   : > { %4465 = vmatmul.mubr.msk.f32.gmra.mrb[14].mxu1 %vm749_vm1, %v5781_v44 }
 0x299   : > { %v5262_v45 = vpop.permute.xlu0 %5261 }
 0x29a   : > { %v5264_v46 = vunpack.i.h.bf16 %v5262_v45  ;;  %v5263_v28 = vunpack.i.l.bf16 %v5262_v45 }
 0x29c   : > { %v5003_v21 = vpack.c.bf16 %v5264_v46, %v5263_v28 }
 0x29d   : > { %v5267_v47 = vpop.permute.xlu1 %5266 }
 0x29e   : > { %v5269_v50 = vunpack.i.h.bf16 %v5267_v47  ;;  %v5268_v51 = vunpack.i.l.bf16 %v5267_v47  ;;  %5004 = vmatprep.subr.bf16.mxu0 %v5003_v21 }
 0x29f   : > { %5006 = vmatpush3.bf16.msra.mxu0 %v5003_v21 }
 0x2a0   : > { %v5007_v52 = vpack.c.bf16 %v5269_v50, %v5268_v51 }
 0x2a1   : > { %v5272_v29 = vpop.permute.xlu1 %5271 }
 0x2a2   : > { %v5274_v53 = vunpack.i.h.bf16 %v5272_v29  ;;  %v5273_v38 = vunpack.i.l.bf16 %v5272_v29  ;;  %5008 = vmatprep.subr.bf16.mxu0 %v5007_v52 }
 0x2a3   : > { %5010 = vmatpush3.bf16.msra.mxu0 %v5007_v52 }
 0x2a4   : > { %v5011_v54 = vpack.c.bf16 %v5274_v53, %v5273_v38 }
 0x2a5   : > { %v5277_v55 = vpop.permute.xlu1 %5276 }
 0x2a6   : > { %v5279_v56 = vunpack.i.h.bf16 %v5277_v55  ;;  %v5278_v57 = vunpack.i.l.bf16 %v5277_v55  ;;  %5012 = vmatprep.subr.bf16.mxu0 %v5011_v54 }
 0x2a7   : > { %5014 = vmatpush3.bf16.msra.mxu0 %v5011_v54 }
 0x2a8   : > { %v5015_v39 = vpack.c.bf16 %v5279_v56, %v5278_v57 }
 0x2aa   : > { %5016 = vmatprep.subr.bf16.mxu0 %v5015_v39 }
 0x2ab   : > { %5018 = vmatpush3.bf16.msra.mxu0 %v5015_v39 }
 0x2ae   : > { %4484 = vmatmul.mubr.msk.f32.vlgmr.msra.gmra.mrb[8].mxu0 %vm749_vm1, %v429_v48 }
 0x2af   : > { %4486 = vmatprep.mubr.msk.f32.mxu0 %vm749_vm1, %v430_v58 }
 0x2b2   : > { %4487 = vmatmul.mubr.msk.f32.gmra.mrb[10].mxu0 %vm749_vm1, %v431_v59 }
 0x2b3   : > { %4489 = vmatprep.mubr.msk.f32.mxu0 %vm749_vm1, %v432_v60 }
 0x2b6   : > { %4490 = vmatmul.mubr.msk.f32.gmra.mrb[12].mxu0 %vm749_vm1, %v433_v61 }
 0x2b7   : > { %4492 = vmatprep.mubr.msk.f32.mxu0 %vm749_vm1, %v434_v62 }
 0x2ba   : > { %4493 = vmatmul.mubr.msk.f32.gmra.mrb[14].mxu0 %vm749_vm1, %v435_v49 }
 0x2bb   : > { %4495 = vmatprep.mubr.msk.f32.mxu0 %vm749_vm1, %v436_v63 }
 0x2be   : > { %4496 = vmatmul.mubr.msk.f32.gmra.mrb[16].mxu0 %vm749_vm1, %v437_v0 }
 0x2bf   : > { %4498 = vmatprep.mubr.msk.f32.mxu0 %vm749_vm1, %v438_v1 }
 0x2c2   : > { %4499 = vmatmul.mubr.msk.f32.gmra.mrb[18].mxu0 %vm749_vm1, %v439_v2 }
 0x2c3   : > { %4501 = vmatprep.mubr.msk.f32.mxu0 %vm749_vm1, %v440_v3 }
 0x2c6   : > { %4502 = vmatmul.mubr.msk.f32.gmra.mrb[20].mxu0 %vm749_vm1, %v441_v4 }
 0x2c7   : > { %4504 = vmatprep.mubr.msk.f32.mxu0 %vm749_vm1, %v442_v5 }
 0x2ca   : > { %4505 = vmatmul.mubr.msk.f32.gmra.mrb[22].mxu0 %vm749_vm1, %v443_v6 }
 0x30a   : > { %v4445_v7 = vpop.f32.mrb[0].mxu1 }
 0x30b   : > { %v864_v8 = vpop.f32.mrb[1].mxu1 }
 0x30e   : > { %v4448_v10 = vpop.f32.mrb[2].mxu1 }
 0x30f   : > { %v874_v11 = vpop.f32.mrb[3].mxu1 }
 0x312   : > { %v4451_v12 = vpop.f32.mrb[4].mxu1 }
 0x313   : > { %v884_v13 = vpop.f32.mrb[5].mxu1 }
 0x316   : > { %v4454_v14 = vpop.f32.mrb[6].mxu1 }
 0x317   : > { %v894_v15 = vpop.f32.mrb[7].mxu1 }
 0x31a   : > { %v4457_v16 = vpop.f32.mrb[8].mxu1 }
 0x31b   : > { %v904_v17 = vpop.f32.mrb[9].mxu1 }
 0x31e   : > { %v4460_v18 = vpop.f32.mrb[10].mxu1 }
 0x31f   : > { %v914_v35 = vpop.f32.mrb[11].mxu1 }
 0x322   : > { %v4463_v20 = vpop.f32.mrb[12].mxu1 }
 0x323   : > { %v924_v36 = vpop.f32.mrb[13].mxu1 }
 0x326   : > { %v4466_v40 = vpop.f32.mrb[14].mxu1 }
 0x327   : > { %v934_v45 = vpop.f32.mrb[15].mxu1 }
 0x381   : > { %v4485_v46 = vpop.f32.mrb[8].mxu0 }
 0x382   : > { %v1169_v28 = vmul.f32 %v4485_v46, %v4445_v7  ;;  %2008 = vrot.lane.b32.xlu1 %v4485_v46, %s5511_s17  ;;  %v1089_v21 = vpop.f32.mrb[9].mxu0 }
 0x383   : > { %v1168_v47 = vmul.f32 %v1089_v21, %v864_v8  ;;  %2006 = vrot.lane.b32.xlu0 %v1089_v21, %s5511_s17 }
 0x385   : > { %v4488_v50 = vpop.f32.mrb[10].mxu0  ;;  %4515 = vmatprep.mubr.msk.f32.mxu1 %vm475_vm0, %v1168_v47 }
 0x386   : > { %v1171_v51 = vmul.f32 %v4488_v50, %v4448_v10  ;;  %4516 = vmatmul.mubr.msk.f32.vlgmr.msra.gmra.mrb[16].mxu1 %vm475_vm0, %v1169_v28  ;;  %2012 = vrot.lane.b32.xlu1 %v4488_v50, %s5511_s17  ;;  %v1099_v52 = vpop.f32.mrb[11].mxu0  ;;  %v5855_v10 = vld [vmem:[%s5852_s16] sm:$0xff] }
 0x387   : > { %v1170_v29 = vmul.f32 %v1099_v52, %v874_v11  ;;  %2010 = vrot.lane.b32.xlu0 %v1099_v52, %s5511_s17  ;;  %4571 = vmatprep.mubr.f32.mxu0 %v5855_v10 }
 0x389   : > { %v4491_v53 = vpop.f32.mrb[12].mxu0  ;;  %4518 = vmatprep.mubr.msk.f32.mxu1 %vm475_vm0, %v1170_v29 }
 0x38a   : > { %v1173_v38 = vmul.f32 %v4491_v53, %v4451_v12  ;;  %4519 = vmatmul.mubr.msk.f32.gmra.mrb[18].mxu1 %vm475_vm0, %v1171_v51  ;;  %2016 = vrot.lane.b32.xlu1 %v4491_v53, %s5511_s17  ;;  %v1109_v54 = vpop.f32.mrb[13].mxu0 }
 0x38b   : > { %v1172_v55 = vmul.f32 %v1109_v54, %v884_v13  ;;  %2014 = vrot.lane.b32.xlu0 %v1109_v54, %s5511_s17 }
 0x38d   : > { %v4494_v56 = vpop.f32.mrb[14].mxu0  ;;  %4521 = vmatprep.mubr.msk.f32.mxu1 %vm475_vm0, %v1172_v55 }
 0x38e   : > { %v1175_v57 = vmul.f32 %v4494_v56, %v4454_v14  ;;  %4522 = vmatmul.mubr.msk.f32.gmra.mrb[20].mxu1 %vm475_vm0, %v1173_v38  ;;  %2020 = vrot.lane.b32.xlu1 %v4494_v56, %s5511_s17  ;;  %v1119_v39 = vpop.f32.mrb[15].mxu0 }
 0x38f   : > { %v1174_v48 = vmul.f32 %v1119_v39, %v894_v15  ;;  %2018 = vrot.lane.b32.xlu0 %v1119_v39, %s5511_s17 }
 0x391   : > { %v4497_v58 = vpop.f32.mrb[16].mxu0  ;;  %4524 = vmatprep.mubr.msk.f32.mxu1 %vm475_vm0, %v1174_v48 }
 0x392   : > { %v1177_v59 = vmul.f32 %v4497_v58, %v4457_v16  ;;  %4525 = vmatmul.mubr.msk.f32.gmra.mrb[22].mxu1 %vm475_vm0, %v1175_v57  ;;  %2024 = vrot.lane.b32.xlu1 %v4497_v58, %s5511_s17  ;;  %v1129_v60 = vpop.f32.mrb[17].mxu0 }
 0x393   : > { %v1176_v61 = vmul.f32 %v1129_v60, %v904_v17  ;;  %2022 = vrot.lane.b32.xlu0 %v1129_v60, %s5511_s17 }
 0x395   : > { %v4500_v62 = vpop.f32.mrb[18].mxu0  ;;  %4527 = vmatprep.mubr.msk.f32.mxu1 %vm475_vm0, %v1176_v61 }
 0x396   : > { %v1179_v49 = vmul.f32 %v4500_v62, %v4460_v18  ;;  %4528 = vmatmul.mubr.msk.f32.gmra.mrb[24].mxu1 %vm475_vm0, %v1177_v59  ;;  %2028 = vrot.lane.b32.xlu1 %v4500_v62, %s5511_s17  ;;  %v1139_v63 = vpop.f32.mrb[19].mxu0 }
 0x397   : > { %v1178_v0 = vmul.f32 %v1139_v63, %v914_v35  ;;  %2026 = vrot.lane.b32.xlu0 %v1139_v63, %s5511_s17 }
 0x399   : > { %v4503_v1 = vpop.f32.mrb[20].mxu0  ;;  %4530 = vmatprep.mubr.msk.f32.mxu1 %vm475_vm0, %v1178_v0 }
 0x39a   : > { %v1181_v2 = vmul.f32 %v4503_v1, %v4463_v20  ;;  %4531 = vmatmul.mubr.msk.f32.gmra.mrb[26].mxu1 %vm475_vm0, %v1179_v49  ;;  %2032 = vrot.lane.b32.xlu1 %v4503_v1, %s5511_s17  ;;  %v1149_v3 = vpop.f32.mrb[21].mxu0 }
 0x39b   : > { %v1180_v4 = vmul.f32 %v1149_v3, %v924_v36  ;;  %2030 = vrot.lane.b32.xlu0 %v1149_v3, %s5511_s17 }
 0x39d   : > { %v4506_v5 = vpop.f32.mrb[22].mxu0  ;;  %4533 = vmatprep.mubr.msk.f32.mxu1 %vm475_vm0, %v1180_v4 }
 0x39e   : > { %v1183_v6 = vmul.f32 %v4506_v5, %v4466_v40  ;;  %4534 = vmatmul.mubr.msk.f32.gmra.mrb[28].mxu1 %vm475_vm0, %v1181_v2  ;;  %2036 = vrot.lane.b32.xlu1 %v4506_v5, %s5511_s17  ;;  %v1159_v7 = vpop.f32.mrb[23].mxu0 }
 0x39f   : > { %v1182_v8 = vmul.f32 %v1159_v7, %v934_v45  ;;  %2034 = vrot.lane.b32.xlu0 %v1159_v7, %s5511_s17 }
 0x3a1   : > { %4536 = vmatprep.mubr.msk.f32.mxu1 %vm475_vm0, %v1182_v8 }
 0x3a2   : > { %4537 = vmatmul.mubr.msk.f32.gmra.mrb[30].mxu1 %vm475_vm0, %v1183_v6 }
 0x459   : > { %v4517_v11 = vpop.f32.mrb[16].mxu1 }
 0x45a   : > { %v1298_v12 = vpop.f32.mrb[17].mxu1  ;;  %v5858_v15 = vmul.f32 0.35355338, %v4517_v11 }
 0x45b   : > { %v5860_v16 = vmul.f32 0.35355338, %v1298_v12 }
 0x45c   : > { %v1395_v36 = vsel %vm1393_vm2, %v5858_v15, -inf }
 0x45d   : > { %v4520_v13 = vpop.f32.mrb[18].mxu1  ;;  %v1394_v46 = vsel %vm1393_vm2, %v5860_v16, -inf }
 0x45e   : > { %v1308_v14 = vpop.f32.mrb[19].mxu1  ;;  %v5868_v40 = vmul.f32 0.35355338, %v4520_v13 }
 0x45f   : > { %v5874_v28 = vmul.f32 0.35355338, %v1308_v14 }
 0x460   : > { %v1397_v38 = vsel %vm1393_vm2, %v5868_v40, -inf }
 0x461   : > { %v4523_v17 = vpop.f32.mrb[20].mxu1  ;;  %v1396_v55 = vsel %vm1393_vm2, %v5874_v28, -inf }
 0x462   : > { %v5862_v18 = vmul.f32 0.35355338, %v4523_v17  ;;  %v1318_v35 = vpop.f32.mrb[21].mxu1 }
 0x463   : > { %v5864_v20 = vmul.f32 0.35355338, %v1318_v35 }
 0x464   : > { %v1400_v45 = vsel %vm1393_vm2, %v5862_v18, -inf }
 0x465   : > { %v1401_v21 = vmax.f32 %v1395_v36, %v1400_v45  ;;  %v1398_v47 = vsel %vm1393_vm2, %v5864_v20, -inf  ;;  %v4526_v50 = vpop.f32.mrb[22].mxu1 }
 0x466   : > { %v1399_v51 = vmax.f32 %v1394_v46, %v1398_v47  ;;  %v5878_v52 = vmul.f32 0.35355338, %v4526_v50  ;;  %v1328_v29 = vpop.f32.mrb[23].mxu1 }
 0x467   : > { %v5880_v53 = vmul.f32 0.35355338, %v1328_v29 }
 0x468   : > { %v1404_v54 = vsel %vm1393_vm2, %v5878_v52, -inf }
 0x469   : > { %v1405_v56 = vmax.f32 %v1397_v38, %v1404_v54  ;;  %v1402_v57 = vsel %vm1393_vm2, %v5880_v53, -inf  ;;  %v4529_v39 = vpop.f32.mrb[24].mxu1 }
 0x46a   : > { %v1403_v48 = vmax.f32 %v1396_v55, %v1402_v57  ;;  %v5890_v58 = vmul.f32 0.35355338, %v4529_v39  ;;  %v1338_v59 = vpop.f32.mrb[25].mxu1 }
 0x46b   : > { %v5892_v60 = vmul.f32 0.35355338, %v1338_v59 }
 0x46c   : > { %v1408_v61 = vsel %vm1393_vm2, %v5890_v58, -inf }
 0x46d   : > { %v1409_v62 = vmax.f32 %v1401_v21, %v1408_v61  ;;  %v1406_v49 = vsel %vm1393_vm2, %v5892_v60, -inf  ;;  %v4532_v63 = vpop.f32.mrb[26].mxu1 }
 0x46e   : > { %v1407_v0 = vmax.f32 %v1399_v51, %v1406_v49  ;;  %v5898_v1 = vmul.f32 0.35355338, %v4532_v63  ;;  %v1348_v2 = vpop.f32.mrb[27].mxu1 }
 0x46f   : > { %v5900_v3 = vmul.f32 0.35355338, %v1348_v2 }
 0x470   : > { %v1412_v4 = vsel %vm1393_vm2, %v5898_v1, -inf }
 0x471   : > { %v1413_v5 = vmax.f32 %v1405_v56, %v1412_v4  ;;  %v1410_v6 = vsel %vm1393_vm2, %v5900_v3, -inf  ;;  %v4535_v7 = vpop.f32.mrb[28].mxu1 }
 0x472   : > { %v1411_v8 = vmax.f32 %v1403_v48, %v1410_v6  ;;  %v5906_v11 = vmul.f32 0.35355338, %v4535_v7  ;;  %v1358_v12 = vpop.f32.mrb[29].mxu1 }
 0x473   : > { %v5908_v13 = vmul.f32 0.35355338, %v1358_v12 }
 0x474   : > { %v1416_v14 = vsel %vm1393_vm2, %v5906_v11, -inf }
 0x475   : > { %v1417_v17 = vmax.f32 %v1409_v62, %v1416_v14  ;;  %v1414_v35 = vsel %vm1393_vm2, %v5908_v13, -inf  ;;  %v4538_v36 = vpop.f32.mrb[30].mxu1 }
 0x476   : > { %v1415_v45 = vmax.f32 %v1407_v0, %v1414_v35  ;;  %v5914_v46 = vmul.f32 0.35355338, %v4538_v36  ;;  %v1368_v21 = vpop.f32.mrb[31].mxu1 }
 0x477   : > { %v5916_v47 = vmul.f32 0.35355338, %v1368_v21 }
 0x478   : > { %v1422_v50 = vmax.f32 %v1415_v45, %v1417_v17  ;;  %v1420_v51 = vsel %vm1393_vm2, %v5914_v46, -inf }
 0x479   : > { %v1421_v29 = vmax.f32 %v1413_v5, %v1420_v51  ;;  %v1418_v38 = vsel %vm1393_vm2, %v5916_v47, -inf }
 0x47a   : > { %v1419_v54 = vmax.f32 %v1411_v8, %v1418_v38 }
 0x47c   : > { %v1423_v55 = vmax.f32 %v1419_v54, %v1421_v29 }
 0x47e   : > { %v1424_v56 = vmax.f32 %v1422_v50, %v1423_v55 }
 0x480   : > { %v1425_v57 = vrot.slane %v1424_v56, 4 }
 0x482   : > { %v1426_v39 = vmax.f32 %v1424_v56, %v1425_v57 }
 0x484   : > { %v1427_v48 = vrot.slane %v1426_v39, 2 }
 0x486   : > { %v1428_v59 = vmax.f32 %v1426_v39, %v1427_v48 }
 0x488   : > { %v1429_v61 = vrot.slane %v1428_v59, 1 }
 0x48a   : > { %v1430_v62 = vmax.f32 %v1428_v59, %v1429_v61 }
 0x48c   : > { %v1445_v49 = vsub.f32 %v5916_v47, %v1430_v62  ;;  %v1431_v63 = vsub.f32 %v5860_v16, %v1430_v62  ;;  %v1432_v0 = vsub.f32 %v5858_v15, %v1430_v62  ;;  %v1433_v2 = vsub.f32 %v5874_v28, %v1430_v62 }
 0x48d   : > { %v1434_v4 = vsub.f32 %v5868_v40, %v1430_v62  ;;  %v1435_v5 = vsub.f32 %v5864_v20, %v1430_v62  ;;  %v1436_v6 = vsub.f32 %v5862_v18, %v1430_v62  ;;  %v1437_v7 = vsub.f32 %v5880_v53, %v1430_v62 }
 0x48e   : > { %v1447_v8 = vmul.f32 1.442695, %v1431_v63  ;;  %v1449_v12 = vmul.f32 1.442695, %v1432_v0  ;;  %v1438_v14 = vsub.f32 %v5878_v52, %v1430_v62  ;;  %v1451_v17 = vmul.f32 1.442695, %v1433_v2 }
 0x48f   : > { %v1439_v35 = vsub.f32 %v5892_v60, %v1430_v62  ;;  %v1453_v16 = vmul.f32 1.442695, %v1434_v4  ;;  %v1455_v36 = vmul.f32 1.442695, %v1435_v5  ;;  %v1457_v15 = vmul.f32 1.442695, %v1436_v6 }
 0x490   : > { %5316 = vpow2.f32 %v1447_v8  ;;  %v1440_v28 = vsub.f32 %v5890_v58, %v1430_v62  ;;  %v1441_v40 = vsub.f32 %v5900_v3, %v1430_v62  ;;  %v1442_v18 = vsub.f32 %v5898_v1, %v1430_v62 }
 0x491   : > { %5318 = vpow2.f32 %v1449_v12  ;;  %v1443_v20 = vsub.f32 %v5908_v13, %v1430_v62  ;;  %v1444_v53 = vsub.f32 %v5906_v11, %v1430_v62  ;;  %v1446_v52 = vsub.f32 %v5914_v46, %v1430_v62 }
 0x492   : > { %5320 = vpow2.f32 %v1451_v17  ;;  %v1459_v60 = vmul.f32 1.442695, %v1437_v7  ;;  %v1461_v45 = vmul.f32 1.442695, %v1438_v14  ;;  %v1463_v21 = vmul.f32 1.442695, %v1439_v35 }
 0x493   : > { %5322 = vpow2.f32 %v1453_v16  ;;  %v1465_v58 = vmul.f32 1.442695, %v1440_v28  ;;  %v1467_v13 = vmul.f32 1.442695, %v1441_v40  ;;  %v1469_v50 = vmul.f32 1.442695, %v1442_v18 }
 0x494   : > { %5324 = vpow2.f32 %v1455_v36  ;;  %v1471_v54 = vmul.f32 1.442695, %v1443_v20  ;;  %v1473_v55 = vmul.f32 1.442695, %v1444_v53  ;;  %v1475_v48 = vmul.f32 1.442695, %v1445_v49 }
 0x495   : > { %5326 = vpow2.f32 %v1457_v15  ;;  %v1477_v59 = vmul.f32 1.442695, %v1446_v52  ;;  %v5987_v17 = vld [vmem:[%s5852_s16 + $0x8] sm:$0xff]  ;;  %v5990_v35 = vld [vmem:[%s5852_s16 + $0x10] sm:$0xff]  ;;  %v5995_v16 = vld [vmem:[%s5852_s16 + $0x18] sm:$0xff] }
 0x496   : > { %5328 = vpow2.f32 %v1459_v60  ;;  %v5998_v36 = vld [vmem:[%s5852_s16 + $0x20] sm:$0xff]  ;;  %v6003_v15 = vld [vmem:[%s5852_s16 + $0x28] sm:$0xff]  ;;  %v6006_v28 = vld [vmem:[%s5852_s16 + $0x30] sm:$0xff] }
 0x497   : > { %5330 = vpow2.f32 %v1461_v45  ;;  %v6011_v40 = vld [vmem:[%s5852_s16 + $0x38] sm:$0xff]  ;;  %v6019_v18 = vld [vmem:[%s6593_s9] sm:$0xf] }
 0x498   : > { %5332 = vpow2.f32 %v1463_v21  ;;  %4623 = vmatprep.subr.msk.mxu1 %vm1841_vm3, %v6019_v18 }
 0x499   : > { %5334 = vpow2.f32 %v1465_v58  ;;  %4624 = vmatpush3.msk.msra.mxu1 %vm1841_vm3, %v6019_v18 }
 0x49a   : > { %v5938_v3 = vpop.eup %5316  ;;  %5336 = vpow2.f32 %v1467_v13 }
 0x49b   : > { %v5940_v47 = vpop.eup %5318  ;;  %5338 = vpow2.f32 %v1469_v50 }
 0x49c   : > { %v5942_v1 = vpop.eup %5320  ;;  %v5027_v11 = vpack.c.bf16 %v5940_v47, %v5938_v3  ;;  %5340 = vpow2.f32 %v1471_v54 }
 0x49d   : > { %v5946_v46 = vpop.eup %5322  ;;  %5342 = vpow2.f32 %v1473_v55 }
 0x49e   : > { %v5948_v51 = vpop.eup %5324  ;;  %5028 = vmatprep.subr.bf16.mxu0 %v5027_v11  ;;  %v5031_v29 = vpack.c.bf16 %v5946_v46, %v5942_v1  ;;  %5344 = vpow2.f32 %v1475_v48 }
 0x49f   : > { %v5952_v38 = vpop.eup %5326  ;;  %5030 = vmatpush3.bf16.msra.mxu0 %v5027_v11  ;;  %5346 = vpow2.f32 %v1477_v59 }
 0x4a0   : > { %5032 = vmatprep.subr.bf16.mxu0 %v5031_v29  ;;  %v5954_v56 = vpop.eup %5328  ;;  %v5035_v57 = vpack.c.bf16 %v5952_v38, %v5948_v51 }
 0x4a1   : > { %v5958_v39 = vpop.eup %5330 }
 0x4a2   : > { %v5960_v61 = vpop.eup %5332  ;;  %v5039_v62 = vpack.c.bf16 %v5958_v39, %v5954_v56 }
 0x4a3   : > { %5034 = vmatpush3.bf16.msra.mxu0 %v5031_v29  ;;  %v5964_v63 = vpop.eup %5334 }
 0x4a4   : > { %5036 = vmatprep.subr.bf16.mxu0 %v5035_v57  ;;  %v5966_v0 = vpop.eup %5336  ;;  %v5043_v49 = vpack.c.bf16 %v5964_v63, %v5960_v61 }
 0x4a5   : > { %v5970_v2 = vpop.eup %5338 }
 0x4a6   : > { %v5972_v4 = vpop.eup %5340  ;;  %v5047_v5 = vpack.c.bf16 %v5970_v2, %v5966_v0 }
 0x4a7   : > { %5038 = vmatpush3.bf16.msra.mxu0 %v5035_v57  ;;  %v5976_v6 = vpop.eup %5342 }
 0x4a8   : > { %5040 = vmatprep.subr.bf16.mxu0 %v5039_v62  ;;  %v5978_v7 = vpop.eup %5344  ;;  %v5051_v8 = vpack.c.bf16 %v5976_v6, %v5972_v4 }
 0x4a9   : > { %v5982_v12 = vpop.eup %5346 }
 0x4aa   : > { %v5055_v14 = vpack.c.bf16 %v5982_v12, %v5978_v7 }
 0x4ab   : > { %5042 = vmatpush3.bf16.msra.mxu0 %v5039_v62 }
 0x4ac   : > { %5044 = vmatprep.subr.bf16.mxu0 %v5043_v49 }
 0x4af   : > { %5046 = vmatpush3.bf16.msra.mxu0 %v5043_v49 }
 0x4b0   : > { %5048 = vmatprep.subr.bf16.mxu0 %v5047_v5 }
 0x4b3   : > { %5050 = vmatpush3.bf16.msra.mxu0 %v5047_v5 }
 0x4b4   : > { %5052 = vmatprep.subr.bf16.mxu0 %v5051_v8 }
 0x4b7   : > { %5054 = vmatpush3.bf16.msra.mxu0 %v5051_v8 }
 0x4b8   : > { %5056 = vmatprep.subr.bf16.mxu0 %v5055_v14 }
 0x4bb   : > { %5058 = vmatpush3.bf16.msra.mxu0 %v5055_v14 }
 0x4be   : > { %4572 = vmatmul.mubr.f32.vlgmr.msra.gmra.mrb[24].mxu0 %v5987_v17 }
 0x4bf   : > { %4574 = vmatprep.mubr.f32.mxu0 %v5990_v35 }
 0x4c2   : > { %4575 = vmatmul.mubr.f32.gmra.mrb[26].mxu0 %v5995_v16 }
 0x4c3   : > { %4577 = vmatprep.mubr.f32.mxu0 %v5998_v36 }
 0x4c6   : > { %4578 = vmatmul.mubr.f32.gmra.mrb[28].mxu0 %v6003_v15 }
 0x4c7   : > { %4580 = vmatprep.mubr.f32.mxu0 %v6006_v28 }
 0x4ca   : > { %4581 = vmatmul.mubr.f32.gmra.mrb[30].mxu0 %v6011_v40 }
 0x4cb   : > { %4599 = vmatprep.mubr.msk.f32.mxu0 %vm749_vm1, %v5683_v9 }
 0x591   : > { %v4573_v20 = vpop.f32.mrb[24].mxu0 }
 0x592   : > { %v1545_v53 = vpop.f32.mrb[25].mxu0 }
 0x593   : > { %v5059_v52 = vpack.c.bf16 %v4573_v20, %v1545_v53 }
 0x595   : > { %v4576_v60 = vpop.f32.mrb[26].mxu0  ;;  %5060 = vmatprep.subr.bf16.mxu0 %v5059_v52 }
 0x596   : > { %v1555_v45 = vpop.f32.mrb[27].mxu0  ;;  %5062 = vmatpush3.bf16.msra.mxu0 %v5059_v52 }
 0x597   : > { %v5063_v9 = vpack.c.bf16 %v4576_v60, %v1555_v45 }
 0x599   : > { %v4579_v21 = vpop.f32.mrb[28].mxu0  ;;  %5064 = vmatprep.subr.bf16.mxu0 %v5063_v9 }
 0x59a   : > { %v1565_v58 = vpop.f32.mrb[29].mxu0  ;;  %5066 = vmatpush3.bf16.msra.mxu0 %v5063_v9 }
 0x59b   : > { %v5067_v11 = vpack.c.bf16 %v4579_v21, %v1565_v58 }
 0x59d   : > { %v4582_v13 = vpop.f32.mrb[30].mxu0  ;;  %5068 = vmatprep.subr.bf16.mxu0 %v5067_v11 }
 0x59e   : > { %v1575_v50 = vpop.f32.mrb[31].mxu0  ;;  %5070 = vmatpush3.bf16.msra.mxu0 %v5067_v11 }
 0x59f   : > { %v5071_v29 = vpack.c.bf16 %v4582_v13, %v1575_v50 }
 0x5a1   : > { %5072 = vmatprep.subr.bf16.mxu0 %v5071_v29 }
 0x5a2   : > { %5074 = vmatpush3.bf16.msra.mxu0 %v5071_v29 }
 0x5a5   : > { %4600 = vmatmul.mubr.msk.f32.vlgmr.msra.gmra.mrb[32].mxu0 %vm749_vm1, %v5692_v19 }
 0x5a6   : > { %4602 = vmatprep.mubr.msk.f32.mxu0 %vm749_vm1, %v5695_v22 }
 0x5a9   : > { %4603 = vmatmul.mubr.msk.f32.gmra.mrb[34].mxu0 %vm749_vm1, %v5702_v23 }
 0x5aa   : > { %4605 = vmatprep.mubr.msk.f32.mxu0 %vm749_vm1, %v5705_v24 }
 0x5ad   : > { %4606 = vmatmul.mubr.msk.f32.gmra.mrb[36].mxu0 %vm749_vm1, %v5712_v25 }
 0x5ae   : > { %4608 = vmatprep.mubr.msk.f32.mxu0 %vm749_vm1, %v5715_v26 }
 0x5b1   : > { %4609 = vmatmul.mubr.msk.f32.gmra.mrb[38].mxu0 %vm749_vm1, %v5722_v27 }
 0x5b2   : > { %4611 = vmatprep.mubr.msk.f32.mxu0 %vm749_vm1, %v5725_v30 }
 0x5b5   : > { %4612 = vmatmul.mubr.msk.f32.gmra.mrb[40].mxu0 %vm749_vm1, %v5732_v31 }
 0x5b6   : > { %4614 = vmatprep.mubr.msk.f32.mxu0 %vm749_vm1, %v5735_v32 }
 0x5b9   : > { %4615 = vmatmul.mubr.msk.f32.gmra.mrb[42].mxu0 %vm749_vm1, %v5742_v33 }
 0x5ba   : > { %4617 = vmatprep.mubr.msk.f32.mxu0 %vm749_vm1, %v5745_v34 }
 0x5bd   : > { %4618 = vmatmul.mubr.msk.f32.gmra.mrb[44].mxu0 %vm749_vm1, %v5766_v41 }
 0x5be   : > { %4620 = vmatprep.mubr.msk.f32.mxu0 %vm749_vm1, %v5771_v43 }
 0x5c1   : > { %4621 = vmatmul.mubr.msk.f32.gmra.mrb[46].mxu0 %vm749_vm1, %v5781_v44 }
 0x5c2   : > { %4681 = vmatprep.mubr.f32.mxu0 %v5855_v10 }
 0x678   : > { %v4601_v19 = vpop.f32.mrb[32].mxu0 }
 0x679   : > { %5348 = vrcp.f32 %v4601_v19  ;;  %v1650_v22 = vpop.f32.mrb[33].mxu0  ;;  %vm1730_vm5 = vcmp.gt.f32.partialorder %v4601_v19, 0.0 }
 0x67a   : > { %5350 = vrcp.f32 %v1650_v22  ;;  %vm1729_vm4 = vcmp.gt.f32.partialorder %v1650_v22, 0.0 }
 0x67c   : > { %v4604_v23 = vpop.f32.mrb[34].mxu0 }
 0x67d   : > { %5352 = vrcp.f32 %v4604_v23  ;;  %v1660_v24 = vpop.f32.mrb[35].mxu0  ;;  %vm1732_vm7 = vcmp.gt.f32.partialorder %v4604_v23, 0.0 }
 0x67e   : > { %5354 = vrcp.f32 %v1660_v24  ;;  %vm1731_vm6 = vcmp.gt.f32.partialorder %v1660_v24, 0.0 }
 0x680   : > { %v4607_v25 = vpop.f32.mrb[36].mxu0 }
 0x681   : > { %5356 = vrcp.f32 %v4607_v25  ;;  %v1670_v26 = vpop.f32.mrb[37].mxu0  ;;  %vm1734_vm9 = vcmp.gt.f32.partialorder %v4607_v25, 0.0 }
 0x682   : > { %5358 = vrcp.f32 %v1670_v26  ;;  %vm1733_vm8 = vcmp.gt.f32.partialorder %v1670_v26, 0.0 }
 0x683   : > { %v5349_v27 = vpop.eup %5348 }
 0x684   : > { %v5351_v30 = vpop.eup %5350  ;;  %v1748_v31 = vmul.f32 %v5349_v27, %v5940_v47  ;;  %v4610_v32 = vpop.f32.mrb[38].mxu0 }
 0x685   : > { %v1746_v33 = vmul.f32 %v5351_v30, %v5938_v3  ;;  %5360 = vrcp.f32 %v4610_v32  ;;  %v1680_v34 = vpop.f32.mrb[39].mxu0  ;;  %vm1736_vm11 = vcmp.gt.f32.partialorder %v4610_v32, 0.0 }
 0x686   : > { %5362 = vrcp.f32 %v1680_v34  ;;  %v1778_v10 = vsel %vm1730_vm5, %v1748_v31, 0.0  ;;  %vm1735_vm10 = vcmp.gt.f32.partialorder %v1680_v34, 0.0 }
 0x687   : > { %v5353_v41 = vpop.eup %5352  ;;  %v1777_v43 = vsel %vm1729_vm4, %v1746_v33, 0.0 }
 0x688   : > { %v5355_v44 = vpop.eup %5354  ;;  %v1752_v54 = vmul.f32 %v5353_v41, %v5946_v46  ;;  %v4613_v55 = vpop.f32.mrb[40].mxu0  ;;  %4625 = vmatprep.mubr.msk.f32.mxu1 %vm1393_vm2, %v1777_v43 }
 0x689   : > { %v1750_v57 = vmul.f32 %v5355_v44, %v5942_v1  ;;  %5364 = vrcp.f32 %v4613_v55  ;;  %v1690_v47 = vpop.f32.mrb[41].mxu0  ;;  %4626 = vmatmul.mubr.msk.f32.vlgmr.msra.gmra.mrb[32].mxu1 %vm1393_vm2, %v1778_v10  ;;  %vm1738_vm13 = vcmp.gt.f32.partialorder %v4613_v55, 0.0  ;;  %v2009_v41 = vpop.permute.xlu1 %2008 }
 0x68a   : > { %5366 = vrcp.f32 %v1690_v47  ;;  %v1780_v62 = vsel %vm1732_vm7, %v1752_v54, 0.0  ;;  %vm1737_vm12 = vcmp.gt.f32.partialorder %v1690_v47, 0.0  ;;  %v2007_v43 = vpop.permute.xlu0 %2006 }
 0x68b   : > { %v5357_v3 = vpop.eup %5356  ;;  %v1779_v48 = vsel %vm1731_vm6, %v1750_v57, 0.0 }
 0x68c   : > { %v5359_v59 = vpop.eup %5358  ;;  %v1756_v49 = vmul.f32 %v5357_v3, %v5952_v38  ;;  %v4616_v5 = vpop.f32.mrb[42].mxu0  ;;  %4628 = vmatprep.mubr.msk.f32.mxu1 %vm1393_vm2, %v1779_v48 }
 0x68d   : > { %v1754_v46 = vmul.f32 %v5359_v59, %v5948_v51  ;;  %5368 = vrcp.f32 %v4616_v5  ;;  %v1700_v1 = vpop.f32.mrb[43].mxu0  ;;  %4629 = vmatmul.mubr.msk.f32.gmra.mrb[34].mxu1 %vm1393_vm2, %v1780_v62  ;;  %vm1740_vm15 = vcmp.gt.f32.partialorder %v4616_v5, 0.0  ;;  %v2013_v44 = vpop.permute.xlu1 %2012 }
 0x68e   : > { %5370 = vrcp.f32 %v1700_v1  ;;  %v1782_v53 = vsel %vm1734_vm9, %v1756_v49, 0.0  ;;  %vm1739_vm14 = vcmp.gt.f32.partialorder %v1700_v1, 0.0  ;;  %v2011_v10 = vpop.permute.xlu0 %2010 }
 0x68f   : > { %v5361_v8 = vpop.eup %5360  ;;  %v1781_v14 = vsel %vm1733_vm8, %v1754_v46, 0.0 }
 0x690   : > { %v5363_v20 = vpop.eup %5362  ;;  %v1760_v52 = vmul.f32 %v5361_v8, %v5958_v39  ;;  %v4619_v60 = vpop.f32.mrb[44].mxu0  ;;  %4631 = vmatprep.mubr.msk.f32.mxu1 %vm1393_vm2, %v1781_v14 }
 0x691   : > { %v1758_v38 = vmul.f32 %v5363_v20, %v5954_v56  ;;  %5372 = vrcp.f32 %v4619_v60  ;;  %v1710_v51 = vpop.f32.mrb[45].mxu0  ;;  %4632 = vmatmul.mubr.msk.f32.gmra.mrb[36].mxu1 %vm1393_vm2, %v1782_v53  ;;  %vm1742_vm5 = vcmp.gt.f32.partialorder %v4619_v60, 0.0  ;;  %v2017_v54 = vpop.permute.xlu1 %2016 }
 0x692   : > { %5374 = vrcp.f32 %v1710_v51  ;;  %v1784_v58 = vsel %vm1736_vm11, %v1760_v52, 0.0  ;;  %vm1741_vm4 = vcmp.gt.f32.partialorder %v1710_v51, 0.0 }
 0x693   : > { %v5365_v45 = vpop.eup %5364  ;;  %v1783_v9 = vsel %vm1735_vm10, %v1758_v38, 0.0 }
 0x694   : > { %v5367_v21 = vpop.eup %5366  ;;  %v1764_v11 = vmul.f32 %v5365_v45, %v5964_v63  ;;  %v4622_v13 = vpop.f32.mrb[46].mxu0  ;;  %4634 = vmatprep.mubr.msk.f32.mxu1 %vm1393_vm2, %v1783_v9 }
 0x695   : > { %v1762_v39 = vmul.f32 %v5367_v21, %v5960_v61  ;;  %5376 = vrcp.f32 %v4622_v13  ;;  %v1720_v56 = vpop.f32.mrb[47].mxu0  ;;  %4635 = vmatmul.mubr.msk.f32.gmra.mrb[38].mxu1 %vm1393_vm2, %v1784_v58  ;;  %vm1744_vm7 = vcmp.gt.f32.partialorder %v4622_v13, 0.0  ;;  %v2021_v3 = vpop.permute.xlu1 %2020 }
 0x696   : > { %5378 = vrcp.f32 %v1720_v56  ;;  %v1786_v22 = vsel %vm1738_vm13, %v1764_v11, 0.0  ;;  %vm1743_vm6 = vcmp.gt.f32.partialorder %v1720_v56, 0.0 }
 0x697   : > { %v5369_v50 = vpop.eup %5368  ;;  %v1785_v29 = vsel %vm1737_vm12, %v1762_v39, 0.0 }
 0x698   : > { %v5371_v19 = vpop.eup %5370  ;;  %v1768_v23 = vmul.f32 %v5369_v50, %v5970_v2  ;;  %4637 = vmatprep.mubr.msk.f32.mxu1 %vm1393_vm2, %v1785_v29 }
 0x699   : > { %v1766_v63 = vmul.f32 %v5371_v19, %v5966_v0  ;;  %4638 = vmatmul.mubr.msk.f32.gmra.mrb[40].mxu1 %vm1393_vm2, %v1786_v22  ;;  %v2025_v53 = vpop.permute.xlu1 %2024 }
 0x69a   : > { %v1788_v26 = vsel %vm1740_vm15, %v1768_v23, 0.0 }
 0x69b   : > { %v5373_v61 = vpop.eup %5372  ;;  %v1787_v24 = vsel %vm1739_vm14, %v1766_v63, 0.0 }
 0x69c   : > { %v5375_v25 = vpop.eup %5374  ;;  %v1772_v27 = vmul.f32 %v5373_v61, %v5976_v6  ;;  %4640 = vmatprep.mubr.msk.f32.mxu1 %vm1393_vm2, %v1787_v24 }
 0x69d   : > { %v1770_v30 = vmul.f32 %v5375_v25, %v5972_v4  ;;  %4641 = vmatmul.mubr.msk.f32.gmra.mrb[42].mxu1 %vm1393_vm2, %v1788_v26  ;;  %v2029_v58 = vpop.permute.xlu1 %2028 }
 0x69e   : > { %v1790_v32 = vsel %vm1742_vm5, %v1772_v27, 0.0 }
 0x69f   : > { %v5377_v2 = vpop.eup %5376  ;;  %v1789_v0 = vsel %vm1741_vm4, %v1770_v30, 0.0 }
 0x6a0   : > { %v5379_v31 = vpop.eup %5378  ;;  %v1776_v33 = vmul.f32 %v5377_v2, %v5982_v12  ;;  %4643 = vmatprep.mubr.msk.f32.mxu1 %vm1393_vm2, %v1789_v0  ;;  %v2015_v12 = vpop.permute.xlu0 %2014 }
 0x6a1   : > { %v1774_v34 = vmul.f32 %v5379_v31, %v5978_v7  ;;  %4644 = vmatmul.mubr.msk.f32.gmra.mrb[44].mxu1 %vm1393_vm2, %v1790_v32  ;;  %v2033_v61 = vpop.permute.xlu1 %2032 }
 0x6a2   : > { %v1792_v4 = vsel %vm1744_vm7, %v1776_v33, 0.0 }
 0x6a3   : > { %v1791_v6 = vsel %vm1743_vm6, %v1774_v34, 0.0 }
 0x6a4   : > { %4646 = vmatprep.mubr.msk.f32.mxu1 %vm1393_vm2, %v1791_v6  ;;  %v2019_v62 = vpop.permute.xlu0 %2018 }
 0x6a5   : > { %4647 = vmatmul.mubr.msk.f32.gmra.mrb[46].mxu1 %vm1393_vm2, %v1792_v4  ;;  %v2037_v31 = vpop.permute.xlu1 %2036 }
 0x6a8   : > { %v2023_v60 = vpop.permute.xlu0 %2022 }
 0x6ac   : > { %v2027_v39 = vpop.permute.xlu0 %2026 }
 0x6b0   : > { %v2031_v25 = vpop.permute.xlu0 %2030 }
 0x6b4   : > { %v2035_v34 = vpop.permute.xlu0 %2034 }
 0x75c   : > { %v4627_v55 = vpop.f32.mrb[32].mxu1 }
 0x75d   : > { %v2055_v57 = vmul.f32 %v4627_v55, %v2009_v41  ;;  %v1911_v47 = vpop.f32.mrb[33].mxu1 }
 0x75e   : > { %v2054_v7 = vmul.f32 %v2007_v43, %v1911_v47 }
 0x760   : > { %v5075_v48 = vpack.c.bf16 %v2055_v57, %v2054_v7  ;;  %v4630_v59 = vpop.f32.mrb[34].mxu1 }
 0x761   : > { %v2057_v49 = vmul.f32 %v4630_v59, %v2013_v44  ;;  %v1921_v5 = vpop.f32.mrb[35].mxu1  ;;  %v6096_v44 = vld [vmem:[%s5679_s14] sm:$0xff] }
 0x762   : > { %v2056_v46 = vmul.f32 %v2011_v10, %v1921_v5  ;;  %5076 = vmatprep.subr.bf16.mxu0 %v5075_v48  ;;  %v3967_v59 = vld [vmem:[%s6590_s6 + $0x20] sm:$0xff] }
 0x763   : > { %5078 = vmatpush3.bf16.msra.mxu0 %v5075_v48 }
 0x764   : > { %v5079_v1 = vpack.c.bf16 %v2057_v49, %v2056_v46  ;;  %v4633_v8 = vpop.f32.mrb[36].mxu1 }
 0x765   : > { %v2059_v14 = vmul.f32 %v4633_v8, %v2017_v54  ;;  %v1931_v20 = vpop.f32.mrb[37].mxu1 }
 0x766   : > { %v2058_v52 = vmul.f32 %v2015_v12, %v1931_v20  ;;  %5080 = vmatprep.subr.bf16.mxu0 %v5079_v1 }
 0x767   : > { %5082 = vmatpush3.bf16.msra.mxu0 %v5079_v1 }
 0x768   : > { %v5083_v38 = vpack.c.bf16 %v2059_v14, %v2058_v52  ;;  %v4636_v51 = vpop.f32.mrb[38].mxu1 }
 0x769   : > { %v2061_v45 = vmul.f32 %v4636_v51, %v2021_v3  ;;  %v1941_v9 = vpop.f32.mrb[39].mxu1 }
 0x76a   : > { %v2060_v21 = vmul.f32 %v2019_v62, %v1941_v9  ;;  %5084 = vmatprep.subr.bf16.mxu0 %v5083_v38  ;;  %v3968_v62 = vld [vmem:[%s6590_s6 + $0x28] sm:$0xff] }
 0x76b   : > { %5086 = vmatpush3.bf16.msra.mxu0 %v5083_v38  ;;  %v5107_v49 = vpack.c.bf16 %v3968_v62, %v3967_v59 }
 0x76c   : > { %v5087_v11 = vpack.c.bf16 %v2061_v45, %v2060_v21  ;;  %v4639_v13 = vpop.f32.mrb[40].mxu1 }
 0x76d   : > { %v2063_v56 = vmul.f32 %v4639_v13, %v2025_v53  ;;  %v1951_v50 = vpop.f32.mrb[41].mxu1  ;;  %5108 = vmatprep.subr.bf16.mxu1 %v5107_v49 }
 0x76e   : > { %v2062_v29 = vmul.f32 %v2023_v60, %v1951_v50  ;;  %5088 = vmatprep.subr.bf16.mxu0 %v5087_v11  ;;  %5110 = vmatpush3.bf16.msra.mxu1 %v5107_v49 }
 0x76f   : > { %5090 = vmatpush3.bf16.msra.mxu0 %v5087_v11 }
 0x770   : > { %v5091_v19 = vpack.c.bf16 %v2063_v56, %v2062_v29  ;;  %v4642_v22 = vpop.f32.mrb[42].mxu1 }
 0x771   : > { %v2065_v23 = vmul.f32 %v4642_v22, %v2029_v58  ;;  %v1961_v63 = vpop.f32.mrb[43].mxu1 }
 0x772   : > { %v2064_v24 = vmul.f32 %v2027_v39, %v1961_v63  ;;  %5092 = vmatprep.subr.bf16.mxu0 %v5091_v19 }
 0x773   : > { %5094 = vmatpush3.bf16.msra.mxu0 %v5091_v19 }
 0x774   : > { %v5095_v26 = vpack.c.bf16 %v2065_v23, %v2064_v24  ;;  %v4645_v27 = vpop.f32.mrb[44].mxu1 }
 0x775   : > { %v2067_v30 = vmul.f32 %v4645_v27, %v2033_v61  ;;  %v1971_v2 = vpop.f32.mrb[45].mxu1 }
 0x776   : > { %v2066_v0 = vmul.f32 %v2031_v25, %v1971_v2  ;;  %5096 = vmatprep.subr.bf16.mxu0 %v5095_v26 }
 0x777   : > { %5098 = vmatpush3.bf16.msra.mxu0 %v5095_v26 }
 0x778   : > { %v5099_v32 = vpack.c.bf16 %v2067_v30, %v2066_v0  ;;  %v4648_v33 = vpop.f32.mrb[46].mxu1 }
 0x779   : > { %v2069_v6 = vmul.f32 %v4648_v33, %v2037_v31  ;;  %v1981_v4 = vpop.f32.mrb[47].mxu1 }
 0x77a   : > { %v2068_v41 = vmul.f32 %v2035_v34, %v1981_v4  ;;  %5100 = vmatprep.subr.bf16.mxu0 %v5099_v32 }
 0x77b   : > { %5102 = vmatpush3.bf16.msra.mxu0 %v5099_v32 }
 0x77c   : > { %v5103_v43 = vpack.c.bf16 %v2069_v6, %v2068_v41 }
 0x77e   : > { %5104 = vmatprep.subr.bf16.mxu0 %v5103_v43 }
 0x77f   : > { %5106 = vmatpush3.bf16.msra.mxu0 %v5103_v43  ;;  %v3969_v43 = vld [vmem:[%s6590_s6 + $0x30] sm:$0xff] }
 0x782   : > { %4682 = vmatmul.mubr.f32.vlgmr.msra.gmra.mrb[48].mxu0 %v5987_v17 }
 0x783   : > { %4684 = vmatprep.mubr.f32.mxu0 %v5990_v35 }
 0x786   : > { %4685 = vmatmul.mubr.f32.gmra.mrb[50].mxu0 %v5995_v16 }
 0x787   : > { %4687 = vmatprep.mubr.f32.mxu0 %v5998_v36 }
 0x78a   : > { %4688 = vmatmul.mubr.f32.gmra.mrb[52].mxu0 %v6003_v15 }
 0x78b   : > { %4690 = vmatprep.mubr.f32.mxu0 %v6006_v28 }
 0x78e   : > { %4691 = vmatmul.mubr.f32.gmra.mrb[54].mxu0 %v6011_v40 }
 0x78f   : > { %4729 = vmatprep.mubr.msk.f32.mxu0 %vm749_vm1, %v6096_v44 }
 0x855   : > { %v4683_v10 = vpop.f32.mrb[48].mxu0 }
 0x856   : > { %v2136_v54 = vpop.f32.mrb[49].mxu0  ;;  %v2178_v17 = vsel %vm475_vm0, %v4683_v10, 0.0 }
 0x857   : > { %2179 = vadd.xlane.f32.xlu1 %v2178_v17  ;;  %v2175_v35 = vsel %vm475_vm0, %v2136_v54, 0.0 }
 0x858   : > { %2176 = vadd.xlane.f32.xlu0 %v2175_v35 }
 0x859   : > { %v4686_v16 = vpop.f32.mrb[50].mxu0 }
 0x85a   : > { %v2146_v36 = vpop.f32.mrb[51].mxu0  ;;  %v2184_v15 = vsel %vm475_vm0, %v4686_v16, 0.0 }
 0x85b   : > { %v2181_v55 = vsel %vm475_vm0, %v2146_v36, 0.0 }
 0x85c   : > { %2185 = vadd.xlane.f32.xlu0 %v2184_v15 }
 0x85d   : > { %v4689_v28 = vpop.f32.mrb[52].mxu0 }
 0x85e   : > { %v2190_v40 = vsel %vm475_vm0, %v4689_v28, 0.0  ;;  %v2156_v12 = vpop.f32.mrb[53].mxu0 }
 0x85f   : > { %2191 = vadd.xlane.f32.xlu1 %v2190_v40  ;;  %v2187_v47 = vsel %vm475_vm0, %v2156_v12, 0.0 }
 0x860   : > { %2182 = vadd.xlane.f32.xlu0 %v2181_v55 }
 0x861   : > { %v4692_v57 = vpop.f32.mrb[54].mxu0 }
 0x862   : > { %v2196_v7 = vsel %vm475_vm0, %v4692_v57, 0.0  ;;  %v2166_v3 = vpop.f32.mrb[55].mxu0 }
 0x863   : > { %2197 = vadd.xlane.f32.xlu1 %v2196_v7  ;;  %v2193_v48 = vsel %vm475_vm0, %v2166_v3, 0.0 }
 0x864   : > { %2188 = vadd.xlane.f32.xlu0 %v2187_v47 }
 0x868   : > { %2194 = vadd.xlane.f32.xlu0 %v2193_v48 }
 0x8e4   : > { %v2180_v5 = vpop.xlane.xlu1 %2179 }
 0x8e5   : > { %v2200_v46 = vmul.f32 0.03125, %v2180_v5  ;;  %v2177_v1 = vpop.xlane.xlu0 %2176 }
 0x8e6   : > { %v2199_v8 = vmul.f32 0.03125, %v2177_v1 }
 0x8e7   : > { %v6114_v14 = vsub.f32 %v4683_v10, %v2200_v46  ;;  %v3970_v10 = vld [vmem:[%s6590_s6 + $0x38] sm:$0xff] }
 0x8e8   : > { %v6116_v20 = vsub.f32 %v2136_v54, %v2199_v8  ;;  %v5111_v54 = vpack.c.bf16 %v3970_v10, %v3969_v43 }
 0x8e9   : > { %v2186_v53 = vpop.xlane.xlu0 %2185  ;;  %v2216_v52 = vmul.f32 %v6114_v14, %v6114_v14 }
 0x8ea   : > { %v2202_v60 = vmul.f32 0.03125, %v2186_v53  ;;  %v2215_v38 = vmul.f32 %v6116_v20, %v6116_v20  ;;  %5112 = vmatprep.subr.bf16.mxu1 %v5111_v54 }
 0x8eb   : > { %v2226_v51 = vsel %vm475_vm0, %v2216_v52, 0.0  ;;  %5114 = vmatpush3.bf16.msra.mxu1 %v5111_v54  ;;  %v5463_v54 = vld [vmem:[%s5674_s20] sm:$0xff] }
 0x8ec   : > { %v6123_v45 = vsub.f32 %v4686_v16, %v2202_v60  ;;  %v2192_v9 = vpop.xlane.xlu1 %2191  ;;  %2227 = vadd.xlane.f32.xlu1 %v2226_v51  ;;  %v2223_v21 = vsel %vm475_vm0, %v2215_v38, 0.0 }
 0x8ed   : > { %v2204_v58 = vmul.f32 0.03125, %v2192_v9  ;;  %v2183_v11 = vpop.xlane.xlu0 %2182  ;;  %2224 = vadd.xlane.f32.xlu0 %v2223_v21  ;;  %v5461_v9 = vld [vmem:[%s6588_s4] ss:$0 sm:$0xff] }
 0x8ee   : > { %v2201_v13 = vmul.f32 0.03125, %v2183_v11  ;;  %v2218_v39 = vmul.f32 %v6123_v45, %v6123_v45 }
 0x8ef   : > { %v6128_v56 = vsub.f32 %v4689_v28, %v2204_v58 }
 0x8f0   : > { %v6130_v50 = vsub.f32 %v2146_v36, %v2201_v13  ;;  %v2198_v29 = vpop.xlane.xlu1 %2197  ;;  %v2232_v19 = vsel %vm475_vm0, %v2218_v39, 0.0 }
 0x8f1   : > { %v2206_v22 = vmul.f32 0.03125, %v2198_v29  ;;  %v2189_v23 = vpop.xlane.xlu0 %2188  ;;  %2233 = vadd.xlane.f32.xlu1 %v2232_v19  ;;  %v2220_v63 = vmul.f32 %v6128_v56, %v6128_v56 }
 0x8f2   : > { %v2203_v61 = vmul.f32 0.03125, %v2189_v23  ;;  %v2217_v24 = vmul.f32 %v6130_v50, %v6130_v50 }
 0x8f3   : > { %v6137_v25 = vsub.f32 %v4692_v57, %v2206_v22  ;;  %v2238_v26 = vsel %vm475_vm0, %v2220_v63, 0.0 }
 0x8f4   : > { %v6140_v27 = vsub.f32 %v2156_v12, %v2203_v61  ;;  %v2229_v30 = vsel %vm475_vm0, %v2217_v24, 0.0 }
 0x8f5   : > { %2239 = vadd.xlane.f32.xlu1 %v2238_v26  ;;  %2230 = vadd.xlane.f32.xlu0 %v2229_v30  ;;  %v2195_v2 = vpop.xlane.xlu0 %2194  ;;  %v2222_v0 = vmul.f32 %v6137_v25, %v6137_v25 }
 0x8f6   : > { %v2205_v31 = vmul.f32 0.03125, %v2195_v2  ;;  %v2219_v32 = vmul.f32 %v6140_v27, %v6140_v27 }
 0x8f7   : > { %v2244_v33 = vsel %vm475_vm0, %v2222_v0, 0.0 }
 0x8f8   : > { %v6148_v34 = vsub.f32 %v2166_v3, %v2205_v31  ;;  %v2235_v6 = vsel %vm475_vm0, %v2219_v32, 0.0 }
 0x8f9   : > { %2245 = vadd.xlane.f32.xlu1 %v2244_v33  ;;  %2236 = vadd.xlane.f32.xlu0 %v2235_v6 }
 0x8fa   : > { %v2221_v4 = vmul.f32 %v6148_v34, %v6148_v34 }
 0x8fc   : > { %v2241_v41 = vsel %vm475_vm0, %v2221_v4, 0.0 }
 0x8fd   : > { %2242 = vadd.xlane.f32.xlu0 %v2241_v41 }
 0x979   : > { %v2228_v17 = vpop.xlane.xlu1 %2227 }
 0x97a   : > { %v2248_v35 = vmul.f32 0.03125, %v2228_v17  ;;  %v2225_v16 = vpop.xlane.xlu0 %2224 }
 0x97b   : > { %v2247_v36 = vmul.f32 0.03125, %v2225_v16 }
 0x97c   : > { %v2256_v15 = vadd.f32 1e-05, %v2248_v35 }
 0x97d   : > { %v2255_v28 = vadd.f32 1e-05, %v2247_v36 }
 0x97e   : > { %5380 = vrsqrt.f32 %v2256_v15  ;;  %v2234_v40 = vpop.xlane.xlu1 %2233 }
 0x97f   : > { %5382 = vrsqrt.f32 %v2255_v28  ;;  %v2250_v12 = vmul.f32 0.03125, %v2234_v40 }
 0x981   : > { %v2258_v55 = vadd.f32 1e-05, %v2250_v12 }
 0x982   : > { %v2240_v57 = vpop.xlane.xlu1 %2239  ;;  %v2231_v47 = vpop.xlane.xlu0 %2230 }
 0x983   : > { %5384 = vrsqrt.f32 %v2258_v55  ;;  %v2252_v7 = vmul.f32 0.03125, %v2240_v57  ;;  %v2249_v3 = vmul.f32 0.03125, %v2231_v47 }
 0x985   : > { %v2260_v48 = vadd.f32 1e-05, %v2252_v7  ;;  %v2257_v59 = vadd.f32 1e-05, %v2249_v3 }
 0x986   : > { %v2246_v62 = vpop.xlane.xlu1 %2245  ;;  %v2237_v49 = vpop.xlane.xlu0 %2236 }
 0x987   : > { %5386 = vrsqrt.f32 %v2260_v48  ;;  %v2254_v5 = vmul.f32 0.03125, %v2246_v62  ;;  %v2251_v46 = vmul.f32 0.03125, %v2237_v49 }
 0x988   : > { %v5381_v1 = vpop.eup %5380  ;;  %5388 = vrsqrt.f32 %v2257_v59 }
 0x989   : > { %v5383_v8 = vpop.eup %5382  ;;  %v2272_v53 = vmul.f32 %v5381_v1, %v6114_v14  ;;  %v2262_v52 = vadd.f32 1e-05, %v2254_v5  ;;  %v2259_v60 = vadd.f32 1e-05, %v2251_v46  ;;  %v5462_v14 = vld [vmem:[%s6589_s5] ss:$0 sm:$0xff] }
 0x98a   : > { %v2243_v38 = vpop.xlane.xlu0 %2242  ;;  %v2271_v51 = vmul.f32 %v5383_v8, %v6116_v20 }
 0x98b   : > { %v2280_v21 = vmul.f32 %v5461_v9, %v2272_v53  ;;  %5390 = vrsqrt.f32 %v2262_v52  ;;  %v2253_v58 = vmul.f32 0.03125, %v2243_v38  ;;  %v6193_v38 = vld [vmem:[%s5679_s14 + $0x8] sm:$0xff] }
 0x98c   : > { %5392 = vrsqrt.f32 %v2259_v60  ;;  %v2279_v11 = vmul.f32 %v5461_v9, %v2271_v51  ;;  %v6198_v51 = vld [vmem:[%s5679_s14 + $0x10] sm:$0xff] }
 0x98d   : > { %v5385_v13 = vpop.eup %5384  ;;  %v2261_v39 = vadd.f32 1e-05, %v2253_v58  ;;  %v2288_v19 = vadd.f32 %v5462_v14, %v2280_v21  ;;  %v6210_v21 = vld [vmem:[%s5679_s14 + $0x20] sm:$0xff]  ;;  %v6223_v58 = vld [vmem:[%s5679_s14 + $0x30] sm:$0xff] }
 0x98e   : > { %v2287_v29 = vadd.f32 %v5462_v14, %v2279_v11  ;;  %v2274_v20 = vmul.f32 %v5385_v13, %v6123_v45  ;;  %v6228_v11 = vld [vmem:[%s5679_s14 + $0x38] sm:$0xff]  ;;  %v6243_v13 = vld [vmem:[%s5679_s14 + $0x50] sm:$0xff] }
 0x98f   : > { %5394 = vrsqrt.f32 %v2261_v39  ;;  %v6248_v39 = vld [vmem:[%s5679_s14 + $0x58] sm:$0xff] }
 0x990   : > { %4701 = vmatprep.mubr.msk.f32.mxu1 %vm475_vm0, %v2287_v29  ;;  %v2282_v61 = vmul.f32 %v5461_v9, %v2274_v20  ;;  %v6258_v29 = vld [vmem:[%s5679_s14 + $0x68] sm:$0xff]  ;;  %v6268_v20 = vld [vmem:[%s5679_s14 + $0x78] sm:$0xff] }
 0x991   : > { %v5387_v22 = vpop.eup %5386  ;;  %4702 = vmatmul.mubr.msk.f32.vlgmr.msra.gmra.mrb[48].mxu1 %vm475_vm0, %v2288_v19  ;;  %v6263_v19 = vld [vmem:[%s5679_s14 + $0x70] sm:$0xff] }
 0x992   : > { %v5389_v23 = vpop.eup %5388  ;;  %v2276_v24 = vmul.f32 %v5387_v22, %v6128_v56  ;;  %v2290_v32 = vadd.f32 %v5462_v14, %v2282_v61 }
 0x993   : > { %v2273_v63 = vmul.f32 %v5389_v23, %v6130_v50 }
 0x994   : > { %v2284_v33 = vmul.f32 %v5461_v9, %v2276_v24 }
 0x995   : > { %v5391_v26 = vpop.eup %5390  ;;  %v2281_v30 = vmul.f32 %v5461_v9, %v2273_v63 }
 0x996   : > { %v5393_v2 = vpop.eup %5392  ;;  %v2278_v6 = vmul.f32 %v5391_v26, %v6137_v25  ;;  %v2292_v41 = vadd.f32 %v5462_v14, %v2284_v33 }
 0x997   : > { %v2289_v0 = vadd.f32 %v5462_v14, %v2281_v30  ;;  %v2275_v31 = vmul.f32 %v5393_v2, %v6140_v27 }
 0x998   : > { %v2286_v10 = vmul.f32 %v5461_v9, %v2278_v6 }
 0x999   : > { %v5395_v45 = vpop.eup %5394  ;;  %4704 = vmatprep.mubr.msk.f32.mxu1 %vm475_vm0, %v2289_v0  ;;  %v2283_v4 = vmul.f32 %v5461_v9, %v2275_v31 }
 0x99a   : > { %4705 = vmatmul.mubr.msk.f32.gmra.mrb[50].mxu1 %vm475_vm0, %v2290_v32  ;;  %v2277_v50 = vmul.f32 %v5395_v45, %v6148_v34  ;;  %v2294_v25 = vadd.f32 %v5462_v14, %v2286_v10  ;;  %v3972_v34 = vld [vmem:[%s6591_s7 + $0x1] ss:$0 sm:$0xff] }
 0x99b   : > { %v2291_v56 = vadd.f32 %v5462_v14, %v2283_v4  ;;  %v5482_v10 = vld [vmem:[%s5674_s20 + $0x20] sm:$0xff] }
 0x99c   : > { %v2285_v43 = vmul.f32 %v5461_v9, %v2277_v50  ;;  %v6205_v9 = vld [vmem:[%s5679_s14 + $0x18] sm:$0xff] }
 0x99d   : > { %4707 = vmatprep.mubr.msk.f32.mxu1 %vm475_vm0, %v2291_v56  ;;  %v5479_v56 = vld [vmem:[%s5674_s20 + $0x8] sm:$0xff] }
 0x99e   : > { %4708 = vmatmul.mubr.msk.f32.gmra.mrb[52].mxu1 %vm475_vm0, %v2292_v41  ;;  %v2293_v27 = vadd.f32 %v5462_v14, %v2285_v43  ;;  %v6253_v14 = vld [vmem:[%s5679_s14 + $0x60] sm:$0xff]  ;;  %v5480_v41 = vld [vmem:[%s5674_s20 + $0x10] sm:$0xff]  ;;  %v5481_v43 = vld [vmem:[%s5674_s20 + $0x18] sm:$0xff] }
 0x9a0   : > { %4710 = vmatprep.mubr.msk.f32.mxu1 %vm475_vm0, %v2293_v27  ;;  %v5483_v27 = vld [vmem:[%s5674_s20 + $0x28] sm:$0xff] }
 0x9a2   : > { %4711 = vmatmul.mubr.msk.f32.gmra.mrb[54].mxu1 %vm475_vm0, %v2294_v25  ;;  %v5484_v25 = vld [vmem:[%s5674_s20 + $0x30] sm:$0xff] }
 0x9a3   : > { %4769 = vmatprep.mubr.msk.f32.mxu1 %vm749_vm1, %v5463_v54  ;;  %v5485_v54 = vld [vmem:[%s5674_s20 + $0x38] sm:$0xff] }
 0xa64   : > { %v4703_v17 = vpop.f32.mrb[48].mxu1 }
 0xa65   : > { %v2404_v35 = vadd.f32 %v4703_v17, %v3972_v34  ;;  %v2398_v16 = vpop.f32.mrb[49].mxu1  ;;  %v5487_v17 = vld [vmem:[%s5674_s20 + $0x48] sm:$0xff] }
 0xa66   : > { %v2399_v36 = vadd.f32 %v3972_v34, %v2398_v16  ;;  %v5489_v16 = vld [vmem:[%s5674_s20 + $0x58] sm:$0xff] }
 0xa68   : > { %v5280_v15 = vpack.i.bf16 %v2404_v35, %v2399_v36  ;;  %v5115_v28 = vpack.c.bf16 %v2404_v35, %v2399_v36  ;;  %v5488_v35 = vld [vmem:[%s5674_s20 + $0x50] sm:$0xff]  ;;  %v5490_v36 = vld [vmem:[%s5674_s20 + $0x60] sm:$0xff] }
 0xa6a   : > { %5281 = vrot.lane.b32.xlu0 %v5280_v15, %s5511_s17  ;;  %5116 = vmatprep.subr.bf16.mxu0 %v5115_v28  ;;  %v5491_v15 = vld [vmem:[%s5674_s20 + $0x68] sm:$0xff] }
 0xa6b   : > { %5118 = vmatpush3.bf16.msra.mxu0 %v5115_v28  ;;  %v5492_v28 = vld [vmem:[%s5674_s20 + $0x70] sm:$0xff] }
 0xa6d   : > { %v4706_v40 = vpop.f32.mrb[50].mxu1 }
 0xa6e   : > { %v2414_v12 = vadd.f32 %v4706_v40, %v3972_v34  ;;  %v2408_v55 = vpop.f32.mrb[51].mxu1  ;;  %v5493_v40 = vld [vmem:[%s5674_s20 + $0x78] sm:$0xff] }
 0xa6f   : > { %v2409_v57 = vadd.f32 %v3972_v34, %v2408_v55 }
 0xa71   : > { %v5285_v47 = vpack.i.bf16 %v2414_v12, %v2409_v57  ;;  %v5119_v7 = vpack.c.bf16 %v2414_v12, %v2409_v57  ;;  %v4709_v3 = vpop.f32.mrb[52].mxu1  ;;  %v6303_v12 = vld [vmem:[%s5852_s16] sm:$0xff] }
 0xa72   : > { %v2424_v48 = vadd.f32 %v4709_v3, %v3972_v34  ;;  %v2418_v59 = vpop.f32.mrb[53].mxu1 }
 0xa73   : > { %v2419_v62 = vadd.f32 %v3972_v34, %v2418_v59  ;;  %5286 = vrot.lane.b32.xlu1 %v5285_v47, %s5511_s17  ;;  %5120 = vmatprep.subr.bf16.mxu0 %v5119_v7 }
 0xa74   : > { %5122 = vmatpush3.bf16.msra.mxu0 %v5119_v7 }
 0xa75   : > { %v5290_v49 = vpack.i.bf16 %v2424_v48, %v2419_v62  ;;  %v5123_v5 = vpack.c.bf16 %v2424_v48, %v2419_v62  ;;  %v4712_v46 = vpop.f32.mrb[54].mxu1 }
 0xa76   : > { %v2434_v1 = vadd.f32 %v4712_v46, %v3972_v34  ;;  %v2428_v8 = vpop.f32.mrb[55].mxu1 }
 0xa77   : > { %v2429_v53 = vadd.f32 %v3972_v34, %v2428_v8  ;;  %5291 = vrot.lane.b32.xlu1 %v5290_v49, %s5511_s17  ;;  %5124 = vmatprep.subr.bf16.mxu0 %v5123_v5  ;;  %v5486_v34 = vld [vmem:[%s5674_s20 + $0x40] sm:$0xff] }
 0xa78   : > { %5126 = vmatpush3.bf16.msra.mxu0 %v5123_v5 }
 0xa79   : > { %v5295_v52 = vpack.i.bf16 %v2434_v1, %v2429_v53  ;;  %v5127_v60 = vpack.c.bf16 %v2434_v1, %v2429_v53 }
 0xa7b   : > { %5296 = vrot.lane.b32.xlu1 %v5295_v52, %s5511_s17  ;;  %5128 = vmatprep.subr.bf16.mxu0 %v5127_v60 }
 0xa7c   : > { %5130 = vmatpush3.bf16.msra.mxu0 %v5127_v60 }
 0xa7d   : > { %5148 = vmatprep.subr.bf16.mxu0 %v5758_v37 }
 0xa7f   : > { %4730 = vmatmul.mubr.msk.f32.vlgmr.msra.gmra.mrb[56].mxu0 %vm749_vm1, %v6193_v38 }
 0xa80   : > { %4732 = vmatprep.mubr.msk.f32.mxu0 %vm749_vm1, %v6198_v51  ;;  %5150 = vmatpush3.bf16.msra.mxu0 %v5758_v37  ;;  %v6218_v37 = vld [vmem:[%s5679_s14 + $0x28] sm:$0xff] }
 0xa81   : > { %5152 = vmatprep.subr.bf16.mxu0 %v5768_v42 }
 0xa83   : > { %4733 = vmatmul.mubr.msk.f32.gmra.mrb[58].mxu0 %vm749_vm1, %v6205_v9 }
 0xa84   : > { %4735 = vmatprep.mubr.msk.f32.mxu0 %vm749_vm1, %v6210_v21  ;;  %5154 = vmatpush3.bf16.msra.mxu0 %v5768_v42  ;;  %v6233_v42 = vld [vmem:[%s5679_s14 + $0x40] sm:$0xff] }
 0xa85   : > { %4909 = vmatprep.subr.msk.mxu0 %vm1841_vm3, %v6019_v18  ;;  %v6238_v18 = vld [vmem:[%s5679_s14 + $0x48] sm:$0xff] }
 0xa87   : > { %4736 = vmatmul.mubr.msk.f32.gmra.mrb[60].mxu0 %vm749_vm1, %v6218_v37 }
 0xa88   : > { %4738 = vmatprep.mubr.msk.f32.mxu0 %vm749_vm1, %v6223_v58 }
 0xa8b   : > { %4739 = vmatmul.mubr.msk.f32.gmra.mrb[62].mxu0 %vm749_vm1, %v6228_v11 }
 0xa8c   : > { %4741 = vmatprep.mubr.msk.f32.mxu0 %vm749_vm1, %v6233_v42 }
 0xa8f   : > { %4742 = vmatmul.mubr.msk.f32.gmra.mrb[64].mxu0 %vm749_vm1, %v6238_v18 }
 0xa90   : > { %4744 = vmatprep.mubr.msk.f32.mxu0 %vm749_vm1, %v6243_v13 }
 0xa93   : > { %4745 = vmatmul.mubr.msk.f32.gmra.mrb[66].mxu0 %vm749_vm1, %v6248_v39 }
 0xa94   : > { %4747 = vmatprep.mubr.msk.f32.mxu0 %vm749_vm1, %v6253_v14 }
 0xa97   : > { %4748 = vmatmul.mubr.msk.f32.gmra.mrb[68].mxu0 %vm749_vm1, %v6258_v29 }
 0xa98   : > { %4750 = vmatprep.mubr.msk.f32.mxu0 %vm749_vm1, %v6263_v19 }
 0xa9b   : > { %4751 = vmatmul.mubr.msk.f32.gmra.mrb[70].mxu0 %vm749_vm1, %v6268_v20 }
 0xadc   : > { %v5282_v22 = vpop.permute.xlu0 %5281 }
 0xadd   : > { %v5284_v23 = vunpack.i.h.bf16 %v5282_v22  ;;  %v5283_v63 = vunpack.i.l.bf16 %v5282_v22 }
 0xadf   : > { %v5131_v61 = vpack.c.bf16 %v5284_v23, %v5283_v63 }
 0xae1   : > { %5132 = vmatprep.subr.bf16.mxu1 %v5131_v61 }
 0xae2   : > { %5134 = vmatpush3.bf16.msra.mxu1 %v5131_v61 }
 0xae5   : > { %v5287_v24 = vpop.permute.xlu1 %5286 }
 0xae6   : > { %v5289_v26 = vunpack.i.h.bf16 %v5287_v24  ;;  %v5288_v30 = vunpack.i.l.bf16 %v5287_v24 }
 0xae8   : > { %v5135_v2 = vpack.c.bf16 %v5289_v26, %v5288_v30 }
 0xae9   : > { %v5292_v0 = vpop.permute.xlu1 %5291 }
 0xaea   : > { %v5294_v31 = vunpack.i.h.bf16 %v5292_v0  ;;  %v5293_v32 = vunpack.i.l.bf16 %v5292_v0  ;;  %5136 = vmatprep.subr.bf16.mxu1 %v5135_v2  ;;  %v5495_v0 = vld [vmem:[%s6593_s9] sm:$0xf] }
 0xaeb   : > { %5138 = vmatpush3.bf16.msra.mxu1 %v5135_v2 }
 0xaec   : > { %v5139_v33 = vpack.c.bf16 %v5294_v31, %v5293_v32 }
 0xaed   : > { %v5297_v6 = vpop.permute.xlu1 %5296 }
 0xaee   : > { %v5299_v45 = vunpack.i.h.bf16 %v5297_v6  ;;  %v5298_v4 = vunpack.i.l.bf16 %v5297_v6  ;;  %5140 = vmatprep.subr.bf16.mxu1 %v5139_v33 }
 0xaef   : > { %5142 = vmatpush3.bf16.msra.mxu1 %v5139_v33 }
 0xaf0   : > { %v5143_v50 = vpack.c.bf16 %v5299_v45, %v5298_v4 }
 0xaf2   : > { %5144 = vmatprep.subr.bf16.mxu1 %v5143_v50 }
 0xaf3   : > { %5146 = vmatpush3.bf16.msra.mxu1 %v5143_v50 }
 0xaf6   : > { %4770 = vmatmul.mubr.msk.f32.vlgmr.msra.gmra.mrb[56].mxu1 %vm749_vm1, %v5479_v56 }
 0xaf7   : > { %4772 = vmatprep.mubr.msk.f32.mxu1 %vm749_vm1, %v5480_v41 }
 0xafa   : > { %4773 = vmatmul.mubr.msk.f32.gmra.mrb[58].mxu1 %vm749_vm1, %v5481_v43 }
 0xafb   : > { %4775 = vmatprep.mubr.msk.f32.mxu1 %vm749_vm1, %v5482_v10 }
 0xafe   : > { %4776 = vmatmul.mubr.msk.f32.gmra.mrb[60].mxu1 %vm749_vm1, %v5483_v27 }
 0xaff   : > { %4778 = vmatprep.mubr.msk.f32.mxu1 %vm749_vm1, %v5484_v25 }
 0xb02   : > { %4779 = vmatmul.mubr.msk.f32.gmra.mrb[62].mxu1 %vm749_vm1, %v5485_v54 }
 0xb03   : > { %4781 = vmatprep.mubr.msk.f32.mxu1 %vm749_vm1, %v5486_v34 }
 0xb06   : > { %4782 = vmatmul.mubr.msk.f32.gmra.mrb[64].mxu1 %vm749_vm1, %v5487_v17 }
 0xb07   : > { %4784 = vmatprep.mubr.msk.f32.mxu1 %vm749_vm1, %v5488_v35 }
 0xb0a   : > { %4785 = vmatmul.mubr.msk.f32.gmra.mrb[66].mxu1 %vm749_vm1, %v5489_v16 }
 0xb0b   : > { %4787 = vmatprep.mubr.msk.f32.mxu1 %vm749_vm1, %v5490_v36 }
 0xb0e   : > { %4788 = vmatmul.mubr.msk.f32.gmra.mrb[68].mxu1 %vm749_vm1, %v5491_v15 }
 0xb0f   : > { %4790 = vmatprep.mubr.msk.f32.mxu1 %vm749_vm1, %v5492_v28 }
 0xb12   : > { %4791 = vmatmul.mubr.msk.f32.gmra.mrb[70].mxu1 %vm749_vm1, %v5493_v40 }
 0xb13   : > { %4857 = vmatprep.mubr.f32.mxu1 %v6303_v12 }
 0xb52   : > { %v4731_v55 = vpop.f32.mrb[56].mxu0 }
 0xb53   : > { %v2503_v57 = vpop.f32.mrb[57].mxu0 }
 0xb56   : > { %v4734_v47 = vpop.f32.mrb[58].mxu0 }
 0xb57   : > { %v2513_v7 = vpop.f32.mrb[59].mxu0 }
 0xb5a   : > { %v4737_v3 = vpop.f32.mrb[60].mxu0 }
 0xb5b   : > { %v2523_v48 = vpop.f32.mrb[61].mxu0 }
 0xb5e   : > { %v4740_v59 = vpop.f32.mrb[62].mxu0 }
 0xb5f   : > { %v2533_v62 = vpop.f32.mrb[63].mxu0 }
 0xb62   : > { %v4743_v49 = vpop.f32.mrb[64].mxu0 }
 0xb63   : > { %v2543_v5 = vpop.f32.mrb[65].mxu0 }
 0xb66   : > { %v4746_v46 = vpop.f32.mrb[66].mxu0 }
 0xb67   : > { %v2553_v1 = vpop.f32.mrb[67].mxu0 }
 0xb6a   : > { %v4749_v8 = vpop.f32.mrb[68].mxu0 }
 0xb6b   : > { %v2563_v53 = vpop.f32.mrb[69].mxu0 }
 0xb6e   : > { %v4752_v52 = vpop.f32.mrb[70].mxu0 }
 0xb6f   : > { %v6306_v60 = vpop.f32.mrb[71].mxu0 }
 0xbc9   : > { %v4771_v22 = vpop.f32.mrb[56].mxu1 }
 0xbca   : > { %v2760_v23 = vmul.f32 %v4771_v22, %v4731_v55  ;;  %3594 = vrot.lane.b32.xlu1 %v4771_v22, %s5511_s17  ;;  %v2680_v63 = vpop.f32.mrb[57].mxu1 }
 0xbcb   : > { %v2759_v61 = vmul.f32 %v2680_v63, %v2503_v57  ;;  %3592 = vrot.lane.b32.xlu0 %v2680_v63, %s5511_s17 }
 0xbcd   : > { %v4774_v24 = vpop.f32.mrb[58].mxu1  ;;  %4801 = vmatprep.mubr.msk.f32.mxu0 %vm475_vm0, %v2759_v61 }
 0xbce   : > { %v2762_v26 = vmul.f32 %v4774_v24, %v4734_v47  ;;  %4802 = vmatmul.mubr.msk.f32.vlgmr.msra.gmra.mrb[72].mxu0 %vm475_vm0, %v2760_v23  ;;  %3598 = vrot.lane.b32.xlu1 %v4774_v24, %s5511_s17  ;;  %v2690_v30 = vpop.f32.mrb[59].mxu1 }
 0xbcf   : > { %v2761_v2 = vmul.f32 %v2690_v30, %v2513_v7  ;;  %3596 = vrot.lane.b32.xlu0 %v2690_v30, %s5511_s17  ;;  %4910 = vmatpush3.msk.msra.mxu0 %vm1841_vm3, %v5495_v0 }
 0xbd1   : > { %v4777_v31 = vpop.f32.mrb[60].mxu1  ;;  %4804 = vmatprep.mubr.msk.f32.mxu0 %vm475_vm0, %v2761_v2 }
 0xbd2   : > { %v2764_v32 = vmul.f32 %v4777_v31, %v4737_v3  ;;  %4805 = vmatmul.mubr.msk.f32.gmra.mrb[74].mxu0 %vm475_vm0, %v2762_v26  ;;  %3602 = vrot.lane.b32.xlu1 %v4777_v31, %s5511_s17  ;;  %v2700_v33 = vpop.f32.mrb[61].mxu1 }
 0xbd3   : > { %v2763_v6 = vmul.f32 %v2700_v33, %v2523_v48  ;;  %3600 = vrot.lane.b32.xlu0 %v2700_v33, %s5511_s17 }
 0xbd5   : > { %v4780_v45 = vpop.f32.mrb[62].mxu1  ;;  %4807 = vmatprep.mubr.msk.f32.mxu0 %vm475_vm0, %v2763_v6 }
 0xbd6   : > { %v2766_v4 = vmul.f32 %v4780_v45, %v4740_v59  ;;  %4808 = vmatmul.mubr.msk.f32.gmra.mrb[76].mxu0 %vm475_vm0, %v2764_v32  ;;  %3606 = vrot.lane.b32.xlu1 %v4780_v45, %s5511_s17  ;;  %v2710_v50 = vpop.f32.mrb[63].mxu1 }
 0xbd7   : > { %v2765_v56 = vmul.f32 %v2710_v50, %v2533_v62  ;;  %3604 = vrot.lane.b32.xlu0 %v2710_v50, %s5511_s17 }
 0xbd9   : > { %v4783_v41 = vpop.f32.mrb[64].mxu1  ;;  %4810 = vmatprep.mubr.msk.f32.mxu0 %vm475_vm0, %v2765_v56 }
 0xbda   : > { %v2768_v43 = vmul.f32 %v4783_v41, %v4743_v49  ;;  %4811 = vmatmul.mubr.msk.f32.gmra.mrb[78].mxu0 %vm475_vm0, %v2766_v4  ;;  %3610 = vrot.lane.b32.xlu1 %v4783_v41, %s5511_s17  ;;  %v2720_v10 = vpop.f32.mrb[65].mxu1 }
 0xbdb   : > { %v2767_v27 = vmul.f32 %v2720_v10, %v2543_v5  ;;  %3608 = vrot.lane.b32.xlu0 %v2720_v10, %s5511_s17 }
 0xbdd   : > { %v4786_v25 = vpop.f32.mrb[66].mxu1  ;;  %4813 = vmatprep.mubr.msk.f32.mxu0 %vm475_vm0, %v2767_v27 }
 0xbde   : > { %v2770_v54 = vmul.f32 %v4786_v25, %v4746_v46  ;;  %4814 = vmatmul.mubr.msk.f32.gmra.mrb[80].mxu0 %vm475_vm0, %v2768_v43  ;;  %3614 = vrot.lane.b32.xlu1 %v4786_v25, %s5511_s17  ;;  %v2730_v34 = vpop.f32.mrb[67].mxu1 }
 0xbdf   : > { %v2769_v17 = vmul.f32 %v2730_v34, %v2553_v1  ;;  %3612 = vrot.lane.b32.xlu0 %v2730_v34, %s5511_s17 }
 0xbe1   : > { %v4789_v35 = vpop.f32.mrb[68].mxu1  ;;  %4816 = vmatprep.mubr.msk.f32.mxu0 %vm475_vm0, %v2769_v17 }
 0xbe2   : > { %v2772_v16 = vmul.f32 %v4789_v35, %v4749_v8  ;;  %4817 = vmatmul.mubr.msk.f32.gmra.mrb[82].mxu0 %vm475_vm0, %v2770_v54  ;;  %3618 = vrot.lane.b32.xlu1 %v4789_v35, %s5511_s17  ;;  %v2740_v36 = vpop.f32.mrb[69].mxu1 }
 0xbe3   : > { %v2771_v15 = vmul.f32 %v2740_v36, %v2563_v53  ;;  %3616 = vrot.lane.b32.xlu0 %v2740_v36, %s5511_s17 }
 0xbe5   : > { %v4792_v28 = vpop.f32.mrb[70].mxu1  ;;  %4819 = vmatprep.mubr.msk.f32.mxu0 %vm475_vm0, %v2771_v15 }
 0xbe6   : > { %v2774_v40 = vmul.f32 %v4792_v28, %v4752_v52  ;;  %4820 = vmatmul.mubr.msk.f32.gmra.mrb[84].mxu0 %vm475_vm0, %v2772_v16  ;;  %3622 = vrot.lane.b32.xlu1 %v4792_v28, %s5511_s17  ;;  %v2750_v55 = vpop.f32.mrb[71].mxu1 }
 0xbe7   : > { %v2773_v57 = vmul.f32 %v2750_v55, %v6306_v60  ;;  %3620 = vrot.lane.b32.xlu0 %v2750_v55, %s5511_s17 }
 0xbe9   : > { %4822 = vmatprep.mubr.msk.f32.mxu0 %vm475_vm0, %v2773_v57 }
 0xbea   : > { %4823 = vmatmul.mubr.msk.f32.gmra.mrb[86].mxu0 %vm475_vm0, %v2774_v40 }
 0xca1   : > { %v4803_v47 = vpop.f32.mrb[72].mxu0 }
 0xca2   : > { %v2889_v7 = vpop.f32.mrb[73].mxu0  ;;  %v6345_v59 = vmul.f32 0.35355338, %v4803_v47 }
 0xca3   : > { %v6347_v62 = vmul.f32 0.35355338, %v2889_v7 }
 0xca4   : > { %v2985_v8 = vsel %vm1393_vm2, %v6345_v59, -inf }
 0xca5   : > { %v4806_v3 = vpop.f32.mrb[74].mxu0  ;;  %v2984_v60 = vsel %vm1393_vm2, %v6347_v62, -inf }
 0xca6   : > { %v2899_v48 = vpop.f32.mrb[75].mxu0  ;;  %v6355_v53 = vmul.f32 0.35355338, %v4806_v3 }
 0xca7   : > { %v6361_v22 = vmul.f32 0.35355338, %v2899_v48 }
 0xca8   : > { %v2987_v0 = vsel %vm1393_vm2, %v6355_v53, -inf }
 0xca9   : > { %v4809_v49 = vpop.f32.mrb[76].mxu0  ;;  %v2986_v32 = vsel %vm1393_vm2, %v6361_v22, -inf }
 0xcaa   : > { %v6349_v5 = vmul.f32 0.35355338, %v4809_v49  ;;  %v2909_v46 = vpop.f32.mrb[77].mxu0 }
 0xcab   : > { %v6351_v1 = vmul.f32 0.35355338, %v2909_v46 }
 0xcac   : > { %v2990_v52 = vsel %vm1393_vm2, %v6349_v5, -inf }
 0xcad   : > { %v2991_v23 = vmax.f32 %v2985_v8, %v2990_v52  ;;  %v2988_v63 = vsel %vm1393_vm2, %v6351_v1, -inf  ;;  %v4812_v61 = vpop.f32.mrb[78].mxu0 }
 0xcae   : > { %v2989_v24 = vmax.f32 %v2984_v60, %v2988_v63  ;;  %v6365_v26 = vmul.f32 0.35355338, %v4812_v61  ;;  %v2919_v30 = vpop.f32.mrb[79].mxu0 }
 0xcaf   : > { %v6367_v2 = vmul.f32 0.35355338, %v2919_v30 }
 0xcb0   : > { %v2994_v31 = vsel %vm1393_vm2, %v6365_v26, -inf }
 0xcb1   : > { %v2995_v33 = vmax.f32 %v2987_v0, %v2994_v31  ;;  %v2992_v6 = vsel %vm1393_vm2, %v6367_v2, -inf  ;;  %v4815_v45 = vpop.f32.mrb[80].mxu0 }
 0xcb2   : > { %v2993_v4 = vmax.f32 %v2986_v32, %v2992_v6  ;;  %v6377_v50 = vmul.f32 0.35355338, %v4815_v45  ;;  %v2929_v56 = vpop.f32.mrb[81].mxu0 }
 0xcb3   : > { %v6379_v41 = vmul.f32 0.35355338, %v2929_v56 }
 0xcb4   : > { %v2998_v43 = vsel %vm1393_vm2, %v6377_v50, -inf }
 0xcb5   : > { %v2999_v10 = vmax.f32 %v2991_v23, %v2998_v43  ;;  %v2996_v27 = vsel %vm1393_vm2, %v6379_v41, -inf  ;;  %v4818_v25 = vpop.f32.mrb[82].mxu0 }
 0xcb6   : > { %v2997_v54 = vmax.f32 %v2989_v24, %v2996_v27  ;;  %v6385_v34 = vmul.f32 0.35355338, %v4818_v25  ;;  %v2939_v17 = vpop.f32.mrb[83].mxu0 }
 0xcb7   : > { %v6387_v35 = vmul.f32 0.35355338, %v2939_v17 }
 0xcb8   : > { %v3002_v16 = vsel %vm1393_vm2, %v6385_v34, -inf }
 0xcb9   : > { %v3003_v36 = vmax.f32 %v2995_v33, %v3002_v16  ;;  %v3000_v15 = vsel %vm1393_vm2, %v6387_v35, -inf  ;;  %v4821_v28 = vpop.f32.mrb[84].mxu0 }
 0xcba   : > { %v3001_v40 = vmax.f32 %v2993_v4, %v3000_v15  ;;  %v6393_v55 = vmul.f32 0.35355338, %v4821_v28  ;;  %v2949_v57 = vpop.f32.mrb[85].mxu0 }
 0xcbb   : > { %v6395_v47 = vmul.f32 0.35355338, %v2949_v57 }
 0xcbc   : > { %v3006_v7 = vsel %vm1393_vm2, %v6393_v55, -inf }
 0xcbd   : > { %v3007_v3 = vmax.f32 %v2999_v10, %v3006_v7  ;;  %v3004_v48 = vsel %vm1393_vm2, %v6395_v47, -inf  ;;  %v4824_v49 = vpop.f32.mrb[86].mxu0 }
 0xcbe   : > { %v3005_v46 = vmax.f32 %v2997_v54, %v3004_v48  ;;  %v6401_v8 = vmul.f32 0.35355338, %v4824_v49  ;;  %v2959_v52 = vpop.f32.mrb[87].mxu0 }
 0xcbf   : > { %v6403_v60 = vmul.f32 0.35355338, %v2959_v52 }
 0xcc0   : > { %v3012_v23 = vmax.f32 %v3005_v46, %v3007_v3  ;;  %v3010_v63 = vsel %vm1393_vm2, %v6401_v8, -inf }
 0xcc1   : > { %v3011_v61 = vmax.f32 %v3003_v36, %v3010_v63  ;;  %v3008_v24 = vsel %vm1393_vm2, %v6403_v60, -inf }
 0xcc2   : > { %v3009_v30 = vmax.f32 %v3001_v40, %v3008_v24 }
 0xcc4   : > { %v3013_v0 = vmax.f32 %v3009_v30, %v3011_v61 }
 0xcc6   : > { %v3014_v31 = vmax.f32 %v3012_v23, %v3013_v0 }
 0xcc8   : > { %v3015_v32 = vrot.slane %v3014_v31, 4 }
 0xcca   : > { %v3016_v33 = vmax.f32 %v3014_v31, %v3015_v32 }
 0xccc   : > { %v3017_v6 = vrot.slane %v3016_v33, 2 }
 0xcce   : > { %v3018_v45 = vmax.f32 %v3016_v33, %v3017_v6 }
 0xcd0   : > { %v3019_v4 = vrot.slane %v3018_v45, 1 }
 0xcd2   : > { %v3020_v56 = vmax.f32 %v3018_v45, %v3019_v4 }
 0xcd4   : > { %v3035_v43 = vsub.f32 %v6403_v60, %v3020_v56  ;;  %v3021_v10 = vsub.f32 %v6347_v62, %v3020_v56  ;;  %v3022_v27 = vsub.f32 %v6345_v59, %v3020_v56  ;;  %v3023_v25 = vsub.f32 %v6361_v22, %v3020_v56 }
 0xcd5   : > { %v3024_v54 = vsub.f32 %v6355_v53, %v3020_v56  ;;  %v3025_v17 = vsub.f32 %v6351_v1, %v3020_v56  ;;  %v3026_v16 = vsub.f32 %v6349_v5, %v3020_v56  ;;  %v3027_v36 = vsub.f32 %v6367_v2, %v3020_v56 }
 0xcd6   : > { %v3037_v15 = vmul.f32 1.442695, %v3021_v10  ;;  %v3039_v28 = vmul.f32 1.442695, %v3022_v27  ;;  %v3028_v40 = vsub.f32 %v6365_v26, %v3020_v56  ;;  %v3041_v57 = vmul.f32 1.442695, %v3023_v25 }
 0xcd7   : > { %v3029_v7 = vsub.f32 %v6379_v41, %v3020_v56  ;;  %v3043_v62 = vmul.f32 1.442695, %v3024_v54  ;;  %v3045_v3 = vmul.f32 1.442695, %v3025_v17  ;;  %v3047_v59 = vmul.f32 1.442695, %v3026_v16 }
 0xcd8   : > { %5396 = vpow2.f32 %v3037_v15  ;;  %v3030_v22 = vsub.f32 %v6377_v50, %v3020_v56  ;;  %v3031_v53 = vsub.f32 %v6387_v35, %v3020_v56  ;;  %v3032_v5 = vsub.f32 %v6385_v34, %v3020_v56 }
 0xcd9   : > { %5398 = vpow2.f32 %v3039_v28  ;;  %v3033_v1 = vsub.f32 %v6395_v47, %v3020_v56  ;;  %v3034_v2 = vsub.f32 %v6393_v55, %v3020_v56  ;;  %v3036_v26 = vsub.f32 %v6401_v8, %v3020_v56  ;;  %v6474_v28 = vld [vmem:[%s5852_s16 + $0x8] sm:$0xff] }
 0xcda   : > { %5400 = vpow2.f32 %v3041_v57  ;;  %v3049_v41 = vmul.f32 1.442695, %v3027_v36  ;;  %v3051_v48 = vmul.f32 1.442695, %v3028_v40  ;;  %v3053_v49 = vmul.f32 1.442695, %v3029_v7 }
 0xcdb   : > { %5402 = vpow2.f32 %v3043_v62  ;;  %v3055_v50 = vmul.f32 1.442695, %v3030_v22  ;;  %v3057_v47 = vmul.f32 1.442695, %v3031_v53  ;;  %v3059_v52 = vmul.f32 1.442695, %v3032_v5 }
 0xcdc   : > { %5404 = vpow2.f32 %v3045_v3  ;;  %v3061_v61 = vmul.f32 1.442695, %v3033_v1  ;;  %v3063_v24 = vmul.f32 1.442695, %v3034_v2  ;;  %v3065_v32 = vmul.f32 1.442695, %v3035_v43 }
 0xcdd   : > { %5406 = vpow2.f32 %v3047_v59  ;;  %v3067_v33 = vmul.f32 1.442695, %v3036_v26  ;;  %v5497_v40 = vld [vmem:[%s5852_s16 + $0x10] sm:$0xff]  ;;  %v6479_v57 = vld [vmem:[%s5852_s16 + $0x18] sm:$0xff]  ;;  %v6483_v7 = vld [vmem:[%s5852_s16 + $0x20] sm:$0xff] }
 0xcde   : > { %5408 = vpow2.f32 %v3049_v41  ;;  %v6487_v62 = vld [vmem:[%s5852_s16 + $0x28] sm:$0xff]  ;;  %v6491_v3 = vld [vmem:[%s5852_s16 + $0x30] sm:$0xff]  ;;  %v6495_v59 = vld [vmem:[%s5852_s16 + $0x38] sm:$0xff] }
 0xcdf   : > { %5410 = vpow2.f32 %v3051_v48 }
 0xce0   : > { %5412 = vpow2.f32 %v3053_v49 }
 0xce1   : > { %5414 = vpow2.f32 %v3055_v50 }
 0xce2   : > { %v6425_v35 = vpop.eup %5396  ;;  %5416 = vpow2.f32 %v3057_v47 }
 0xce3   : > { %v6427_v46 = vpop.eup %5398  ;;  %5418 = vpow2.f32 %v3059_v52 }
 0xce4   : > { %v6429_v34 = vpop.eup %5400  ;;  %v5155_v55 = vpack.c.bf16 %v6427_v46, %v6425_v35  ;;  %5420 = vpow2.f32 %v3061_v61 }
 0xce5   : > { %v6433_v8 = vpop.eup %5402  ;;  %5422 = vpow2.f32 %v3063_v24 }
 0xce6   : > { %v6435_v60 = vpop.eup %5404  ;;  %5156 = vmatprep.subr.bf16.mxu1 %v5155_v55  ;;  %v5159_v23 = vpack.c.bf16 %v6433_v8, %v6429_v34  ;;  %5424 = vpow2.f32 %v3065_v32 }
 0xce7   : > { %v6439_v63 = vpop.eup %5406  ;;  %5158 = vmatpush3.bf16.msra.mxu1 %v5155_v55  ;;  %5426 = vpow2.f32 %v3067_v33 }
 0xce8   : > { %5160 = vmatprep.subr.bf16.mxu1 %v5159_v23  ;;  %v6441_v30 = vpop.eup %5408  ;;  %v5163_v0 = vpack.c.bf16 %v6439_v63, %v6435_v60 }
 0xce9   : > { %v6445_v31 = vpop.eup %5410 }
 0xcea   : > { %v6447_v6 = vpop.eup %5412  ;;  %v5167_v45 = vpack.c.bf16 %v6445_v31, %v6441_v30 }
 0xceb   : > { %5162 = vmatpush3.bf16.msra.mxu1 %v5159_v23  ;;  %v6451_v4 = vpop.eup %5414 }
 0xcec   : > { %5164 = vmatprep.subr.bf16.mxu1 %v5163_v0  ;;  %v6453_v56 = vpop.eup %5416  ;;  %v5171_v43 = vpack.c.bf16 %v6451_v4, %v6447_v6 }
 0xced   : > { %v6457_v10 = vpop.eup %5418 }
 0xcee   : > { %v6459_v27 = vpop.eup %5420  ;;  %v5175_v25 = vpack.c.bf16 %v6457_v10, %v6453_v56 }
 0xcef   : > { %5166 = vmatpush3.bf16.msra.mxu1 %v5163_v0  ;;  %v6463_v54 = vpop.eup %5422 }
 0xcf0   : > { %5168 = vmatprep.subr.bf16.mxu1 %v5167_v45  ;;  %v6465_v17 = vpop.eup %5424  ;;  %v5179_v16 = vpack.c.bf16 %v6463_v54, %v6459_v27 }
 0xcf1   : > { %v6469_v36 = vpop.eup %5426 }
 0xcf2   : > { %v5183_v15 = vpack.c.bf16 %v6469_v36, %v6465_v17 }
 0xcf3   : > { %5170 = vmatpush3.bf16.msra.mxu1 %v5167_v45 }
 0xcf4   : > { %5172 = vmatprep.subr.bf16.mxu1 %v5171_v43 }
 0xcf7   : > { %5174 = vmatpush3.bf16.msra.mxu1 %v5171_v43 }
 0xcf8   : > { %5176 = vmatprep.subr.bf16.mxu1 %v5175_v25 }
 0xcfb   : > { %5178 = vmatpush3.bf16.msra.mxu1 %v5175_v25 }
 0xcfc   : > { %5180 = vmatprep.subr.bf16.mxu1 %v5179_v16 }
 0xcff   : > { %5182 = vmatpush3.bf16.msra.mxu1 %v5179_v16 }
 0xd00   : > { %5184 = vmatprep.subr.bf16.mxu1 %v5183_v15 }
 0xd03   : > { %5186 = vmatpush3.bf16.msra.mxu1 %v5183_v15 }
 0xd06   : > { %4858 = vmatmul.mubr.f32.vlgmr.msra.gmra.mrb[72].mxu1 %v6474_v28 }
 0xd07   : > { %4860 = vmatprep.mubr.f32.mxu1 %v5497_v40 }
 0xd0a   : > { %4861 = vmatmul.mubr.f32.gmra.mrb[74].mxu1 %v6479_v57 }
 0xd0b   : > { %4863 = vmatprep.mubr.f32.mxu1 %v6483_v7 }
 0xd0e   : > { %4864 = vmatmul.mubr.f32.gmra.mrb[76].mxu1 %v6487_v62 }
 0xd0f   : > { %4866 = vmatprep.mubr.f32.mxu1 %v6491_v3 }
 0xd12   : > { %4867 = vmatmul.mubr.f32.gmra.mrb[78].mxu1 %v6495_v59 }
 0xd13   : > { %4885 = vmatprep.mubr.msk.f32.mxu1 %vm749_vm1, %v6096_v44 }
 0xdd9   : > { %v4859_v22 = vpop.f32.mrb[72].mxu1 }
 0xdda   : > { %v3135_v53 = vpop.f32.mrb[73].mxu1 }
 0xddb   : > { %v5187_v5 = vpack.c.bf16 %v4859_v22, %v3135_v53 }
 0xddd   : > { %v4862_v1 = vpop.f32.mrb[74].mxu1  ;;  %5188 = vmatprep.subr.bf16.mxu1 %v5187_v5 }
 0xdde   : > { %v3145_v2 = vpop.f32.mrb[75].mxu1  ;;  %5190 = vmatpush3.bf16.msra.mxu1 %v5187_v5 }
 0xddf   : > { %v5191_v26 = vpack.c.bf16 %v4862_v1, %v3145_v2 }
 0xde1   : > { %v4865_v41 = vpop.f32.mrb[76].mxu1  ;;  %5192 = vmatprep.subr.bf16.mxu1 %v5191_v26 }
 0xde2   : > { %v3155_v48 = vpop.f32.mrb[77].mxu1  ;;  %5194 = vmatpush3.bf16.msra.mxu1 %v5191_v26 }
 0xde3   : > { %v5195_v49 = vpack.c.bf16 %v4865_v41, %v3155_v48 }
 0xde5   : > { %v4868_v50 = vpop.f32.mrb[78].mxu1  ;;  %5196 = vmatprep.subr.bf16.mxu1 %v5195_v49 }
 0xde6   : > { %v3165_v55 = vpop.f32.mrb[79].mxu1  ;;  %5198 = vmatpush3.bf16.msra.mxu1 %v5195_v49 }
 0xde7   : > { %v5199_v47 = vpack.c.bf16 %v4868_v50, %v3165_v55 }
 0xde9   : > { %5200 = vmatprep.subr.bf16.mxu1 %v5199_v47 }
 0xdea   : > { %5202 = vmatpush3.bf16.msra.mxu1 %v5199_v47 }
 0xded   : > { %4886 = vmatmul.mubr.msk.f32.vlgmr.msra.gmra.mrb[80].mxu1 %vm749_vm1, %v6193_v38 }
 0xdee   : > { %4888 = vmatprep.mubr.msk.f32.mxu1 %vm749_vm1, %v6198_v51 }
 0xdf1   : > { %4889 = vmatmul.mubr.msk.f32.gmra.mrb[82].mxu1 %vm749_vm1, %v6205_v9 }
 0xdf2   : > { %4891 = vmatprep.mubr.msk.f32.mxu1 %vm749_vm1, %v6210_v21 }
 0xdf5   : > { %4892 = vmatmul.mubr.msk.f32.gmra.mrb[84].mxu1 %vm749_vm1, %v6218_v37 }
 0xdf6   : > { %4894 = vmatprep.mubr.msk.f32.mxu1 %vm749_vm1, %v6223_v58 }
 0xdf9   : > { %4895 = vmatmul.mubr.msk.f32.gmra.mrb[86].mxu1 %vm749_vm1, %v6228_v11 }
 0xdfa   : > { %4897 = vmatprep.mubr.msk.f32.mxu1 %vm749_vm1, %v6233_v42 }
 0xdfd   : > { %4898 = vmatmul.mubr.msk.f32.gmra.mrb[88].mxu1 %vm749_vm1, %v6238_v18 }
 0xdfe   : > { %4900 = vmatprep.mubr.msk.f32.mxu1 %vm749_vm1, %v6243_v13 }
 0xe01   : > { %4901 = vmatmul.mubr.msk.f32.gmra.mrb[90].mxu1 %vm749_vm1, %v6248_v39 }
 0xe02   : > { %4903 = vmatprep.mubr.msk.f32.mxu1 %vm749_vm1, %v6253_v14 }
 0xe05   : > { %4904 = vmatmul.mubr.msk.f32.gmra.mrb[92].mxu1 %vm749_vm1, %v6258_v29 }
 0xe06   : > { %4906 = vmatprep.mubr.msk.f32.mxu1 %vm749_vm1, %v6263_v19 }
 0xe09   : > { %4907 = vmatmul.mubr.msk.f32.gmra.mrb[94].mxu1 %vm749_vm1, %v6268_v20 }
 0xe0a   : > { %4970 = vmatprep.mubr.f32.mxu1 %v5497_v40 }
 0xec0   : > { %v4887_v44 = vpop.f32.mrb[80].mxu1 }
 0xec1   : > { %5428 = vrcp.f32 %v4887_v44  ;;  %v3240_v38 = vpop.f32.mrb[81].mxu1  ;;  %vm3320_vm3 = vcmp.gt.f32.partialorder %v4887_v44, 0.0 }
 0xec2   : > { %5430 = vrcp.f32 %v3240_v38  ;;  %vm3319_vm1 = vcmp.gt.f32.partialorder %v3240_v38, 0.0 }
 0xec4   : > { %v4890_v51 = vpop.f32.mrb[82].mxu1 }
 0xec5   : > { %5432 = vrcp.f32 %v4890_v51  ;;  %v3250_v9 = vpop.f32.mrb[83].mxu1  ;;  %vm3322_vm9 = vcmp.gt.f32.partialorder %v4890_v51, 0.0 }
 0xec6   : > { %5434 = vrcp.f32 %v3250_v9  ;;  %vm3321_vm8 = vcmp.gt.f32.partialorder %v3250_v9, 0.0 }
 0xec8   : > { %v4893_v21 = vpop.f32.mrb[84].mxu1 }
 0xec9   : > { %5436 = vrcp.f32 %v4893_v21  ;;  %v3260_v37 = vpop.f32.mrb[85].mxu1  ;;  %vm3324_vm11 = vcmp.gt.f32.partialorder %v4893_v21, 0.0 }
 0xeca   : > { %5438 = vrcp.f32 %v3260_v37  ;;  %vm3323_vm10 = vcmp.gt.f32.partialorder %v3260_v37, 0.0 }
 0xecb   : > { %v5429_v58 = vpop.eup %5428 }
 0xecc   : > { %v5431_v11 = vpop.eup %5430  ;;  %v3338_v42 = vmul.f32 %v5429_v58, %v6427_v46  ;;  %v4896_v18 = vpop.f32.mrb[86].mxu1 }
 0xecd   : > { %v3336_v13 = vmul.f32 %v5431_v11, %v6425_v35  ;;  %5440 = vrcp.f32 %v4896_v18  ;;  %v3270_v39 = vpop.f32.mrb[87].mxu1  ;;  %vm3326_vm13 = vcmp.gt.f32.partialorder %v4896_v18, 0.0  ;;  %v3595_v18 = vpop.permute.xlu1 %3594 }
 0xece   : > { %5442 = vrcp.f32 %v3270_v39  ;;  %v3368_v20 = vsel %vm3320_vm3, %v3338_v42, 0.0  ;;  %vm3325_vm12 = vcmp.gt.f32.partialorder %v3270_v39, 0.0 }
 0xecf   : > { %v5433_v14 = vpop.eup %5432  ;;  %v3367_v29 = vsel %vm3319_vm1, %v3336_v13, 0.0  ;;  %v3593_v13 = vpop.permute.xlu0 %3592 }
 0xed0   : > { %v5435_v19 = vpop.eup %5434  ;;  %v3342_v52 = vmul.f32 %v5433_v14, %v6433_v8  ;;  %v4899_v23 = vpop.f32.mrb[88].mxu1  ;;  %4911 = vmatprep.mubr.msk.f32.mxu0 %vm1393_vm2, %v3367_v29 }
 0xed1   : > { %v3340_v61 = vmul.f32 %v5435_v19, %v6429_v34  ;;  %5444 = vrcp.f32 %v4899_v23  ;;  %v3280_v46 = vpop.f32.mrb[89].mxu1  ;;  %4912 = vmatmul.mubr.msk.f32.vlgmr.msra.gmra.mrb[88].mxu0 %vm1393_vm2, %v3368_v20  ;;  %vm3328_vm15 = vcmp.gt.f32.partialorder %v4899_v23, 0.0  ;;  %v3599_v39 = vpop.permute.xlu1 %3598 }
 0xed2   : > { %5446 = vrcp.f32 %v3280_v46  ;;  %v3370_v32 = vsel %vm3322_vm9, %v3342_v52, 0.0  ;;  %vm3327_vm14 = vcmp.gt.f32.partialorder %v3280_v46, 0.0 }
 0xed3   : > { %v5437_v35 = vpop.eup %5436  ;;  %v3369_v24 = vsel %vm3321_vm8, %v3340_v61, 0.0 }
 0xed4   : > { %v5439_v0 = vpop.eup %5438  ;;  %v3346_v33 = vmul.f32 %v5437_v35, %v6439_v63  ;;  %v4902_v45 = vpop.f32.mrb[90].mxu1  ;;  %4914 = vmatprep.mubr.msk.f32.mxu0 %vm1393_vm2, %v3369_v24 }
 0xed5   : > { %v3344_v8 = vmul.f32 %v5439_v0, %v6435_v60  ;;  %5448 = vrcp.f32 %v4902_v45  ;;  %v3290_v34 = vpop.f32.mrb[91].mxu1  ;;  %4915 = vmatmul.mubr.msk.f32.gmra.mrb[90].mxu0 %vm1393_vm2, %v3370_v32  ;;  %vm3330_vm5 = vcmp.gt.f32.partialorder %v4902_v45, 0.0  ;;  %v3603_v14 = vpop.permute.xlu1 %3602 }
 0xed6   : > { %5450 = vrcp.f32 %v3290_v34  ;;  %v3372_v15 = vsel %vm3324_vm11, %v3346_v33, 0.0  ;;  %vm3329_vm4 = vcmp.gt.f32.partialorder %v3290_v34, 0.0 }
 0xed7   : > { %v5441_v43 = vpop.eup %5440  ;;  %v3371_v25 = vsel %vm3323_vm10, %v3344_v8, 0.0 }
 0xed8   : > { %v5443_v16 = vpop.eup %5442  ;;  %v3350_v40 = vmul.f32 %v5441_v43, %v6445_v31  ;;  %v4905_v22 = vpop.f32.mrb[92].mxu1  ;;  %4917 = vmatprep.mubr.msk.f32.mxu0 %vm1393_vm2, %v3371_v25 }
 0xed9   : > { %v3348_v63 = vmul.f32 %v5443_v16, %v6441_v30  ;;  %5452 = vrcp.f32 %v4905_v22  ;;  %v3300_v60 = vpop.f32.mrb[93].mxu1  ;;  %4918 = vmatmul.mubr.msk.f32.gmra.mrb[92].mxu0 %vm1393_vm2, %v3372_v15  ;;  %vm3332_vm7 = vcmp.gt.f32.partialorder %v4905_v22, 0.0  ;;  %v3607_v23 = vpop.permute.xlu1 %3606 }
 0xeda   : > { %5454 = vrcp.f32 %v3300_v60  ;;  %v3374_v2 = vsel %vm3326_vm13, %v3350_v40, 0.0  ;;  %vm3331_vm6 = vcmp.gt.f32.partialorder %v3300_v60, 0.0 }
 0xedb   : > { %v5445_v53 = vpop.eup %5444  ;;  %v3373_v5 = vsel %vm3325_vm12, %v3348_v63, 0.0 }
 0xedc   : > { %v5447_v1 = vpop.eup %5446  ;;  %v3354_v26 = vmul.f32 %v5445_v53, %v6451_v4  ;;  %v4908_v41 = vpop.f32.mrb[94].mxu1  ;;  %4920 = vmatprep.mubr.msk.f32.mxu0 %vm1393_vm2, %v3373_v5 }
 0xedd   : > { %v3352_v31 = vmul.f32 %v5447_v1, %v6447_v6  ;;  %5456 = vrcp.f32 %v4908_v41  ;;  %v3310_v30 = vpop.f32.mrb[95].mxu1  ;;  %4921 = vmatmul.mubr.msk.f32.gmra.mrb[94].mxu0 %vm1393_vm2, %v3374_v2  ;;  %vm3334_vm3 = vcmp.gt.f32.partialorder %v4908_v41, 0.0  ;;  %v3611_v34 = vpop.permute.xlu1 %3610 }
 0xede   : > { %5458 = vrcp.f32 %v3310_v30  ;;  %v3376_v55 = vsel %vm3328_vm15, %v3354_v26, 0.0  ;;  %vm3333_vm1 = vcmp.gt.f32.partialorder %v3310_v30, 0.0 }
 0xedf   : > { %v5449_v48 = vpop.eup %5448  ;;  %v3375_v49 = vsel %vm3327_vm14, %v3352_v31, 0.0 }
 0xee0   : > { %v5451_v50 = vpop.eup %5450  ;;  %v3358_v47 = vmul.f32 %v5449_v48, %v6457_v10  ;;  %4923 = vmatprep.mubr.msk.f32.mxu0 %vm1393_vm2, %v3375_v49 }
 0xee1   : > { %v3356_v4 = vmul.f32 %v5451_v50, %v6453_v56  ;;  %4924 = vmatmul.mubr.msk.f32.gmra.mrb[96].mxu0 %vm1393_vm2, %v3376_v55  ;;  %v3615_v60 = vpop.permute.xlu1 %3614 }
 0xee2   : > { %v3378_v51 = vsel %vm3330_vm5, %v3358_v47, 0.0 }
 0xee3   : > { %v5453_v6 = vpop.eup %5452  ;;  %v3377_v44 = vsel %vm3329_vm4, %v3356_v4, 0.0 }
 0xee4   : > { %v5455_v38 = vpop.eup %5454  ;;  %v3362_v9 = vmul.f32 %v5453_v6, %v6463_v54  ;;  %4926 = vmatprep.mubr.msk.f32.mxu0 %vm1393_vm2, %v3377_v44 }
 0xee5   : > { %v3360_v21 = vmul.f32 %v5455_v38, %v6459_v27  ;;  %4927 = vmatmul.mubr.msk.f32.gmra.mrb[98].mxu0 %vm1393_vm2, %v3378_v51  ;;  %v3619_v50 = vpop.permute.xlu1 %3618 }
 0xee6   : > { %v3380_v58 = vsel %vm3332_vm7, %v3362_v9, 0.0 }
 0xee7   : > { %v5457_v10 = vpop.eup %5456  ;;  %v3379_v56 = vsel %vm3331_vm6, %v3360_v21, 0.0 }
 0xee8   : > { %v5459_v37 = vpop.eup %5458  ;;  %v3366_v11 = vmul.f32 %v5457_v10, %v6469_v36  ;;  %4929 = vmatprep.mubr.msk.f32.mxu0 %vm1393_vm2, %v3379_v56  ;;  %v3597_v36 = vpop.permute.xlu0 %3596 }
 0xee9   : > { %v3364_v42 = vmul.f32 %v5459_v37, %v6465_v17  ;;  %4930 = vmatmul.mubr.msk.f32.gmra.mrb[100].mxu0 %vm1393_vm2, %v3380_v58  ;;  %v3623_v9 = vpop.permute.xlu1 %3622 }
 0xeea   : > { %v3382_v27 = vsel %vm3334_vm3, %v3366_v11, 0.0 }
 0xeeb   : > { %v3381_v54 = vsel %vm3333_vm1, %v3364_v42, 0.0 }
 0xeec   : > { %4932 = vmatprep.mubr.msk.f32.mxu0 %vm1393_vm2, %v3381_v54  ;;  %v3601_v29 = vpop.permute.xlu0 %3600 }
 0xeed   : > { %4933 = vmatmul.mubr.msk.f32.gmra.mrb[102].mxu0 %vm1393_vm2, %v3382_v27 }
 0xeee   : > { %4967 = vmatprep.mubr.f32.mxu0 %v6303_v12 }
 0xef0   : > { %v3605_v35 = vpop.permute.xlu0 %3604 }
 0xef4   : > { %v3609_v25 = vpop.permute.xlu0 %3608 }
 0xef8   : > { %v3613_v1 = vpop.permute.xlu0 %3612 }
 0xefc   : > { %v3617_v47 = vpop.permute.xlu0 %3616 }
 0xf00   : > { %v3621_v56 = vpop.permute.xlu0 %3620 }
 0xfa4   : > { %v4913_v19 = vpop.f32.mrb[88].mxu0 }
 0xfa5   : > { %v3641_v17 = vmul.f32 %v4913_v19, %v3595_v18  ;;  %v3497_v20 = vpop.f32.mrb[89].mxu0 }
 0xfa6   : > { %v3640_v52 = vmul.f32 %v3593_v13, %v3497_v20 }
 0xfa8   : > { %v5203_v61 = vpack.c.bf16 %v3641_v17, %v3640_v52  ;;  %v4916_v46 = vpop.f32.mrb[90].mxu0 }
 0xfa9   : > { %v3643_v24 = vmul.f32 %v4916_v46, %v3599_v39  ;;  %v3507_v0 = vpop.f32.mrb[91].mxu0 }
 0xfaa   : > { %v3642_v32 = vmul.f32 %v3597_v36, %v3507_v0  ;;  %5204 = vmatprep.subr.bf16.mxu0 %v5203_v61  ;;  %5235 = vmatprep.subr.bf16.mxu1 %v5203_v61 }
 0xfab   : > { %5206 = vmatpush3.bf16.msra.mxu0 %v5203_v61  ;;  %5243 = vmatpush3.bf16.msra.mxu1 %v5203_v61 }
 0xfac   : > { %v5207_v12 = vpack.c.bf16 %v3643_v24, %v3642_v32  ;;  %v4919_v33 = vpop.f32.mrb[92].mxu0 }
 0xfad   : > { %v3645_v45 = vmul.f32 %v4919_v33, %v3603_v14  ;;  %v3517_v8 = vpop.f32.mrb[93].mxu0 }
 0xfae   : > { %v3644_v43 = vmul.f32 %v3601_v29, %v3517_v8  ;;  %5208 = vmatprep.subr.bf16.mxu0 %v5207_v12  ;;  %5236 = vmatprep.subr.bf16.mxu1 %v5207_v12 }
 0xfaf   : > { %5210 = vmatpush3.bf16.msra.mxu0 %v5207_v12  ;;  %5244 = vmatpush3.bf16.msra.mxu1 %v5207_v12 }
 0xfb0   : > { %v5211_v16 = vpack.c.bf16 %v3645_v45, %v3644_v43  ;;  %v4922_v15 = vpop.f32.mrb[94].mxu0 }
 0xfb1   : > { %v3647_v40 = vmul.f32 %v4922_v15, %v3607_v23  ;;  %v3527_v22 = vpop.f32.mrb[95].mxu0 }
 0xfb2   : > { %v3646_v63 = vmul.f32 %v3605_v35, %v3527_v22  ;;  %5212 = vmatprep.subr.bf16.mxu0 %v5211_v16  ;;  %5237 = vmatprep.subr.bf16.mxu1 %v5211_v16 }
 0xfb3   : > { %5214 = vmatpush3.bf16.msra.mxu0 %v5211_v16  ;;  %5245 = vmatpush3.bf16.msra.mxu1 %v5211_v16 }
 0xfb4   : > { %v5215_v53 = vpack.c.bf16 %v3647_v40, %v3646_v63  ;;  %v4925_v5 = vpop.f32.mrb[96].mxu0 }
 0xfb5   : > { %v3649_v2 = vmul.f32 %v4925_v5, %v3611_v34  ;;  %v3537_v26 = vpop.f32.mrb[97].mxu0 }
 0xfb6   : > { %v3648_v41 = vmul.f32 %v3609_v25, %v3537_v26  ;;  %5216 = vmatprep.subr.bf16.mxu0 %v5215_v53  ;;  %5238 = vmatprep.subr.bf16.mxu1 %v5215_v53 }
 0xfb7   : > { %5218 = vmatpush3.bf16.msra.mxu0 %v5215_v53  ;;  %5246 = vmatpush3.bf16.msra.mxu1 %v5215_v53 }
 0xfb8   : > { %v5219_v31 = vpack.c.bf16 %v3649_v2, %v3648_v41  ;;  %v4928_v30 = vpop.f32.mrb[98].mxu0 }
 0xfb9   : > { %v3651_v48 = vmul.f32 %v4928_v30, %v3615_v60  ;;  %v3547_v49 = vpop.f32.mrb[99].mxu0 }
 0xfba   : > { %v3650_v55 = vmul.f32 %v3613_v1, %v3547_v49  ;;  %5220 = vmatprep.subr.bf16.mxu0 %v5219_v31  ;;  %5239 = vmatprep.subr.bf16.mxu1 %v5219_v31 }
 0xfbb   : > { %5222 = vmatpush3.bf16.msra.mxu0 %v5219_v31  ;;  %5247 = vmatpush3.bf16.msra.mxu1 %v5219_v31 }
 0xfbc   : > { %v5223_v4 = vpack.c.bf16 %v3651_v48, %v3650_v55  ;;  %v4931_v6 = vpop.f32.mrb[100].mxu0 }
 0xfbd   : > { %v3653_v44 = vmul.f32 %v4931_v6, %v3619_v50  ;;  %v3557_v38 = vpop.f32.mrb[101].mxu0 }
 0xfbe   : > { %v3652_v51 = vmul.f32 %v3617_v47, %v3557_v38  ;;  %5224 = vmatprep.subr.bf16.mxu0 %v5223_v4  ;;  %5240 = vmatprep.subr.bf16.mxu1 %v5223_v4 }
 0xfbf   : > { %5226 = vmatpush3.bf16.msra.mxu0 %v5223_v4  ;;  %5248 = vmatpush3.bf16.msra.mxu1 %v5223_v4 }
 0xfc0   : > { %v5227_v21 = vpack.c.bf16 %v3653_v44, %v3652_v51  ;;  %v4934_v10 = vpop.f32.mrb[102].mxu0 }
 0xfc1   : > { %v3655_v37 = vmul.f32 %v4934_v10, %v3623_v9  ;;  %v3567_v58 = vpop.f32.mrb[103].mxu0 }
 0xfc2   : > { %v3654_v11 = vmul.f32 %v3621_v56, %v3567_v58  ;;  %5228 = vmatprep.subr.bf16.mxu0 %v5227_v21  ;;  %5241 = vmatprep.subr.bf16.mxu1 %v5227_v21 }
 0xfc3   : > { %5230 = vmatpush3.bf16.msra.mxu0 %v5227_v21  ;;  %5249 = vmatpush3.bf16.msra.mxu1 %v5227_v21 }
 0xfc4   : > { %v5231_v42 = vpack.c.bf16 %v3655_v37, %v3654_v11 }
 0xfc6   : > { %5232 = vmatprep.subr.bf16.mxu0 %v5231_v42  ;;  %5242 = vmatprep.subr.bf16.mxu1 %v5231_v42 }
 0xfc7   : > { %5234 = vmatpush3.bf16.msra.mxu0 %v5231_v42  ;;  %5250 = vmatpush3.bf16.msra.mxu1 %v5231_v42 }
 0xfca   : > { %4971 = vmatmul.mubr.f32.vlgmr.msra.gmra.mrb[96].mxu1 %v6479_v57  ;;  %4968 = vmatmul.mubr.f32.vlgmr.msra.gmra.mrb[104].mxu0 %v6474_v28 }
 0xfcb   : > { %4973 = vmatprep.mubr.f32.mxu1 %v6483_v7 }
 0xfce   : > { %4974 = vmatmul.mubr.f32.gmra.mrb[98].mxu1 %v6487_v62 }
 0xfcf   : > { %4976 = vmatprep.mubr.f32.mxu1 %v6491_v3 }
 0xfd2   : > { %4977 = vmatmul.mubr.f32.gmra.mrb[100].mxu1 %v6495_v59 }
0x109d   : > { %v4972_v54 = vpop.f32.mrb[96].mxu1  ;;  %v4969_v27 = vpop.f32.mrb[104].mxu0 }
0x109e   : > { %3764 = vst.msk [vmem:[%s419_s21 + $0x18] sm:$0xff] %vm475_vm0, %v4972_v54  ;;  %v3732_v18 = vpop.f32.mrb[97].mxu1  ;;  %3762 = vst.msk [vmem:[%s419_s21 + $0x8] sm:$0xff] %vm475_vm0, %v4969_v27  ;;  %v3722_v28 = vpop.f32.mrb[105].mxu0 }
0x109f   : > { %3763 = vst.msk [vmem:[%s419_s21 + $0x10] sm:$0xff] %vm475_vm0, %v3732_v18  ;;  %3761 = vst.msk [vmem:[%s419_s21] sm:$0xff] %vm475_vm0, %v3722_v28 }
0x10a1   : > { %v4975_v57 = vpop.f32.mrb[98].mxu1 }
0x10a2   : > { %3766 = vst.msk [vmem:[%s419_s21 + $0x28] sm:$0xff] %vm475_vm0, %v4975_v57  ;;  %v3742_v7 = vpop.f32.mrb[99].mxu1 }
0x10a3   : > { %3765 = vst.msk [vmem:[%s419_s21 + $0x20] sm:$0xff] %vm475_vm0, %v3742_v7 }
0x10a5   : > { %v4978_v62 = vpop.f32.mrb[100].mxu1 }
0x10a6   : > { %3768 = vst.msk [vmem:[%s419_s21 + $0x38] sm:$0xff] %vm475_vm0, %v4978_v62  ;;  %v3752_v3 = vpop.f32.mrb[101].mxu1 }
0x10a7   : > { %3767 = vst.msk [vmem:[%s419_s21 + $0x30] sm:$0xff] %vm475_vm0, %v3752_v3 }
0x10a8 PF: > { %s20_s13 = sadd.s32 1, %s5509_s13  }
0x10a9   : > { %p17_p4 = scmp.ge.s32.totalorder %s20_s13, 5  }
0x10ab   :  { %19 = sbr.rel (!%p17_p4) target bundleno = 1 (0x1), region = 101 }

// kernel: predict_model_forward.4
= control target key start
LH: loop header
LB: loop body
LE: loop exit
PB: predicated region body
PF: predicated region fallthrough
CT: control target
= control target key end

     0   :  { %v877_v3 = vmov 0.0   ;;  %vm59_vm0 = vcmask 523264   ;;  %v878_v56 = vmov 0   ;;  %v49_v60 = vlaneseq  ;;  %s1187_s3 = inlined_call_operand.vmem [shape: f32[64,256], index: 3, kind: input, shape index: {}]   ;;  %s1188_s4 = inlined_call_operand.vmem [shape: f32[64,256], index: 4, kind: input, shape index: {}]   ;;  %s1189_s0 = inlined_call_operand.vmem [shape: f32[48,64], index: 0, kind: input, shape index: {}]   ;;  %s1190_s1 = inlined_call_operand.vmem [shape: s32[16,1], index: 1, kind: input, shape index: {}]   ;;  %s1191_s5 = inlined_call_operand.vmem [shape: f32[1,256], index: 5, kind: input, shape index: {}]   ;;  %s1192_s2 = inlined_call_operand.<no memory space> [shape: f32[1,1], index: 2, kind: input, shape index: {}]   ;;  %s1193_s6 = inlined_call_operand.vmem [shape: f32[16,32], index: 6, kind: output, shape index: {}]  }
   0x1   :  { %v32_v0 = vld [vmem:[%s1187_s3 + $0x8] sm:$0xff]  ;;  %v34_v1 = vld [vmem:[%s1187_s3 + $0x18] sm:$0xff]  ;;  %v31_v2 = vld [vmem:[%s1187_s3] sm:$0xff]  ;;  %142 = vmatprep.mubr.f32.mxu1 %v877_v3  ;;  %417 = vmatprep.mubr.f32.mxu0 %v877_v3  ;;  %vm681_vm13 = vcmask 261120  }
   0x2   :  { %v711_v4 = vpack.c.bf16 %v34_v1, %v32_v0  ;;  %v33_v5 = vld [vmem:[%s1187_s3 + $0x10] sm:$0xff]  ;;  %v36_v6 = vld [vmem:[%s1187_s3 + $0x28] sm:$0xff]  ;;  %v38_v7 = vld [vmem:[%s1187_s3 + $0x38] sm:$0xff]  ;;  %803 = vset.pattern.permute.xlu1 %v878_v56  ;;  %804 = vset.pattern.permute.xlu0 %v878_v56  ;;  %v50_v61 = vshrl.u32 %v49_v60, 7 }
   0x3   :  { %v713_v8 = vpack.c.bf16 %v33_v5, %v31_v2  ;;  %v715_v9 = vpack.c.bf16 %v38_v7, %v36_v6  ;;  %v35_v10 = vld [vmem:[%s1187_s3 + $0x20] sm:$0xff]  ;;  %v37_v11 = vld [vmem:[%s1187_s3 + $0x30] sm:$0xff]  ;;  %v40_v12 = vld [vmem:[%s1187_s3 + $0x48] sm:$0xff] }
   0x4   :  { %712 = vmatprep.subr.bf16.mxu1 %v711_v4  ;;  %v42_v13 = vld [vmem:[%s1187_s3 + $0x58] sm:$0xff]  ;;  %v717_v14 = vpack.c.bf16 %v37_v11, %v35_v10  ;;  %v39_v15 = vld [vmem:[%s1187_s3 + $0x40] sm:$0xff]  ;;  %v41_v16 = vld [vmem:[%s1187_s3 + $0x50] sm:$0xff]  ;;  %v51_v62 = vsub.s32 0, %v50_v61  ;;  %v55_v0 = vsub.s32 1, %v50_v61 }
   0x5   :  { %714 = vmatpush1.bf16.msra.mxu1 %v713_v8  ;;  %v719_v17 = vpack.c.bf16 %v42_v13, %v40_v12  ;;  %v44_v18 = vld [vmem:[%s1187_s3 + $0x68] sm:$0xff]  ;;  %v46_v19 = vld [vmem:[%s1187_s3 + $0x78] sm:$0xff]  ;;  %v179_v22 = vld [vmem:[%s1188_s4] sm:$0xff]  ;;  %v721_v27 = vpack.c.bf16 %v41_v16, %v39_v15 }
   0x6   :  { %716 = vmatprep.subr.bf16.mxu1 %v715_v9  ;;  %v180_v20 = vld [vmem:[%s1188_s4 + $0x8] sm:$0xff]  ;;  %v182_v21 = vld [vmem:[%s1188_s4 + $0x18] sm:$0xff]  ;;  %v181_v23 = vld [vmem:[%s1188_s4 + $0x10] sm:$0xff]  ;;  %v723_v30 = vpack.c.bf16 %v46_v19, %v44_v18 }
   0x7   :  { %v727_v24 = vpack.c.bf16 %v182_v21, %v180_v20  ;;  %v184_v25 = vld [vmem:[%s1188_s4 + $0x28] sm:$0xff]  ;;  %v186_v26 = vld [vmem:[%s1188_s4 + $0x38] sm:$0xff]  ;;  %v43_v28 = vld [vmem:[%s1187_s3 + $0x60] sm:$0xff]  ;;  %v981_v29 = vpack.c.bf16 %v181_v23, %v179_v22 }
   0x8   :  { %v45_v31 = vld [vmem:[%s1187_s3 + $0x70] sm:$0xff]  ;;  %v986_v32 = vpack.c.bf16 %v186_v26, %v184_v25  ;;  %v183_v33 = vld [vmem:[%s1188_s4 + $0x20] sm:$0xff]  ;;  %v188_v35 = vld [vmem:[%s1188_s4 + $0x48] sm:$0xff] }
   0x9   :  { %718 = vmatpush1.bf16.msra.mxu1 %v717_v14  ;;  %v185_v34 = vld [vmem:[%s1188_s4 + $0x30] sm:$0xff]  ;;  %744 = vmatprep.subr.bf16.mxu0 %v727_v24  ;;  %v190_v36 = vld [vmem:[%s1188_s4 + $0x58] sm:$0xff]  ;;  %v725_v37 = vpack.c.bf16 %v45_v31, %v43_v28  ;;  %v187_v40 = vld [vmem:[%s1188_s4 + $0x40] sm:$0xff] }
   0xa   :  { %720 = vmatprep.subr.bf16.mxu1 %v719_v17  ;;  %746 = vmatpush1.bf16.msra.mxu0 %v981_v29  ;;  %v1002_v38 = vpack.c.bf16 %v185_v34, %v183_v33  ;;  %v1004_v39 = vpack.c.bf16 %v190_v36, %v188_v35  ;;  %v189_v41 = vld [vmem:[%s1188_s4 + $0x50] sm:$0xff]  ;;  %v192_v42 = vld [vmem:[%s1188_s4 + $0x68] sm:$0xff]  ;;  %v194_v43 = vld [vmem:[%s1188_s4 + $0x78] sm:$0xff] }
   0xb   :  { %748 = vmatprep.subr.bf16.mxu0 %v986_v32  ;;  %v25_v44 = vld [vmem:[%s1189_s0] sm:$0xff]  ;;  %v1023_v45 = vpack.c.bf16 %v189_v41, %v187_v40  ;;  %v1025_v46 = vpack.c.bf16 %v194_v43, %v192_v42  ;;  %v193_v48 = vld [vmem:[%s1188_s4 + $0x70] sm:$0xff]  ;;  %v26_v49 = vld [vmem:[%s1189_s0 + $0x8] sm:$0xff] }
   0xc   :  { %v191_v47 = vld [vmem:[%s1188_s4 + $0x60] sm:$0xff]  ;;  %v27_v51 = vld [vmem:[%s1189_s0 + $0x10] sm:$0xff]  ;;  %v28_v52 = vld [vmem:[%s1189_s0 + $0x18] sm:$0xff] }
   0xd   :  { %722 = vmatpush1.bf16.msra.mxu1 %v721_v27  ;;  %v1041_v50 = vpack.c.bf16 %v193_v48, %v191_v47  ;;  %v29_v53 = vld [vmem:[%s1189_s0 + $0x20] sm:$0xff]  ;;  %v30_v54 = vld [vmem:[%s1189_s0 + $0x28] sm:$0xff] }
   0xe   :  { %724 = vmatprep.subr.bf16.mxu1 %v723_v30  ;;  %750 = vmatpush1.bf16.msra.mxu0 %v1002_v38  ;;  %v1078_v55 = vld [vmem:[%s1190_s1] sm:$0xff]  ;;  %v1087_v58 = vld [vmem:[%s1190_s1 + $0x8] sm:$0xff]  ;;  %s879_s1 = smov 64  }
   0xf   :  { %752 = vmatprep.subr.bf16.mxu0 %v1004_v39  ;;  %vm325_vm1 = vcmp.gt.s32.totalorder %v1078_v55, 0  ;;  %vm326_vm2 = vcmp.gt.s32.totalorder %v1087_v58, 0  ;;  %v47_v63 = vld [vmem:[%s1191_s5] sm:$0x3]  ;;  %vm478_vm5 = vcmp.gt.s32.totalorder %v1078_v55, 1  ;;  %vm479_vm6 = vcmp.gt.s32.totalorder %v1087_v58, 1 }
  0x10   :  { %v327_v57 = vsel %vm325_vm1, 1, %v878_v56  ;;  %v328_v59 = vsel %vm326_vm2, 1, %v878_v56  ;;  %v52_v1 = vrot.slane %v47_v63, %v51_v62  ;;  %v56_v2 = vrot.slane %v47_v63, %v55_v0 }
  0x11   :  { %726 = vmatpush1.bf16.msra.mxu1 %v725_v37  ;;  %330 = vperm.xlu1 %803, %v327_v57   ;;  %vm633_vm9 = vcmp.gt.s32.totalorder %v1078_v55, 2  ;;  %vm634_vm10 = vcmp.gt.s32.totalorder %v1087_v58, 2 }
  0x12   :  { %728 = vmatprep.subr.bf16.mxu1 %v727_v24  ;;  %754 = vmatpush1.bf16.msra.mxu0 %v1023_v45 }
  0x13   :  { %756 = vmatprep.subr.bf16.mxu0 %v1025_v46 }
  0x14   :  { %688 = vmatmul.mubr.msk.f32.vlgmr.msra.gmra.mrb[0].mxu1 %vm59_vm0, %v25_v44 }
  0x15   :  { %730 = vmatpush1.bf16.msra.mxu1 %v981_v29  ;;  %148 = vmatprep.mubr.f32.mxu1 %v877_v3 }
  0x16   :  { %732 = vmatprep.subr.bf16.mxu1 %v986_v32  ;;  %758 = vmatpush1.bf16.msra.mxu0 %v1041_v50 }
  0x17   :  { %760 = vmatprep.subr.bf16.mxu0 %v727_v24  ;;  %333 = vperm.xlu1 %803, %v328_v59  }
  0x18   :  { %689 = vmatmul.mubr.msk.f32.gmra.mrb[2].mxu1 %vm59_vm0, %v26_v49 }
  0x19   :  { %154 = vmatprep.mubr.f32.mxu1 %v877_v3  ;;  %734 = vmatpush1.bf16.msra.mxu1 %v1002_v38 }
  0x1a   :  { %736 = vmatprep.subr.bf16.mxu1 %v1004_v39 }
  0x1c   :  { %690 = vmatmul.mubr.msk.f32.gmra.mrb[4].mxu1 %vm59_vm0, %v27_v51 }
  0x1d   :  { %160 = vmatprep.mubr.f32.mxu1 %v877_v3  ;;  %738 = vmatpush1.bf16.msra.mxu1 %v1023_v45 }
  0x1e   :  { %740 = vmatprep.subr.bf16.mxu1 %v1025_v46 }
  0x20   :  { %691 = vmatmul.mubr.msk.f32.gmra.mrb[6].mxu1 %vm59_vm0, %v28_v52 }
  0x21   :  { %166 = vmatprep.mubr.f32.mxu1 %v877_v3  ;;  %742 = vmatpush1.bf16.msra.mxu1 %v1041_v50 }
  0x24   :  { %692 = vmatmul.mubr.msk.f32.gmra.mrb[8].mxu1 %vm59_vm0, %v29_v53 }
  0x25   :  { %172 = vmatprep.mubr.f32.mxu1 %v877_v3 }
  0x28   :  { %693 = vmatmul.mubr.msk.f32.gmra.mrb[10].mxu1 %vm59_vm0, %v30_v54 }
  0x29   :  { %264 = vmatprep.mubr.f32.mxu1 %v877_v3 }
  0x2c   :  { %265 = vmatmul.mubr.f32.vlgmr.msra.gmra.mrb[0].mxu1 %v877_v3 }
  0x2d   :  { %270 = vmatprep.mubr.f32.mxu1 %v877_v3 }
  0x30   :  { %271 = vmatmul.mubr.f32.gmra.mrb[2].mxu1 %v877_v3 }
  0x90   :  { %v331_v49 = vpop.permute.xlu1 %330 }
  0x91   :  { %vm335_vm3 = vcmp.eq.s32.totalorder %v331_v49, 1 }
  0x96   :  { %v334_v59 = vpop.permute.xlu1 %333 }
  0x97   :  { %vm336_vm4 = vcmp.eq.s32.totalorder %v334_v59, 1 }
  0xef   :  { %v156_v4 = vpop.f32.mrb[4].mxu1 }
  0xf0   :  { %v1094_v5 = vadd.f32 %v156_v4, %v52_v1  ;;  %v158_v6 = vpop.f32.mrb[5].mxu1 }
  0xf1   :  { %v1096_v7 = vadd.f32 %v158_v6, %v56_v2 }
  0xf3   :  { %v162_v8 = vpop.f32.mrb[6].mxu1 }
  0xf4   :  { %v1098_v9 = vadd.f32 %v162_v8, %v52_v1  ;;  %v164_v10 = vpop.f32.mrb[7].mxu1 }
  0xf5   :  { %v1100_v11 = vadd.f32 %v164_v10, %v56_v2 }
  0xf7   :  { %v168_v12 = vpop.f32.mrb[8].mxu1 }
  0xf8   :  { %v1102_v13 = vadd.f32 %v168_v12, %v52_v1  ;;  %v170_v14 = vpop.f32.mrb[9].mxu1 }
  0xf9   :  { %v1104_v15 = vadd.f32 %v170_v14, %v56_v2 }
  0xfb   :  { %v174_v16 = vpop.f32.mrb[10].mxu1 }
  0xfc   :  { %v1106_v17 = vadd.f32 %v174_v16, %v52_v1  ;;  %v176_v18 = vpop.f32.mrb[11].mxu1 }
  0xfd   :  { %v1108_v19 = vadd.f32 %v176_v18, %v56_v2 }
  0xff   :  { %v266_v20 = vpop.f32.mrb[0].mxu1 }
 0x100   :  { %v775_v21 = vadd.f32 %v266_v20, %v52_v1  ;;  %v268_v22 = vpop.f32.mrb[1].mxu1 }
 0x101   :  { %v776_v28 = vadd.f32 %v268_v22, %v56_v2 }
 0x102   :  { %v694_v23 = vmul.f32 -1.442695, %v775_v21 }
 0x103   :  { %v272_v24 = vpop.f32.mrb[2].mxu1  ;;  %v696_v44 = vmul.f32 -1.442695, %v776_v28 }
 0x104   :  { %805 = vpow2.f32 %v694_v23  ;;  %v777_v25 = vadd.f32 %v272_v24, %v52_v1  ;;  %v274_v26 = vpop.f32.mrb[3].mxu1 }
 0x105   :  { %v778_v33 = vadd.f32 %v274_v26, %v56_v2 }
 0x106   :  { %v695_v27 = vmul.f32 -1.442695, %v777_v25 }
 0x107   :  { %v697_v47 = vmul.f32 -1.442695, %v778_v33 }
 0x108   :  { %807 = vpow2.f32 %v695_v27 }
 0x109   :  { %809 = vtanh.f32 %v776_v28 }
 0x10e   :  { %v806_v30 = vpop.eup %805 }
 0x10f   :  { %v287_v31 = vadd.f32 1.0, %v806_v30 }
 0x111   :  { %811 = vrcp.f32 %v287_v31 }
 0x112   :  { %v808_v34 = vpop.eup %807  ;;  %813 = vtanh.f32 %v778_v33  ;;  %v481_v33 = vsel %vm479_vm6, 1, %v878_v56 }
 0x113   :  { %v288_v35 = vadd.f32 1.0, %v808_v34  ;;  %v810_v36 = vpop.eup %809 }
 0x115   :  { %815 = vrcp.f32 %v288_v35 }
 0x116   :  { %817 = vpow2.f32 %v696_v44 }
 0x117   :  { %819 = vpow2.f32 %v697_v47 }
 0x11b   :  { %v812_v37 = vpop.eup %811 }
 0x11c   :  { %v309_v40 = vmul.f32 %v812_v37, %v810_v36  ;;  %v814_v41 = vpop.eup %813  ;;  %v307_v53 = vmul.f32 0.0, %v812_v37 }
 0x11e   :  { %313 = vrot.lane.b32.xlu0 %v309_v40, %s879_s1 }
 0x11f   :  { %v816_v42 = vpop.eup %815 }
 0x120   :  { %v310_v43 = vmul.f32 %v816_v42, %v814_v41  ;;  %v818_v48 = vpop.eup %817  ;;  %v308_v62 = vmul.f32 0.0, %v816_v42 }
 0x121   :  { %v301_v51 = vadd.f32 1.0, %v818_v48  ;;  %v820_v52 = vpop.eup %819 }
 0x122   :  { %315 = vrot.lane.b32.xlu0 %v310_v43, %s879_s1  ;;  %v302_v60 = vadd.f32 1.0, %v820_v52 }
 0x123   :  { %821 = vrcp.f32 %v301_v51 }
 0x12d   :  { %v822_v2 = vpop.eup %821 }
 0x190   :  { %v314_v54 = vpop.permute.xlu0 %313 }
 0x191   :  { %v319_v57 = vadd.f32 %v314_v54, %v307_v53 }
 0x193   :  { %823 = vtanh.f32 %v319_v57  ;;  %v1113_v61 = vsel %vm335_vm3, %v319_v57, 0.0 }
 0x194   :  { %v316_v63 = vpop.permute.xlu0 %315  ;;  %825 = vrcp.f32 %v302_v60 }
 0x195   :  { %v320_v0 = vadd.f32 %v316_v63, %v308_v62 }
 0x197   :  { %827 = vtanh.f32 %v320_v0  ;;  %v1115_v1 = vsel %vm336_vm4, %v320_v0, 0.0 }
 0x19d   :  { %v824_v4 = vpop.eup %823 }
 0x19e   :  { %v323_v6 = vmul.f32 %v824_v4, %v822_v2  ;;  %v826_v8 = vpop.eup %825 }
 0x1a0   :  { %v1118_v10 = vsel %vm335_vm3, %v323_v6, 0.0 }
 0x1a1   :  { %v828_v12 = vpop.eup %827  ;;  %345 = vrot.lane.b32.xlu0 %v1118_v10, %s879_s1 }
 0x1a2   :  { %v324_v14 = vmul.f32 %v828_v12, %v826_v8 }
 0x1a4   :  { %v1122_v16 = vsel %vm336_vm4, %v324_v14, 0.0  ;;  %v11_v14 = vstv %s1192_s2  ;;  %s880_s2 = smov 96  }
 0x1a5   :  { %347 = vrot.lane.b32.xlu1 %v1122_v16, %s879_s1  ;;  %12 = vst [vmem:[#allocation2] sm:$0x1] %v11_v14 }
 0x213   :  { %v346_v18 = vpop.permute.xlu0 %345 }
 0x214   :  { %698 = vmatmul.mubr.msk.f32.vlgmr.msra.gmra.mrb[0].mxu0 %vm59_vm0, %v346_v18 }
 0x215   :  { %423 = vmatprep.mubr.f32.mxu0 %v877_v3  ;;  %762 = vmatpush1.bf16.msra.mxu0 %v981_v29 }
 0x216   :  { %764 = vmatprep.subr.bf16.mxu0 %v986_v32 }
 0x217   :  { %v348_v20 = vpop.permute.xlu1 %347 }
 0x218   :  { %699 = vmatmul.mubr.msk.f32.gmra.mrb[2].mxu0 %vm59_vm0, %v348_v20 }
 0x219   :  { %766 = vmatpush1.bf16.msra.mxu0 %v1002_v38  ;;  %572 = vmatprep.mubr.f32.mxu0 %v877_v3 }
 0x21a   :  { %768 = vmatprep.subr.bf16.mxu0 %v1004_v39 }
 0x21d   :  { %770 = vmatpush1.bf16.msra.mxu0 %v1023_v45 }
 0x21e   :  { %772 = vmatprep.subr.bf16.mxu0 %v1025_v46 }
 0x221   :  { %774 = vmatpush1.bf16.msra.mxu0 %v1041_v50 }
 0x2e7   :  { %v419_v21 = vpop.f32.mrb[0].mxu0 }
 0x2e8   :  { %v430_v29 = vadd.f32 %v419_v21, %v1094_v5  ;;  %v421_v22 = vpop.f32.mrb[1].mxu0 }
 0x2e9   :  { %v431_v32 = vadd.f32 %v421_v22, %v1096_v7 }
 0x2ea   :  { %v700_v23 = vmul.f32 -1.442695, %v430_v29 }
 0x2eb   :  { %v425_v24 = vpop.f32.mrb[2].mxu0  ;;  %v702_v34 = vmul.f32 -1.442695, %v431_v32 }
 0x2ec   :  { %829 = vpow2.f32 %v700_v23  ;;  %v432_v38 = vadd.f32 %v425_v24, %v1098_v9  ;;  %v427_v25 = vpop.f32.mrb[3].mxu0 }
 0x2ed   :  { %v433_v39 = vadd.f32 %v427_v25, %v1100_v11  ;;  %v480_v11 = vsel %vm478_vm5, 1, %v878_v56 }
 0x2ee   :  { %v701_v26 = vmul.f32 -1.442695, %v432_v38 }
 0x2ef   :  { %v703_v35 = vmul.f32 -1.442695, %v433_v39 }
 0x2f0   :  { %831 = vpow2.f32 %v701_v26 }
 0x2f1   :  { %833 = vtanh.f32 %v431_v32 }
 0x2f6   :  { %v830_v45 = vpop.eup %829 }
 0x2f7   :  { %v440_v46 = vadd.f32 1.0, %v830_v45 }
 0x2f9   :  { %835 = vrcp.f32 %v440_v46 }
 0x2fa   :  { %v832_v50 = vpop.eup %831  ;;  %837 = vtanh.f32 %v433_v39 }
 0x2fb   :  { %v441_v27 = vadd.f32 1.0, %v832_v50  ;;  %v834_v5 = vpop.eup %833  ;;  %v635_v50 = vsel %vm633_vm9, 1, %v878_v56 }
 0x2fd   :  { %839 = vrcp.f32 %v441_v27 }
 0x2fe   :  { %841 = vpow2.f32 %v702_v34 }
 0x2ff   :  { %843 = vpow2.f32 %v703_v35 }
 0x303   :  { %v836_v7 = vpop.eup %835 }
 0x304   :  { %v462_v28 = vmul.f32 %v836_v7, %v834_v5  ;;  %v838_v30 = vpop.eup %837  ;;  %v460_v41 = vmul.f32 %v836_v7, %v1113_v61  ;;  %v710_v7 = vld [vmem:[#allocation2] ss:$0 sm:$0xff] }
 0x306   :  { %466 = vrot.lane.b32.xlu0 %v462_v28, %s879_s1  ;;  %v636_v28 = vsel %vm634_vm10, 1, %v878_v56 }
 0x307   :  { %v840_v9 = vpop.eup %839 }
 0x308   :  { %v463_v31 = vmul.f32 %v840_v9, %v838_v30  ;;  %v842_v36 = vpop.eup %841  ;;  %v461_v47 = vmul.f32 %v840_v9, %v1115_v1 }
 0x309   :  { %v454_v37 = vadd.f32 1.0, %v842_v36  ;;  %v844_v40 = vpop.eup %843 }
 0x30a   :  { %468 = vrot.lane.b32.xlu1 %v463_v31, %s879_s1  ;;  %483 = vperm.xlu0 %804, %v480_v11   ;;  %v455_v44 = vadd.f32 1.0, %v844_v40 }
 0x30b   :  { %845 = vrcp.f32 %v454_v37 }
 0x30e   :  { %486 = vperm.xlu1 %803, %v481_v33  }
 0x315   :  { %v846_v51 = vpop.eup %845 }
 0x378   :  { %v467_v42 = vpop.permute.xlu0 %466 }
 0x379   :  { %v472_v43 = vadd.f32 %v467_v42, %v460_v41 }
 0x37b   :  { %847 = vtanh.f32 %v472_v43 }
 0x37c   :  { %v469_v48 = vpop.permute.xlu1 %468  ;;  %849 = vrcp.f32 %v455_v44 }
 0x37d   :  { %v473_v49 = vadd.f32 %v469_v48, %v461_v47 }
 0x37f   :  { %851 = vtanh.f32 %v473_v49 }
 0x385   :  { %v848_v52 = vpop.eup %847 }
 0x386   :  { %v476_v53 = vmul.f32 %v848_v52, %v846_v51  ;;  %v850_v54 = vpop.eup %849 }
 0x389   :  { %v852_v57 = vpop.eup %851  ;;  %v484_v59 = vpop.permute.xlu0 %483 }
 0x38a   :  { %vm488_vm7 = vcmp.eq.s32.totalorder %v484_v59, 1  ;;  %v477_v60 = vmul.f32 %v852_v57, %v850_v54 }
 0x38b   :  { %v492_v62 = vsel %vm488_vm7, %v472_v43, %v1113_v61  ;;  %v1150_v63 = vsel %vm488_vm7, %v476_v53, 0.0  ;;  %v490_v0 = vsel %vm488_vm7, %v476_v53, %v1118_v10 }
 0x38c   :  { %500 = vrot.lane.b32.xlu1 %v490_v0, %s879_s1  ;;  %v496_v44 = vadd.f32 %v1150_v63, %v1118_v10 }
 0x38d   :  { %v487_v2 = vpop.permute.xlu1 %486 }
 0x38e   :  { %vm489_vm8 = vcmp.eq.s32.totalorder %v487_v2, 1 }
 0x38f   :  { %v493_v4 = vsel %vm489_vm8, %v473_v49, %v1115_v1  ;;  %v1155_v6 = vsel %vm489_vm8, %v477_v60, 0.0  ;;  %v491_v8 = vsel %vm489_vm8, %v477_v60, %v1122_v16 }
 0x390   :  { %502 = vrot.lane.b32.xlu0 %v491_v8, %s879_s1  ;;  %v497_v52 = vadd.f32 %v1155_v6, %v1122_v16 }
 0x3fe   :  { %v501_v12 = vpop.permute.xlu1 %500 }
 0x3ff   :  { %704 = vmatmul.mubr.msk.f32.vlgmr.msra.gmra.mrb[4].mxu0 %vm59_vm0, %v501_v12 }
 0x400   :  { %578 = vmatprep.mubr.f32.mxu0 %v877_v3 }
 0x402   :  { %v503_v61 = vpop.permute.xlu0 %502 }
 0x403   :  { %705 = vmatmul.mubr.msk.f32.gmra.mrb[6].mxu0 %vm59_vm0, %v503_v61 }
 0x4d2   :  { %v574_v1 = vpop.f32.mrb[4].mxu0 }
 0x4d3   :  { %v585_v18 = vadd.f32 %v574_v1, %v1102_v13  ;;  %v576_v20 = vpop.f32.mrb[5].mxu0 }
 0x4d4   :  { %v586_v21 = vadd.f32 %v576_v20, %v1104_v15 }
 0x4d5   :  { %v706_v29 = vmul.f32 -1.442695, %v585_v18 }
 0x4d6   :  { %v580_v22 = vpop.f32.mrb[6].mxu0  ;;  %v708_v55 = vmul.f32 -1.442695, %v586_v21 }
 0x4d7   :  { %853 = vpow2.f32 %v706_v29  ;;  %v587_v32 = vadd.f32 %v580_v22, %v1106_v17  ;;  %v582_v3 = vpop.f32.mrb[7].mxu0 }
 0x4d8   :  { %v588_v23 = vadd.f32 %v582_v3, %v1108_v19 }
 0x4d9   :  { %v707_v24 = vmul.f32 -1.442695, %v587_v32 }
 0x4da   :  { %v709_v30 = vmul.f32 -1.442695, %v588_v23 }
 0x4db   :  { %855 = vpow2.f32 %v707_v24 }
 0x4dc   :  { %857 = vtanh.f32 %v586_v21 }
 0x4e1   :  { %v854_v38 = vpop.eup %853 }
 0x4e2   :  { %v595_v25 = vadd.f32 1.0, %v854_v38 }
 0x4e4   :  { %859 = vrcp.f32 %v595_v25 }
 0x4e5   :  { %v856_v39 = vpop.eup %855  ;;  %861 = vtanh.f32 %v588_v23 }
 0x4e6   :  { %v596_v26 = vadd.f32 1.0, %v856_v39  ;;  %v858_v13 = vpop.eup %857 }
 0x4e8   :  { %863 = vrcp.f32 %v596_v26 }
 0x4e9   :  { %865 = vpow2.f32 %v708_v55 }
 0x4ea   :  { %867 = vpow2.f32 %v709_v30 }
 0x4ee   :  { %v860_v15 = vpop.eup %859 }
 0x4ef   :  { %v617_v45 = vmul.f32 %v860_v15, %v858_v13  ;;  %v615_v46 = vmul.f32 %v860_v15, %v492_v62  ;;  %v862_v17 = vpop.eup %861 }
 0x4f1   :  { %621 = vrot.lane.b32.xlu1 %v617_v45, %s879_s1 }
 0x4f2   :  { %v864_v19 = vpop.eup %863 }
 0x4f3   :  { %v618_v27 = vmul.f32 %v864_v19, %v862_v17  ;;  %v616_v5 = vmul.f32 %v864_v19, %v493_v4  ;;  %v866_v9 = vpop.eup %865 }
 0x4f4   :  { %v609_v11 = vadd.f32 1.0, %v866_v9  ;;  %v868_v31 = vpop.eup %867 }
 0x4f5   :  { %638 = vperm.xlu1 %803, %v635_v50   ;;  %623 = vrot.lane.b32.xlu0 %v618_v27, %s879_s1  ;;  %v610_v58 = vadd.f32 1.0, %v868_v31 }
 0x4f6   :  { %869 = vrcp.f32 %v609_v11 }
 0x4f9   :  { %668 = vperm.xlu1 %803, %v710_v7   ;;  %641 = vperm.xlu0 %804, %v636_v28  }
 0x500   :  { %v870_v37 = vpop.eup %869 }
 0x563   :  { %v622_v33 = vpop.permute.xlu1 %621 }
 0x564   :  { %v627_v34 = vadd.f32 %v622_v33, %v615_v46 }
 0x566   :  { %871 = vtanh.f32 %v627_v34 }
 0x567   :  { %v624_v35 = vpop.permute.xlu0 %623  ;;  %873 = vrcp.f32 %v610_v58 }
 0x568   :  { %v628_v36 = vadd.f32 %v624_v35, %v616_v5 }
 0x56a   :  { %875 = vtanh.f32 %v628_v36 }
 0x570   :  { %v872_v56 = vpop.eup %871 }
 0x571   :  { %v631_v40 = vmul.f32 %v872_v56, %v870_v37  ;;  %v874_v41 = vpop.eup %873 }
 0x574   :  { %v876_v42 = vpop.eup %875  ;;  %v639_v43 = vpop.permute.xlu1 %638 }
 0x575   :  { %vm643_vm11 = vcmp.eq.s32.totalorder %v639_v43, 1  ;;  %v632_v47 = vmul.f32 %v876_v42, %v874_v41 }
 0x576   :  { %v645_v48 = vsel %vm643_vm11, %v631_v40, 0.0 }
 0x577   :  { %v647_v49 = vadd.f32 %v645_v48, %v496_v44 }
 0x578   :  { %v642_v51 = vpop.permute.xlu0 %641  ;;  %v669_v57 = vpop.permute.xlu1 %668 }
 0x579   :  { %vm644_vm12 = vcmp.eq.s32.totalorder %v642_v51, 1  ;;  %651 = vrot.lane.b32.xlu0 %v647_v49, %s880_s2 }
 0x57a   :  { %v646_v53 = vsel %vm644_vm12, %v632_v47, 0.0 }
 0x57b   :  { %v648_v54 = vadd.f32 %v646_v53, %v497_v52 }
 0x57d   :  { %653 = vrot.lane.b32.xlu1 %v648_v54, %s880_s2 }
 0x5eb   :  { %v652_v59 = vpop.permute.xlu0 %651 }
 0x5ec   :  { %v657_v60 = vadd.f32 %v652_v59, %v647_v49 }
 0x5ee   :  { %v659_v62 = vmul.f32 0.5, %v657_v60 }
 0x5ef   :  { %v654_v0 = vpop.permute.xlu1 %653 }
 0x5f0   :  { %v671_v10 = vmul.f32 %v669_v57, %v659_v62  ;;  %v658_v63 = vadd.f32 %v654_v0, %v648_v54 }
 0x5f2   :  { %v660_v2 = vmul.f32 0.5, %v658_v63  ;;  %675 = vrot.lane.b32.xlu0 %v671_v10, %s879_s1 }
 0x5f4   :  { %v672_v4 = vmul.f32 %v669_v57, %v660_v2 }
 0x5f6   :  { %677 = vrot.lane.b32.xlu1 %v672_v4, %s879_s1 }
 0x664   :  { %v676_v16 = vpop.permute.xlu0 %675 }
 0x665   :  { %682 = vst.msk [vmem:[%s1193_s6] sm:$0xff] %vm681_vm13, %v676_v16 }
 0x668   :  { %v678_v6 = vpop.permute.xlu1 %677 }
 0x669   :  { %683 = vst.msk [vmem:[%s1193_s6 + $0x8] sm:$0xff] %vm681_vm13, %v678_v6 }

// kernel: predict_model_forward.5
= control target key start
LH: loop header
LB: loop body
LE: loop exit
PB: predicated region body
PF: predicated region fallthrough
CT: control target
= control target key end

     0   :  { %vm124_vm0 = vcmask 261120   ;;  %s2947_s27 = smov 96   ;;  %vm254_vm1 = vcmask 523264   ;;  %vm898_vm2 = vcmask 31744   ;;  %vm1346_vm3 = vcmask 1043456   ;;  %s3701_s4 = inlined_call_operand.vmem [shape: f32[32,96], index: 4, kind: input, shape index: {}]   ;;  %s3702_s0 = inlined_call_operand.vmem [shape: f32[64,32], index: 0, kind: input, shape index: {}]   ;;  %s3703_s5 = inlined_call_operand.vmem [shape: f32[1,96], index: 5, kind: input, shape index: {}]   ;;  %s3704_s2 = inlined_call_operand.vmem [shape: f32[128,64], index: 2, kind: input, shape index: {}]   ;;  %s3705_s1 = inlined_call_operand.vmem [shape: f32[128,64], index: 1, kind: input, shape index: {}]   ;;  %s3706_s6 = inlined_call_operand.vmem [shape: f32[32,4], index: 6, kind: input, shape index: {}]   ;;  %s3707_s3 = inlined_call_operand.vmem [shape: f32[64,128], index: 3, kind: input, shape index: {}]   ;;  %s3708_s7 = inlined_call_operand.vmem [shape: f32[4,32], index: 7, kind: input, shape index: {}]   ;;  %s3709_s18 = inlined_call_operand.vmem [shape: f32[128,4], index: 18, kind: output, shape index: {1}]   ;;  %s3710_s8 = inlined_call_operand.vmem [shape: f32[8,64], index: 8, kind: input, shape index: {}]   ;;  %s3711_s11 = inlined_call_operand.vmem [shape: f32[32,32], index: 11, kind: input, shape index: {}]   ;;  %s3712_s9 = inlined_call_operand.vmem [shape: f32[1,32], index: 9, kind: input, shape index: {}]   ;;  %s3713_s10 = inlined_call_operand.vmem [shape: f32[1,32], index: 10, kind: input, shape index: {}]   ;;  %s3714_s13 = inlined_call_operand.vmem [shape: f32[32,16], index: 13, kind: input, shape index: {}]   ;;  %s3715_s12 = inlined_call_operand.vmem [shape: f32[1,32], index: 12, kind: input, shape index: {}]   ;;  %s3716_s15 = inlined_call_operand.vmem [shape: f32[16,1], index: 15, kind: input, shape index: {}]   ;;  %s3717_s16 = inlined_call_operand.<no memory space> [shape: f32[1,1], index: 16, kind: input, shape index: {}]   ;;  %s3718_s14 = inlined_call_operand.vmem [shape: f32[1,16], index: 14, kind: input, shape index: {}]   ;;  %s3719_s17 = inlined_call_operand.vmem [shape: f32[8,1], index: 17, kind: output, shape index: {0}]  }
   0x1   :  { %3722 = sst [smem:[#allocation3_spill]] %s3701_s4  ;;  %v3098_v31 = vld [vmem:[%s3704_s2] sm:$0xff]  ;;  %v3111_v41 = vld [vmem:[%s3704_s2 + $0x8] sm:$0xff]  ;;  %v3116_v42 = vld [vmem:[%s3704_s2 + $0x10] sm:$0xff] }
   0x2   :  { %3723 = sst [smem:[#allocation4_spill]] %s3702_s0  ;;  %s3725_s29 = sld [smem:[#allocation3_spill]]  ;;  %2396 = vmatprep.mubr.msk.f32.mxu1 %vm254_vm1, %v3098_v31  ;;  %v68_v32 = vld [vmem:[%s3705_s1] sm:$0xff]  ;;  %v3125_v43 = vld [vmem:[%s3704_s2 + $0x18] sm:$0xff]  ;;  %v3139_v45 = vld [vmem:[%s3704_s2 + $0x28] sm:$0xff] }
   0x3   :  { %3724 = sst [smem:[#allocation5_spill]] %s3703_s5  ;;  %s3726_s23 = sld [smem:[#allocation4_spill]]  ;;  %v3130_v44 = vld [vmem:[%s3704_s2 + $0x20] sm:$0xff]  ;;  %v3144_v46 = vld [vmem:[%s3704_s2 + $0x30] sm:$0xff]  ;;  %v3153_v47 = vld [vmem:[%s3704_s2 + $0x38] sm:$0xff] }
   0x4   :  { %s3727_s26 = sld [smem:[#allocation5_spill]]  ;;  %v3158_v48 = vld [vmem:[%s3704_s2 + $0x40] sm:$0xff]  ;;  %v3167_v49 = vld [vmem:[%s3704_s2 + $0x48] sm:$0xff]  ;;  %v3172_v50 = vld [vmem:[%s3704_s2 + $0x50] sm:$0xff] }
   0x5   :  { %v3181_v51 = vld [vmem:[%s3704_s2 + $0x58] sm:$0xff]  ;;  %v3186_v52 = vld [vmem:[%s3704_s2 + $0x60] sm:$0xff]  ;;  %v114_v54 = vld [vmem:[%s3706_s6 + $0x8] sm:$0xff] }
   0x6   :  { %v113_v53 = vld [vmem:[%s3706_s6] sm:$0xff]  ;;  %v3201_v55 = vld [vmem:[%s3704_s2 + $0x68] sm:$0xff]  ;;  %v3206_v57 = vld [vmem:[%s3704_s2 + $0x70] sm:$0xff] }
   0x7   :  { %v2734_v56 = vpack.c.bf16 %v114_v54, %v113_v53  ;;  %v3215_v58 = vld [vmem:[%s3704_s2 + $0x78] sm:$0xff] }
   0x8   :  { %v108_v0 = vld [vmem:[%s3725_s29] sm:$0xff]  ;;  %v109_v1 = vld [vmem:[%s3725_s29 + $0x8] sm:$0xff]  ;;  %v110_v2 = vld [vmem:[%s3725_s29 + $0x10] sm:$0xff] }
   0x9   :  { %v2694_v3 = vpack.c.bf16 %v109_v1, %v108_v0  ;;  %v111_v4 = vld [vmem:[%s3725_s29 + $0x18] sm:$0xff]  ;;  %v60_v5 = vld [vmem:[%s3726_s23] sm:$0xff]  ;;  %v61_v7 = vld [vmem:[%s3726_s23 + $0x8] sm:$0xff] }
   0xa   :  { %v2698_v6 = vpack.c.bf16 %v111_v4, %v110_v2  ;;  %2368 = vmatprep.mubr.msk.f32.mxu0 %vm124_vm0, %v60_v5  ;;  %v62_v8 = vld [vmem:[%s3726_s23 + $0x10] sm:$0xff]  ;;  %v63_v9 = vld [vmem:[%s3726_s23 + $0x18] sm:$0xff]  ;;  %v64_v10 = vld [vmem:[%s3726_s23 + $0x20] sm:$0xff] }
   0xb   :  { %2695 = vmatprep.subr.bf16.mxu0 %v2694_v3  ;;  %v65_v11 = vld [vmem:[%s3726_s23 + $0x28] sm:$0xff]  ;;  %v66_v12 = vld [vmem:[%s3726_s23 + $0x30] sm:$0xff]  ;;  %v67_v13 = vld [vmem:[%s3726_s23 + $0x38] sm:$0xff] }
   0xc   :  { %2697 = vmatpush3.bf16.msra.mxu0 %v2694_v3  ;;  %v2069_v14 = vld [vmem:[%s3727_s26] ss:$0 sm:$0xff] }
   0xd   :  { %2699 = vmatprep.subr.bf16.mxu0 %v2698_v6 }
  0x10   :  { %2701 = vmatpush3.bf16.msra.mxu0 %v2698_v6 }
  0x13   :  { %2369 = vmatmul.mubr.msk.f32.vlgmr.msra.gmra.mrb[0].mxu0 %vm124_vm0, %v61_v7 }
  0x14   :  { %2371 = vmatprep.mubr.msk.f32.mxu0 %vm124_vm0, %v62_v8 }
  0x17   :  { %2372 = vmatmul.mubr.msk.f32.gmra.mrb[2].mxu0 %vm124_vm0, %v63_v9 }
  0x18   :  { %2374 = vmatprep.mubr.msk.f32.mxu0 %vm124_vm0, %v64_v10 }
  0x1b   :  { %2375 = vmatmul.mubr.msk.f32.gmra.mrb[4].mxu0 %vm124_vm0, %v65_v11  ;;  %v69_v11 = vld [vmem:[%s3705_s1 + $0x8] sm:$0xff] }
  0x1c   :  { %2377 = vmatprep.mubr.msk.f32.mxu0 %vm124_vm0, %v66_v12  ;;  %v70_v12 = vld [vmem:[%s3705_s1 + $0x10] sm:$0xff] }
  0x1f   :  { %2378 = vmatmul.mubr.msk.f32.gmra.mrb[6].mxu0 %vm124_vm0, %v67_v13  ;;  %v71_v13 = vld [vmem:[%s3705_s1 + $0x18] sm:$0xff] }
  0x20   :  { %2436 = vmatprep.mubr.msk.f32.mxu0 %vm254_vm1, %v68_v32 }
  0xe6   :  { %v2370_v15 = vpop.f32.mrb[0].mxu0 }
  0xe7   :  { %v221_v16 = vadd.f32 %v2370_v15, %v2069_v14  ;;  %v215_v17 = vpop.f32.mrb[1].mxu0  ;;  %v73_v15 = vld [vmem:[%s3705_s1 + $0x28] sm:$0xff] }
  0xe8   :  { %v216_v18 = vadd.f32 %v2069_v14, %v215_v17  ;;  %v75_v17 = vld [vmem:[%s3705_s1 + $0x38] sm:$0xff] }
  0xea   :  { %v2373_v19 = vpop.f32.mrb[2].mxu0  ;;  %v2853_v20 = vpack.i.bf16 %v221_v16, %v216_v18  ;;  %v2702_v21 = vpack.c.bf16 %v221_v16, %v216_v18  ;;  %v74_v16 = vld [vmem:[%s3705_s1 + $0x30] sm:$0xff]  ;;  %v76_v18 = vld [vmem:[%s3705_s1 + $0x40] sm:$0xff] }
  0xeb   :  { %v231_v22 = vadd.f32 %v2373_v19, %v2069_v14  ;;  %v225_v23 = vpop.f32.mrb[3].mxu0  ;;  %v77_v19 = vld [vmem:[%s3705_s1 + $0x48] sm:$0xff] }
  0xec   :  { %v226_v24 = vadd.f32 %v2069_v14, %v225_v23  ;;  %2854 = vrot.lane.b32.xlu0 %v2853_v20, %s2947_s27  ;;  %2703 = vmatprep.subr.bf16.mxu1 %v2702_v21  ;;  %v78_v20 = vld [vmem:[%s3705_s1 + $0x50] sm:$0xff]  ;;  %v81_v23 = vld [vmem:[%s3705_s1 + $0x68] sm:$0xff] }
  0xed   :  { %2705 = vmatpush3.bf16.msra.mxu1 %v2702_v21  ;;  %v79_v21 = vld [vmem:[%s3705_s1 + $0x58] sm:$0xff] }
  0xee   :  { %v2858_v25 = vpack.i.bf16 %v231_v22, %v226_v24  ;;  %v2706_v26 = vpack.c.bf16 %v231_v22, %v226_v24  ;;  %v2376_v27 = vpop.f32.mrb[4].mxu0  ;;  %v80_v22 = vld [vmem:[%s3705_s1 + $0x60] sm:$0xff]  ;;  %v82_v24 = vld [vmem:[%s3705_s1 + $0x70] sm:$0xff] }
  0xef   :  { %v241_v28 = vadd.f32 %v2376_v27, %v2069_v14  ;;  %v235_v29 = vpop.f32.mrb[5].mxu0  ;;  %v116_v27 = vld [vmem:[%s3706_s6 + $0x18] sm:$0xff] }
  0xf0   :  { %v236_v30 = vadd.f32 %v2069_v14, %v235_v29  ;;  %2859 = vrot.lane.b32.xlu0 %v2858_v25, %s2947_s27  ;;  %2707 = vmatprep.subr.bf16.mxu1 %v2706_v26  ;;  %v83_v25 = vld [vmem:[%s3705_s1 + $0x78] sm:$0xff] }
  0xf1   :  { %2709 = vmatpush3.bf16.msra.mxu1 %v2706_v26  ;;  %v115_v26 = vld [vmem:[%s3706_s6 + $0x10] sm:$0xff] }
  0xf2   :  { %v2710_v33 = vpack.c.bf16 %v241_v28, %v236_v30  ;;  %v2379_v34 = vpop.f32.mrb[6].mxu0  ;;  %v2863_v35 = vpack.i.bf16 %v241_v28, %v236_v30  ;;  %v2738_v28 = vpack.c.bf16 %v116_v27, %v115_v26 }
  0xf3   :  { %v251_v36 = vadd.f32 %v2379_v34, %v2069_v14  ;;  %v245_v37 = vpop.f32.mrb[7].mxu0 }
  0xf4   :  { %v246_v38 = vadd.f32 %v2069_v14, %v245_v37  ;;  %2864 = vrot.lane.b32.xlu1 %v2863_v35, %s2947_s27  ;;  %2711 = vmatprep.subr.bf16.mxu1 %v2710_v33  ;;  %v72_v14 = vld [vmem:[%s3705_s1 + $0x20] sm:$0xff] }
  0xf5   :  { %2713 = vmatpush3.bf16.msra.mxu1 %v2710_v33 }
  0xf6   :  { %v2868_v39 = vpack.i.bf16 %v251_v36, %v246_v38  ;;  %v2714_v40 = vpack.c.bf16 %v251_v36, %v246_v38 }
  0xf8   :  { %2869 = vrot.lane.b32.xlu1 %v2868_v39, %s2947_s27  ;;  %2715 = vmatprep.subr.bf16.mxu1 %v2714_v40 }
  0xf9   :  { %2717 = vmatpush3.bf16.msra.mxu1 %v2714_v40 }
  0xfa   :  { %2735 = vmatprep.subr.bf16.mxu1 %v2734_v56 }
  0xfc   :  { %2397 = vmatmul.mubr.msk.f32.vlgmr.msra.gmra.mrb[0].mxu1 %vm254_vm1, %v3111_v41 }
  0xfd   :  { %2399 = vmatprep.mubr.msk.f32.mxu1 %vm254_vm1, %v3116_v42  ;;  %2737 = vmatpush3.bf16.msra.mxu1 %v2734_v56 }
  0xfe   :  { %2739 = vmatprep.subr.bf16.mxu1 %v2738_v28 }
 0x100   :  { %2400 = vmatmul.mubr.msk.f32.gmra.mrb[2].mxu1 %vm254_vm1, %v3125_v43 }
 0x101   :  { %2402 = vmatprep.mubr.msk.f32.mxu1 %vm254_vm1, %v3130_v44  ;;  %2741 = vmatpush3.bf16.msra.mxu1 %v2738_v28 }
 0x104   :  { %2403 = vmatmul.mubr.msk.f32.gmra.mrb[4].mxu1 %vm254_vm1, %v3139_v45 }
 0x105   :  { %2405 = vmatprep.mubr.msk.f32.mxu1 %vm254_vm1, %v3144_v46 }
 0x108   :  { %2406 = vmatmul.mubr.msk.f32.gmra.mrb[6].mxu1 %vm254_vm1, %v3153_v47 }
 0x109   :  { %2408 = vmatprep.mubr.msk.f32.mxu1 %vm254_vm1, %v3158_v48 }
 0x10c   :  { %2409 = vmatmul.mubr.msk.f32.gmra.mrb[8].mxu1 %vm254_vm1, %v3167_v49 }
 0x10d   :  { %2411 = vmatprep.mubr.msk.f32.mxu1 %vm254_vm1, %v3172_v50 }
 0x110   :  { %2412 = vmatmul.mubr.msk.f32.gmra.mrb[10].mxu1 %vm254_vm1, %v3181_v51 }
 0x111   :  { %2414 = vmatprep.mubr.msk.f32.mxu1 %vm254_vm1, %v3186_v52 }
 0x114   :  { %2415 = vmatmul.mubr.msk.f32.gmra.mrb[12].mxu1 %vm254_vm1, %v3201_v55 }
 0x115   :  { %2417 = vmatprep.mubr.msk.f32.mxu1 %vm254_vm1, %v3206_v57 }
 0x118   :  { %2418 = vmatmul.mubr.msk.f32.gmra.mrb[14].mxu1 %vm254_vm1, %v3215_v58 }
 0x15e   :  { %v2855_v59 = vpop.permute.xlu0 %2854 }
 0x15f   :  { %v2857_v60 = vunpack.i.h.bf16 %v2855_v59  ;;  %v2856_v61 = vunpack.i.l.bf16 %v2855_v59 }
 0x161   :  { %v2718_v62 = vpack.c.bf16 %v2857_v60, %v2856_v61 }
 0x162   :  { %v2860_v63 = vpop.permute.xlu0 %2859 }
 0x163   :  { %v2862_v0 = vunpack.i.h.bf16 %v2860_v63  ;;  %v2861_v1 = vunpack.i.l.bf16 %v2860_v63  ;;  %2719 = vmatprep.subr.bf16.mxu0 %v2718_v62 }
 0x164   :  { %2721 = vmatpush3.bf16.msra.mxu0 %v2718_v62 }
 0x165   :  { %v2722_v2 = vpack.c.bf16 %v2862_v0, %v2861_v1 }
 0x166   :  { %v2865_v3 = vpop.permute.xlu1 %2864 }
 0x167   :  { %v2867_v4 = vunpack.i.h.bf16 %v2865_v3  ;;  %v2866_v5 = vunpack.i.l.bf16 %v2865_v3  ;;  %2723 = vmatprep.subr.bf16.mxu0 %v2722_v2 }
 0x168   :  { %2725 = vmatpush3.bf16.msra.mxu0 %v2722_v2 }
 0x169   :  { %v2726_v6 = vpack.c.bf16 %v2867_v4, %v2866_v5 }
 0x16a   :  { %v2870_v7 = vpop.permute.xlu1 %2869 }
 0x16b   :  { %v2872_v8 = vunpack.i.h.bf16 %v2870_v7  ;;  %v2871_v9 = vunpack.i.l.bf16 %v2870_v7  ;;  %2727 = vmatprep.subr.bf16.mxu0 %v2726_v6 }
 0x16c   :  { %2729 = vmatpush3.bf16.msra.mxu0 %v2726_v6 }
 0x16d   :  { %v2730_v10 = vpack.c.bf16 %v2872_v8, %v2871_v9 }
 0x16f   :  { %2731 = vmatprep.subr.bf16.mxu0 %v2730_v10 }
 0x170   :  { %2733 = vmatpush3.bf16.msra.mxu0 %v2730_v10 }
 0x173   :  { %2437 = vmatmul.mubr.msk.f32.vlgmr.msra.gmra.mrb[8].mxu0 %vm254_vm1, %v69_v11 }
 0x174   :  { %2439 = vmatprep.mubr.msk.f32.mxu0 %vm254_vm1, %v70_v12 }
 0x177   :  { %2440 = vmatmul.mubr.msk.f32.gmra.mrb[10].mxu0 %vm254_vm1, %v71_v13 }
 0x178   :  { %2442 = vmatprep.mubr.msk.f32.mxu0 %vm254_vm1, %v72_v14 }
 0x17b   :  { %2443 = vmatmul.mubr.msk.f32.gmra.mrb[12].mxu0 %vm254_vm1, %v73_v15 }
 0x17c   :  { %2445 = vmatprep.mubr.msk.f32.mxu0 %vm254_vm1, %v74_v16 }
 0x17f   :  { %2446 = vmatmul.mubr.msk.f32.gmra.mrb[14].mxu0 %vm254_vm1, %v75_v17 }
 0x180   :  { %2448 = vmatprep.mubr.msk.f32.mxu0 %vm254_vm1, %v76_v18 }
 0x183   :  { %2449 = vmatmul.mubr.msk.f32.gmra.mrb[16].mxu0 %vm254_vm1, %v77_v19 }
 0x184   :  { %2451 = vmatprep.mubr.msk.f32.mxu0 %vm254_vm1, %v78_v20 }
 0x187   :  { %2452 = vmatmul.mubr.msk.f32.gmra.mrb[18].mxu0 %vm254_vm1, %v79_v21 }
 0x188   :  { %2454 = vmatprep.mubr.msk.f32.mxu0 %vm254_vm1, %v80_v22 }
 0x18b   :  { %2455 = vmatmul.mubr.msk.f32.gmra.mrb[20].mxu0 %vm254_vm1, %v81_v23 }
 0x18c   :  { %2457 = vmatprep.mubr.msk.f32.mxu0 %vm254_vm1, %v82_v24 }
 0x18f   :  { %2458 = vmatmul.mubr.msk.f32.gmra.mrb[22].mxu0 %vm254_vm1, %v83_v25 }
 0x1cf   :  { %v2398_v29 = vpop.f32.mrb[0].mxu1 }
 0x1d0   :  { %v369_v30 = vpop.f32.mrb[1].mxu1 }
 0x1d3   :  { %v2401_v32 = vpop.f32.mrb[2].mxu1 }
 0x1d4   :  { %v379_v33 = vpop.f32.mrb[3].mxu1 }
 0x1d7   :  { %v2404_v34 = vpop.f32.mrb[4].mxu1 }
 0x1d8   :  { %v389_v35 = vpop.f32.mrb[5].mxu1 }
 0x1db   :  { %v2407_v36 = vpop.f32.mrb[6].mxu1 }
 0x1dc   :  { %v399_v37 = vpop.f32.mrb[7].mxu1 }
 0x1df   :  { %v2410_v38 = vpop.f32.mrb[8].mxu1 }
 0x1e0   :  { %v409_v39 = vpop.f32.mrb[9].mxu1 }
 0x1e3   :  { %v2413_v40 = vpop.f32.mrb[10].mxu1 }
 0x1e4   :  { %v419_v53 = vpop.f32.mrb[11].mxu1 }
 0x1e7   :  { %v2416_v54 = vpop.f32.mrb[12].mxu1 }
 0x1e8   :  { %v429_v56 = vpop.f32.mrb[13].mxu1 }
 0x1eb   :  { %v2419_v59 = vpop.f32.mrb[14].mxu1 }
 0x1ec   :  { %v439_v60 = vpop.f32.mrb[15].mxu1 }
 0x246   :  { %v2438_v61 = vpop.f32.mrb[8].mxu0 }
 0x247   :  { %v674_v62 = vmul.f32 %v2438_v61, %v2398_v29  ;;  %1513 = vrot.lane.b32.xlu1 %v2438_v61, %s2947_s27  ;;  %v594_v63 = vpop.f32.mrb[9].mxu0  ;;  %v3320_v29 = vld [vmem:[%s3707_s3] sm:$0xff] }
 0x248   :  { %v673_v0 = vmul.f32 %v594_v63, %v369_v30  ;;  %1511 = vrot.lane.b32.xlu0 %v594_v63, %s2947_s27  ;;  %2524 = vmatprep.mubr.f32.mxu0 %v3320_v29 }
 0x24a   :  { %v2441_v1 = vpop.f32.mrb[10].mxu0  ;;  %2468 = vmatprep.mubr.msk.f32.mxu1 %vm124_vm0, %v673_v0 }
 0x24b   :  { %v676_v2 = vmul.f32 %v2441_v1, %v2401_v32  ;;  %1517 = vrot.lane.b32.xlu1 %v2441_v1, %s2947_s27  ;;  %v604_v3 = vpop.f32.mrb[11].mxu0  ;;  %2469 = vmatmul.mubr.msk.f32.vlgmr.msra.gmra.mrb[16].mxu1 %vm124_vm0, %v674_v62 }
 0x24c   :  { %v675_v4 = vmul.f32 %v604_v3, %v379_v33  ;;  %1515 = vrot.lane.b32.xlu0 %v604_v3, %s2947_s27 }
 0x24e   :  { %v2444_v5 = vpop.f32.mrb[12].mxu0  ;;  %2471 = vmatprep.mubr.msk.f32.mxu1 %vm124_vm0, %v675_v4 }
 0x24f   :  { %v678_v6 = vmul.f32 %v2444_v5, %v2404_v34  ;;  %1521 = vrot.lane.b32.xlu1 %v2444_v5, %s2947_s27  ;;  %v614_v7 = vpop.f32.mrb[13].mxu0  ;;  %2472 = vmatmul.mubr.msk.f32.gmra.mrb[18].mxu1 %vm124_vm0, %v676_v2 }
 0x250   :  { %v677_v8 = vmul.f32 %v614_v7, %v389_v35  ;;  %1519 = vrot.lane.b32.xlu0 %v614_v7, %s2947_s27 }
 0x252   :  { %v2447_v9 = vpop.f32.mrb[14].mxu0  ;;  %2474 = vmatprep.mubr.msk.f32.mxu1 %vm124_vm0, %v677_v8 }
 0x253   :  { %v680_v10 = vmul.f32 %v2447_v9, %v2407_v36  ;;  %1525 = vrot.lane.b32.xlu1 %v2447_v9, %s2947_s27  ;;  %v624_v11 = vpop.f32.mrb[15].mxu0  ;;  %2475 = vmatmul.mubr.msk.f32.gmra.mrb[20].mxu1 %vm124_vm0, %v678_v6 }
 0x254   :  { %v679_v12 = vmul.f32 %v624_v11, %v399_v37  ;;  %1523 = vrot.lane.b32.xlu0 %v624_v11, %s2947_s27 }
 0x256   :  { %v2450_v13 = vpop.f32.mrb[16].mxu0  ;;  %2477 = vmatprep.mubr.msk.f32.mxu1 %vm124_vm0, %v679_v12 }
 0x257   :  { %v682_v14 = vmul.f32 %v2450_v13, %v2410_v38  ;;  %1529 = vrot.lane.b32.xlu1 %v2450_v13, %s2947_s27  ;;  %v634_v15 = vpop.f32.mrb[17].mxu0  ;;  %2478 = vmatmul.mubr.msk.f32.gmra.mrb[22].mxu1 %vm124_vm0, %v680_v10 }
 0x258   :  { %v681_v16 = vmul.f32 %v634_v15, %v409_v39  ;;  %1527 = vrot.lane.b32.xlu0 %v634_v15, %s2947_s27 }
 0x25a   :  { %v2453_v17 = vpop.f32.mrb[18].mxu0  ;;  %2480 = vmatprep.mubr.msk.f32.mxu1 %vm124_vm0, %v681_v16 }
 0x25b   :  { %v684_v18 = vmul.f32 %v2453_v17, %v2413_v40  ;;  %1533 = vrot.lane.b32.xlu1 %v2453_v17, %s2947_s27  ;;  %v644_v19 = vpop.f32.mrb[19].mxu0  ;;  %2481 = vmatmul.mubr.msk.f32.gmra.mrb[24].mxu1 %vm124_vm0, %v682_v14 }
 0x25c   :  { %v683_v20 = vmul.f32 %v644_v19, %v419_v53  ;;  %1531 = vrot.lane.b32.xlu0 %v644_v19, %s2947_s27 }
 0x25e   :  { %v2456_v21 = vpop.f32.mrb[20].mxu0  ;;  %2483 = vmatprep.mubr.msk.f32.mxu1 %vm124_vm0, %v683_v20 }
 0x25f   :  { %v686_v22 = vmul.f32 %v2456_v21, %v2416_v54  ;;  %1537 = vrot.lane.b32.xlu1 %v2456_v21, %s2947_s27  ;;  %v654_v23 = vpop.f32.mrb[21].mxu0  ;;  %2484 = vmatmul.mubr.msk.f32.gmra.mrb[26].mxu1 %vm124_vm0, %v684_v18 }
 0x260   :  { %v685_v24 = vmul.f32 %v654_v23, %v429_v56  ;;  %1535 = vrot.lane.b32.xlu0 %v654_v23, %s2947_s27 }
 0x262   :  { %v2459_v25 = vpop.f32.mrb[22].mxu0  ;;  %2486 = vmatprep.mubr.msk.f32.mxu1 %vm124_vm0, %v685_v24 }
 0x263   :  { %v688_v26 = vmul.f32 %v2459_v25, %v2419_v59  ;;  %1541 = vrot.lane.b32.xlu1 %v2459_v25, %s2947_s27  ;;  %v664_v27 = vpop.f32.mrb[23].mxu0  ;;  %2487 = vmatmul.mubr.msk.f32.gmra.mrb[28].mxu1 %vm124_vm0, %v686_v22 }
 0x264   :  { %v687_v28 = vmul.f32 %v664_v27, %v439_v60  ;;  %1539 = vrot.lane.b32.xlu0 %v664_v27, %s2947_s27 }
 0x266   :  { %2489 = vmatprep.mubr.msk.f32.mxu1 %vm124_vm0, %v687_v28 }
 0x267   :  { %2490 = vmatmul.mubr.msk.f32.gmra.mrb[30].mxu1 %vm124_vm0, %v688_v26 }
 0x31e   :  { %v2470_v30 = vpop.f32.mrb[16].mxu1 }
 0x31f   :  { %v803_v32 = vpop.f32.mrb[17].mxu1  ;;  %v3323_v35 = vmul.f32 0.35355338, %v2470_v30 }
 0x320   :  { %v3325_v36 = vmul.f32 0.35355338, %v803_v32 }
 0x321   :  { %v900_v53 = vsel %vm898_vm2, %v3323_v35, -inf }
 0x322   :  { %v2473_v33 = vpop.f32.mrb[18].mxu1  ;;  %v899_v59 = vsel %vm898_vm2, %v3325_v36, -inf }
 0x323   :  { %v813_v34 = vpop.f32.mrb[19].mxu1  ;;  %v3333_v54 = vmul.f32 0.35355338, %v2473_v33 }
 0x324   :  { %v3339_v60 = vmul.f32 0.35355338, %v813_v34 }
 0x325   :  { %v902_v4 = vsel %vm898_vm2, %v3333_v54, -inf }
 0x326   :  { %v2476_v37 = vpop.f32.mrb[20].mxu1  ;;  %v901_v6 = vsel %vm898_vm2, %v3339_v60, -inf }
 0x327   :  { %v3327_v38 = vmul.f32 0.35355338, %v2476_v37  ;;  %v823_v39 = vpop.f32.mrb[21].mxu1 }
 0x328   :  { %v3329_v40 = vmul.f32 0.35355338, %v823_v39 }
 0x329   :  { %v905_v56 = vsel %vm898_vm2, %v3327_v38, -inf }
 0x32a   :  { %v906_v61 = vmax.f32 %v900_v53, %v905_v56  ;;  %v903_v62 = vsel %vm898_vm2, %v3329_v40, -inf  ;;  %v2479_v63 = vpop.f32.mrb[22].mxu1 }
 0x32b   :  { %v904_v0 = vmax.f32 %v899_v59, %v903_v62  ;;  %v3343_v1 = vmul.f32 0.35355338, %v2479_v63  ;;  %v833_v2 = vpop.f32.mrb[23].mxu1 }
 0x32c   :  { %v3345_v3 = vmul.f32 0.35355338, %v833_v2 }
 0x32d   :  { %v909_v5 = vsel %vm898_vm2, %v3343_v1, -inf }
 0x32e   :  { %v910_v7 = vmax.f32 %v902_v4, %v909_v5  ;;  %v907_v8 = vsel %vm898_vm2, %v3345_v3, -inf  ;;  %v2482_v9 = vpop.f32.mrb[24].mxu1 }
 0x32f   :  { %v908_v10 = vmax.f32 %v901_v6, %v907_v8  ;;  %v3355_v11 = vmul.f32 0.35355338, %v2482_v9  ;;  %v843_v12 = vpop.f32.mrb[25].mxu1 }
 0x330   :  { %v3357_v13 = vmul.f32 0.35355338, %v843_v12 }
 0x331   :  { %v913_v14 = vsel %vm898_vm2, %v3355_v11, -inf }
 0x332   :  { %v914_v15 = vmax.f32 %v906_v61, %v913_v14  ;;  %v911_v16 = vsel %vm898_vm2, %v3357_v13, -inf  ;;  %v2485_v17 = vpop.f32.mrb[26].mxu1 }
 0x333   :  { %v912_v18 = vmax.f32 %v904_v0, %v911_v16  ;;  %v3363_v19 = vmul.f32 0.35355338, %v2485_v17  ;;  %v853_v20 = vpop.f32.mrb[27].mxu1 }
 0x334   :  { %v3365_v21 = vmul.f32 0.35355338, %v853_v20 }
 0x335   :  { %v917_v22 = vsel %vm898_vm2, %v3363_v19, -inf }
 0x336   :  { %v918_v23 = vmax.f32 %v910_v7, %v917_v22  ;;  %v915_v24 = vsel %vm898_vm2, %v3365_v21, -inf  ;;  %v2488_v25 = vpop.f32.mrb[28].mxu1 }
 0x337   :  { %v916_v26 = vmax.f32 %v908_v10, %v915_v24  ;;  %v3371_v27 = vmul.f32 0.35355338, %v2488_v25  ;;  %v863_v28 = vpop.f32.mrb[29].mxu1 }
 0x338   :  { %v3373_v30 = vmul.f32 0.35355338, %v863_v28 }
 0x339   :  { %v921_v32 = vsel %vm898_vm2, %v3371_v27, -inf }
 0x33a   :  { %v922_v33 = vmax.f32 %v914_v15, %v921_v32  ;;  %v919_v34 = vsel %vm898_vm2, %v3373_v30, -inf  ;;  %v2491_v37 = vpop.f32.mrb[30].mxu1 }
 0x33b   :  { %v920_v39 = vmax.f32 %v912_v18, %v919_v34  ;;  %v3379_v53 = vmul.f32 0.35355338, %v2491_v37  ;;  %v873_v56 = vpop.f32.mrb[31].mxu1 }
 0x33c   :  { %v3381_v59 = vmul.f32 0.35355338, %v873_v56 }
 0x33d   :  { %v927_v61 = vmax.f32 %v920_v39, %v922_v33  ;;  %v925_v62 = vsel %vm898_vm2, %v3379_v53, -inf }
 0x33e   :  { %v926_v63 = vmax.f32 %v918_v23, %v925_v62  ;;  %v923_v0 = vsel %vm898_vm2, %v3381_v59, -inf }
 0x33f   :  { %v924_v2 = vmax.f32 %v916_v26, %v923_v0 }
 0x341   :  { %v928_v4 = vmax.f32 %v924_v2, %v926_v63 }
 0x343   :  { %v929_v5 = vmax.f32 %v927_v61, %v928_v4 }
 0x345   :  { %v930_v6 = vrot.slane %v929_v5, 4 }
 0x347   :  { %v931_v7 = vmax.f32 %v929_v5, %v930_v6 }
 0x349   :  { %v932_v8 = vrot.slane %v931_v7, 2 }
 0x34b   :  { %v933_v9 = vmax.f32 %v931_v7, %v932_v8 }
 0x34d   :  { %v934_v10 = vrot.slane %v933_v9, 1 }
 0x34f   :  { %v935_v12 = vmax.f32 %v933_v9, %v934_v10 }
 0x351   :  { %v950_v14 = vsub.f32 %v3381_v59, %v935_v12  ;;  %v936_v15 = vsub.f32 %v3325_v36, %v935_v12  ;;  %v937_v16 = vsub.f32 %v3323_v35, %v935_v12  ;;  %v938_v17 = vsub.f32 %v3339_v60, %v935_v12 }
 0x352   :  { %v939_v18 = vsub.f32 %v3333_v54, %v935_v12  ;;  %v940_v20 = vsub.f32 %v3329_v40, %v935_v12  ;;  %v941_v22 = vsub.f32 %v3327_v38, %v935_v12  ;;  %v942_v23 = vsub.f32 %v3345_v3, %v935_v12 }
 0x353   :  { %v952_v24 = vmul.f32 1.442695, %v936_v15  ;;  %v954_v25 = vmul.f32 1.442695, %v937_v16  ;;  %v943_v26 = vsub.f32 %v3343_v1, %v935_v12  ;;  %v956_v28 = vmul.f32 1.442695, %v938_v17 }
 0x354   :  { %v944_v32 = vsub.f32 %v3357_v13, %v935_v12  ;;  %v958_v36 = vmul.f32 1.442695, %v939_v18  ;;  %v960_v33 = vmul.f32 1.442695, %v940_v20  ;;  %v962_v35 = vmul.f32 1.442695, %v941_v22 }
 0x355   :  { %2873 = vpow2.f32 %v952_v24  ;;  %v945_v60 = vsub.f32 %v3355_v11, %v935_v12  ;;  %v946_v54 = vsub.f32 %v3365_v21, %v935_v12  ;;  %v947_v38 = vsub.f32 %v3363_v19, %v935_v12 }
 0x356   :  { %2875 = vpow2.f32 %v954_v25  ;;  %v948_v40 = vsub.f32 %v3373_v30, %v935_v12  ;;  %v949_v3 = vsub.f32 %v3371_v27, %v935_v12  ;;  %v951_v1 = vsub.f32 %v3379_v53, %v935_v12  ;;  %v3454_v25 = vld [vmem:[%s3707_s3 + $0x8] sm:$0xff] }
 0x357   :  { %2877 = vpow2.f32 %v956_v28  ;;  %v964_v13 = vmul.f32 1.442695, %v942_v23  ;;  %v966_v34 = vmul.f32 1.442695, %v943_v26  ;;  %v968_v37 = vmul.f32 1.442695, %v944_v32 }
 0x358   :  { %2879 = vpow2.f32 %v958_v36  ;;  %v970_v11 = vmul.f32 1.442695, %v945_v60  ;;  %v972_v30 = vmul.f32 1.442695, %v946_v54  ;;  %v974_v56 = vmul.f32 1.442695, %v947_v38 }
 0x359   :  { %2881 = vpow2.f32 %v960_v33  ;;  %v976_v63 = vmul.f32 1.442695, %v948_v40  ;;  %v978_v0 = vmul.f32 1.442695, %v949_v3  ;;  %v980_v6 = vmul.f32 1.442695, %v950_v14 }
 0x35a   :  { %2883 = vpow2.f32 %v962_v35  ;;  %v982_v7 = vmul.f32 1.442695, %v951_v1  ;;  %v3459_v26 = vld [vmem:[%s3707_s3 + $0x10] sm:$0xff]  ;;  %v3466_v28 = vld [vmem:[%s3707_s3 + $0x18] sm:$0xff]  ;;  %v3471_v32 = vld [vmem:[%s3707_s3 + $0x20] sm:$0xff] }
 0x35b   :  { %2885 = vpow2.f32 %v964_v13  ;;  %v3478_v36 = vld [vmem:[%s3707_s3 + $0x28] sm:$0xff]  ;;  %v3483_v33 = vld [vmem:[%s3707_s3 + $0x30] sm:$0xff]  ;;  %v3490_v35 = vld [vmem:[%s3707_s3 + $0x38] sm:$0xff] }
 0x35c   :  { %2887 = vpow2.f32 %v966_v34 }
 0x35d   :  { %2889 = vpow2.f32 %v968_v37 }
 0x35e   :  { %2891 = vpow2.f32 %v970_v11 }
 0x35f   :  { %v3403_v21 = vpop.eup %2873  ;;  %2893 = vpow2.f32 %v972_v30 }
 0x360   :  { %v3405_v39 = vpop.eup %2875  ;;  %2895 = vpow2.f32 %v974_v56 }
 0x361   :  { %v3407_v19 = vpop.eup %2877  ;;  %v2742_v27 = vpack.c.bf16 %v3405_v39, %v3403_v21  ;;  %2897 = vpow2.f32 %v976_v63 }
 0x362   :  { %v3411_v53 = vpop.eup %2879  ;;  %2899 = vpow2.f32 %v978_v0 }
 0x363   :  { %v3413_v59 = vpop.eup %2881  ;;  %2743 = vmatprep.subr.bf16.mxu0 %v2742_v27  ;;  %v2746_v61 = vpack.c.bf16 %v3411_v53, %v3407_v19  ;;  %2901 = vpow2.f32 %v980_v6 }
 0x364   :  { %v3417_v62 = vpop.eup %2883  ;;  %2745 = vmatpush3.bf16.msra.mxu0 %v2742_v27  ;;  %2903 = vpow2.f32 %v982_v7 }
 0x365   :  { %2747 = vmatprep.subr.bf16.mxu0 %v2746_v61  ;;  %v3419_v2 = vpop.eup %2885  ;;  %v2750_v4 = vpack.c.bf16 %v3417_v62, %v3413_v59 }
 0x366   :  { %v3423_v5 = vpop.eup %2887 }
 0x367   :  { %v3425_v8 = vpop.eup %2889  ;;  %v2754_v9 = vpack.c.bf16 %v3423_v5, %v3419_v2 }
 0x368   :  { %2749 = vmatpush3.bf16.msra.mxu0 %v2746_v61  ;;  %v3429_v10 = vpop.eup %2891 }
 0x369   :  { %2751 = vmatprep.subr.bf16.mxu0 %v2750_v4  ;;  %v3431_v12 = vpop.eup %2893  ;;  %v2758_v14 = vpack.c.bf16 %v3429_v10, %v3425_v8 }
 0x36a   :  { %v3435_v15 = vpop.eup %2895 }
 0x36b   :  { %v3437_v16 = vpop.eup %2897  ;;  %v2762_v17 = vpack.c.bf16 %v3435_v15, %v3431_v12 }
 0x36c   :  { %2753 = vmatpush3.bf16.msra.mxu0 %v2750_v4  ;;  %v3441_v18 = vpop.eup %2899 }
 0x36d   :  { %2755 = vmatprep.subr.bf16.mxu0 %v2754_v9  ;;  %v3443_v20 = vpop.eup %2901  ;;  %v2766_v22 = vpack.c.bf16 %v3441_v18, %v3437_v16 }
 0x36e   :  { %v3447_v23 = vpop.eup %2903 }
 0x36f   :  { %v2770_v24 = vpack.c.bf16 %v3447_v23, %v3443_v20 }
 0x370   :  { %2757 = vmatpush3.bf16.msra.mxu0 %v2754_v9 }
 0x371   :  { %2759 = vmatprep.subr.bf16.mxu0 %v2758_v14 }
 0x374   :  { %2761 = vmatpush3.bf16.msra.mxu0 %v2758_v14 }
 0x375   :  { %2763 = vmatprep.subr.bf16.mxu0 %v2762_v17 }
 0x378   :  { %2765 = vmatpush3.bf16.msra.mxu0 %v2762_v17 }
 0x379   :  { %2767 = vmatprep.subr.bf16.mxu0 %v2766_v22 }
 0x37c   :  { %2769 = vmatpush3.bf16.msra.mxu0 %v2766_v22 }
 0x37d   :  { %2771 = vmatprep.subr.bf16.mxu0 %v2770_v24 }
 0x380   :  { %2773 = vmatpush3.bf16.msra.mxu0 %v2770_v24 }
 0x383   :  { %2525 = vmatmul.mubr.f32.vlgmr.msra.gmra.mrb[24].mxu0 %v3454_v25 }
 0x384   :  { %2527 = vmatprep.mubr.f32.mxu0 %v3459_v26 }
 0x387   :  { %2528 = vmatmul.mubr.f32.gmra.mrb[26].mxu0 %v3466_v28 }
 0x388   :  { %2530 = vmatprep.mubr.f32.mxu0 %v3471_v32 }
 0x38b   :  { %2531 = vmatmul.mubr.f32.gmra.mrb[28].mxu0 %v3478_v36 }
 0x38c   :  { %2533 = vmatprep.mubr.f32.mxu0 %v3483_v33 }
 0x38f   :  { %2534 = vmatmul.mubr.f32.gmra.mrb[30].mxu0 %v3490_v35 }
 0x390   :  { %2552 = vmatprep.mubr.msk.f32.mxu0 %vm254_vm1, %v3098_v31  ;;  %v117_v31 = vld [vmem:[%s3708_s7] sm:$0xf] }
 0x391   :  { %2576 = vmatprep.subr.msk.mxu1 %vm1346_vm3, %v117_v31 }
 0x392   :  { %2577 = vmatpush3.msk.msra.mxu1 %vm1346_vm3, %v117_v31 }
 0x456   :  { %v2526_v60 = vpop.f32.mrb[24].mxu0 }
 0x457   :  { %v1050_v54 = vpop.f32.mrb[25].mxu0 }
 0x458   :  { %v2774_v38 = vpack.c.bf16 %v2526_v60, %v1050_v54 }
 0x45a   :  { %v2529_v40 = vpop.f32.mrb[26].mxu0  ;;  %2775 = vmatprep.subr.bf16.mxu0 %v2774_v38 }
 0x45b   :  { %v1060_v3 = vpop.f32.mrb[27].mxu0  ;;  %2777 = vmatpush3.bf16.msra.mxu0 %v2774_v38 }
 0x45c   :  { %v2778_v1 = vpack.c.bf16 %v2529_v40, %v1060_v3 }
 0x45e   :  { %v2532_v13 = vpop.f32.mrb[28].mxu0  ;;  %2779 = vmatprep.subr.bf16.mxu0 %v2778_v1 }
 0x45f   :  { %v1070_v34 = vpop.f32.mrb[29].mxu0  ;;  %2781 = vmatpush3.bf16.msra.mxu0 %v2778_v1 }
 0x460   :  { %v2782_v37 = vpack.c.bf16 %v2532_v13, %v1070_v34 }
 0x462   :  { %v2535_v11 = vpop.f32.mrb[30].mxu0  ;;  %2783 = vmatprep.subr.bf16.mxu0 %v2782_v37 }
 0x463   :  { %v1080_v27 = vpop.f32.mrb[31].mxu0  ;;  %2785 = vmatpush3.bf16.msra.mxu0 %v2782_v37 }
 0x464   :  { %v2786_v30 = vpack.c.bf16 %v2535_v11, %v1080_v27 }
 0x466   :  { %2787 = vmatprep.subr.bf16.mxu0 %v2786_v30 }
 0x467   :  { %2789 = vmatpush3.bf16.msra.mxu0 %v2786_v30 }
 0x46a   :  { %2553 = vmatmul.mubr.msk.f32.vlgmr.msra.gmra.mrb[32].mxu0 %vm254_vm1, %v3111_v41 }
 0x46b   :  { %2555 = vmatprep.mubr.msk.f32.mxu0 %vm254_vm1, %v3116_v42 }
 0x46e   :  { %2556 = vmatmul.mubr.msk.f32.gmra.mrb[34].mxu0 %vm254_vm1, %v3125_v43 }
 0x46f   :  { %2558 = vmatprep.mubr.msk.f32.mxu0 %vm254_vm1, %v3130_v44 }
 0x472   :  { %2559 = vmatmul.mubr.msk.f32.gmra.mrb[36].mxu0 %vm254_vm1, %v3139_v45 }
 0x473   :  { %2561 = vmatprep.mubr.msk.f32.mxu0 %vm254_vm1, %v3144_v46 }
 0x476   :  { %2562 = vmatmul.mubr.msk.f32.gmra.mrb[38].mxu0 %vm254_vm1, %v3153_v47 }
 0x477   :  { %2564 = vmatprep.mubr.msk.f32.mxu0 %vm254_vm1, %v3158_v48 }
 0x47a   :  { %2565 = vmatmul.mubr.msk.f32.gmra.mrb[40].mxu0 %vm254_vm1, %v3167_v49 }
 0x47b   :  { %2567 = vmatprep.mubr.msk.f32.mxu0 %vm254_vm1, %v3172_v50 }
 0x47e   :  { %2568 = vmatmul.mubr.msk.f32.gmra.mrb[42].mxu0 %vm254_vm1, %v3181_v51 }
 0x47f   :  { %2570 = vmatprep.mubr.msk.f32.mxu0 %vm254_vm1, %v3186_v52 }
 0x482   :  { %2571 = vmatmul.mubr.msk.f32.gmra.mrb[44].mxu0 %vm254_vm1, %v3201_v55 }
 0x483   :  { %2573 = vmatprep.mubr.msk.f32.mxu0 %vm254_vm1, %v3206_v57 }
 0x486   :  { %2574 = vmatmul.mubr.msk.f32.gmra.mrb[46].mxu0 %vm254_vm1, %v3215_v58 }
 0x487   :  { %2634 = vmatprep.mubr.f32.mxu0 %v3320_v29 }
 0x53d   :  { %v2554_v41 = vpop.f32.mrb[32].mxu0 }
 0x53e   :  { %2905 = vrcp.f32 %v2554_v41  ;;  %v1155_v42 = vpop.f32.mrb[33].mxu0  ;;  %vm1235_vm4 = vcmp.gt.f32.partialorder %v2554_v41, 0.0 }
 0x53f   :  { %2907 = vrcp.f32 %v1155_v42  ;;  %vm1234_vm5 = vcmp.gt.f32.partialorder %v1155_v42, 0.0 }
 0x541   :  { %v2557_v43 = vpop.f32.mrb[34].mxu0 }
 0x542   :  { %2909 = vrcp.f32 %v2557_v43  ;;  %v1165_v44 = vpop.f32.mrb[35].mxu0  ;;  %vm1237_vm6 = vcmp.gt.f32.partialorder %v2557_v43, 0.0 }
 0x543   :  { %2911 = vrcp.f32 %v1165_v44  ;;  %vm1236_vm7 = vcmp.gt.f32.partialorder %v1165_v44, 0.0 }
 0x545   :  { %v2560_v45 = vpop.f32.mrb[36].mxu0 }
 0x546   :  { %2913 = vrcp.f32 %v2560_v45  ;;  %v1175_v46 = vpop.f32.mrb[37].mxu0  ;;  %vm1239_vm8 = vcmp.gt.f32.partialorder %v2560_v45, 0.0 }
 0x547   :  { %2915 = vrcp.f32 %v1175_v46  ;;  %vm1238_vm9 = vcmp.gt.f32.partialorder %v1175_v46, 0.0 }
 0x548   :  { %v2906_v47 = vpop.eup %2905 }
 0x549   :  { %v2908_v48 = vpop.eup %2907  ;;  %v1253_v49 = vmul.f32 %v2906_v47, %v3405_v39  ;;  %v2563_v50 = vpop.f32.mrb[38].mxu0 }
 0x54a   :  { %v1251_v51 = vmul.f32 %v2908_v48, %v3403_v21  ;;  %2917 = vrcp.f32 %v2563_v50  ;;  %v1185_v52 = vpop.f32.mrb[39].mxu0  ;;  %vm1241_vm10 = vcmp.gt.f32.partialorder %v2563_v50, 0.0 }
 0x54b   :  { %v1283_v55 = vsel %vm1235_vm4, %v1253_v49, 0.0  ;;  %2919 = vrcp.f32 %v1185_v52  ;;  %vm1240_vm11 = vcmp.gt.f32.partialorder %v1185_v52, 0.0 }
 0x54c   :  { %v2910_v57 = vpop.eup %2909  ;;  %1681 = vst.msk [vmem:[%s3709_s18 + $0x8] sm:$0xff] %vm898_vm2, %v1283_v55  ;;  %v1282_v58 = vsel %vm1234_vm5, %v1251_v51, 0.0 }
 0x54d   :  { %v2912_v29 = vpop.eup %2911  ;;  %1680 = vst.msk [vmem:[%s3709_s18] sm:$0xff] %vm898_vm2, %v1282_v58  ;;  %v1257_v21 = vmul.f32 %v2910_v57, %v3411_v53  ;;  %v2566_v39 = vpop.f32.mrb[40].mxu0  ;;  %2578 = vmatprep.mubr.msk.f32.mxu1 %vm898_vm2, %v1282_v58 }
 0x54e   :  { %v1255_v56 = vmul.f32 %v2912_v29, %v3407_v19  ;;  %2921 = vrcp.f32 %v2566_v39  ;;  %v1195_v61 = vpop.f32.mrb[41].mxu0  ;;  %2579 = vmatmul.mubr.msk.f32.vlgmr.msra.gmra.mrb[32].mxu1 %vm898_vm2, %v1283_v55  ;;  %vm1243_vm12 = vcmp.gt.f32.partialorder %v2566_v39, 0.0 }
 0x54f   :  { %v1285_v63 = vsel %vm1237_vm6, %v1257_v21, 0.0  ;;  %2923 = vrcp.f32 %v1195_v61  ;;  %vm1242_vm13 = vcmp.gt.f32.partialorder %v1195_v61, 0.0 }
 0x550   :  { %v2914_v0 = vpop.eup %2913  ;;  %1683 = vst.msk [vmem:[%s3709_s18 + $0x18] sm:$0xff] %vm898_vm2, %v1285_v63  ;;  %v1284_v53 = vsel %vm1236_vm7, %v1255_v56, 0.0 }
 0x551   :  { %v2916_v4 = vpop.eup %2915  ;;  %1682 = vst.msk [vmem:[%s3709_s18 + $0x10] sm:$0xff] %vm898_vm2, %v1284_v53  ;;  %v1261_v19 = vmul.f32 %v2914_v0, %v3417_v62  ;;  %v2569_v6 = vpop.f32.mrb[42].mxu0  ;;  %2581 = vmatprep.mubr.msk.f32.mxu1 %vm898_vm2, %v1284_v53 }
 0x552   :  { %v1259_v7 = vmul.f32 %v2916_v4, %v3413_v59  ;;  %2925 = vrcp.f32 %v2569_v6  ;;  %v1205_v9 = vpop.f32.mrb[43].mxu0  ;;  %2582 = vmatmul.mubr.msk.f32.gmra.mrb[34].mxu1 %vm898_vm2, %v1285_v63  ;;  %vm1245_vm14 = vcmp.gt.f32.partialorder %v2569_v6, 0.0 }
 0x553   :  { %v1287_v14 = vsel %vm1239_vm8, %v1261_v19, 0.0  ;;  %2927 = vrcp.f32 %v1205_v9  ;;  %vm1244_vm15 = vcmp.gt.f32.partialorder %v1205_v9, 0.0 }
 0x554   :  { %v2918_v17 = vpop.eup %2917  ;;  %1685 = vst.msk [vmem:[%s3709_s18 + $0x28] sm:$0xff] %vm898_vm2, %v1287_v14  ;;  %v1286_v62 = vsel %vm1238_vm9, %v1259_v7, 0.0 }
 0x555   :  { %v2920_v22 = vpop.eup %2919  ;;  %1684 = vst.msk [vmem:[%s3709_s18 + $0x20] sm:$0xff] %vm898_vm2, %v1286_v62  ;;  %v1265_v59 = vmul.f32 %v2918_v17, %v3423_v5  ;;  %v2572_v24 = vpop.f32.mrb[44].mxu0  ;;  %2584 = vmatprep.mubr.msk.f32.mxu1 %vm898_vm2, %v1286_v62 }
 0x556   :  { %v1263_v60 = vmul.f32 %v2920_v22, %v3419_v2  ;;  %2929 = vrcp.f32 %v2572_v24  ;;  %v1215_v54 = vpop.f32.mrb[45].mxu0  ;;  %2585 = vmatmul.mubr.msk.f32.gmra.mrb[36].mxu1 %vm898_vm2, %v1287_v14  ;;  %vm1247_vm3 = vcmp.gt.f32.partialorder %v2572_v24, 0.0 }
 0x557   :  { %v1289_v38 = vsel %vm1241_vm10, %v1265_v59, 0.0  ;;  %2931 = vrcp.f32 %v1215_v54  ;;  %vm1246_vm4 = vcmp.gt.f32.partialorder %v1215_v54, 0.0 }
 0x558   :  { %v2922_v40 = vpop.eup %2921  ;;  %1687 = vst.msk [vmem:[%s3709_s18 + $0x38] sm:$0xff] %vm898_vm2, %v1289_v38  ;;  %v1288_v5 = vsel %vm1240_vm11, %v1263_v60, 0.0 }
 0x559   :  { %v2924_v3 = vpop.eup %2923  ;;  %1686 = vst.msk [vmem:[%s3709_s18 + $0x30] sm:$0xff] %vm898_vm2, %v1288_v5  ;;  %v1269_v2 = vmul.f32 %v2922_v40, %v3429_v10  ;;  %v2575_v1 = vpop.f32.mrb[46].mxu0  ;;  %2587 = vmatprep.mubr.msk.f32.mxu1 %vm898_vm2, %v1288_v5 }
 0x55a   :  { %v1267_v13 = vmul.f32 %v2924_v3, %v3425_v8  ;;  %2933 = vrcp.f32 %v2575_v1  ;;  %v1225_v34 = vpop.f32.mrb[47].mxu0  ;;  %2588 = vmatmul.mubr.msk.f32.gmra.mrb[38].mxu1 %vm898_vm2, %v1289_v38  ;;  %vm1249_vm5 = vcmp.gt.f32.partialorder %v2575_v1, 0.0 }
 0x55b   :  { %v1291_v37 = vsel %vm1243_vm12, %v1269_v2, 0.0  ;;  %2935 = vrcp.f32 %v1225_v34  ;;  %vm1248_vm6 = vcmp.gt.f32.partialorder %v1225_v34, 0.0 }
 0x55c   :  { %v2926_v11 = vpop.eup %2925  ;;  %1689 = vst.msk [vmem:[%s3709_s18 + $0x48] sm:$0xff] %vm898_vm2, %v1291_v37  ;;  %v1290_v10 = vsel %vm1242_vm13, %v1267_v13, 0.0 }
 0x55d   :  { %v2928_v27 = vpop.eup %2927  ;;  %1688 = vst.msk [vmem:[%s3709_s18 + $0x40] sm:$0xff] %vm898_vm2, %v1290_v10  ;;  %v1273_v8 = vmul.f32 %v2926_v11, %v3435_v15  ;;  %2590 = vmatprep.mubr.msk.f32.mxu1 %vm898_vm2, %v1290_v10 }
 0x55e   :  { %v1271_v30 = vmul.f32 %v2928_v27, %v3431_v12  ;;  %2591 = vmatmul.mubr.msk.f32.gmra.mrb[40].mxu1 %vm898_vm2, %v1291_v37 }
 0x55f   :  { %v1293_v31 = vsel %vm1245_vm14, %v1273_v8, 0.0 }
 0x560   :  { %v2930_v41 = vpop.eup %2929  ;;  %1691 = vst.msk [vmem:[%s3709_s18 + $0x58] sm:$0xff] %vm898_vm2, %v1293_v31  ;;  %v1292_v42 = vsel %vm1244_vm15, %v1271_v30, 0.0 }
 0x561   :  { %v2932_v43 = vpop.eup %2931  ;;  %1690 = vst.msk [vmem:[%s3709_s18 + $0x50] sm:$0xff] %vm898_vm2, %v1292_v42  ;;  %v1277_v15 = vmul.f32 %v2930_v41, %v3441_v18  ;;  %2593 = vmatprep.mubr.msk.f32.mxu1 %vm898_vm2, %v1292_v42 }
 0x562   :  { %v1275_v12 = vmul.f32 %v2932_v43, %v3437_v16  ;;  %2594 = vmatmul.mubr.msk.f32.gmra.mrb[42].mxu1 %vm898_vm2, %v1293_v31 }
 0x563   :  { %v1295_v44 = vsel %vm1247_vm3, %v1277_v15, 0.0 }
 0x564   :  { %v2934_v45 = vpop.eup %2933  ;;  %1693 = vst.msk [vmem:[%s3709_s18 + $0x68] sm:$0xff] %vm898_vm2, %v1295_v44  ;;  %v1294_v46 = vsel %vm1246_vm4, %v1275_v12, 0.0 }
 0x565   :  { %v2936_v47 = vpop.eup %2935  ;;  %1692 = vst.msk [vmem:[%s3709_s18 + $0x60] sm:$0xff] %vm898_vm2, %v1294_v46  ;;  %v1281_v18 = vmul.f32 %v2934_v45, %v3447_v23  ;;  %2596 = vmatprep.mubr.msk.f32.mxu1 %vm898_vm2, %v1294_v46  ;;  %v1512_v23 = vpop.permute.xlu0 %1511 }
 0x566   :  { %v1279_v16 = vmul.f32 %v2936_v47, %v3443_v20  ;;  %2597 = vmatmul.mubr.msk.f32.gmra.mrb[44].mxu1 %vm898_vm2, %v1295_v44  ;;  %v1514_v20 = vpop.permute.xlu1 %1513 }
 0x567   :  { %v1297_v48 = vsel %vm1249_vm5, %v1281_v18, 0.0 }
 0x568   :  { %1695 = vst.msk [vmem:[%s3709_s18 + $0x78] sm:$0xff] %vm898_vm2, %v1297_v48  ;;  %v1296_v49 = vsel %vm1248_vm6, %v1279_v16, 0.0 }
 0x569   :  { %1694 = vst.msk [vmem:[%s3709_s18 + $0x70] sm:$0xff] %vm898_vm2, %v1296_v49  ;;  %2599 = vmatprep.mubr.msk.f32.mxu1 %vm898_vm2, %v1296_v49  ;;  %v1516_v51 = vpop.permute.xlu0 %1515  ;;  %v2948_v49 = vmov 0.0|0.0  }
 0x56a   :  { %2600 = vmatmul.mubr.msk.f32.gmra.mrb[46].mxu1 %vm898_vm2, %v1297_v48  ;;  %v1518_v50 = vpop.permute.xlu1 %1517  ;;  %2822 = vmatprep.subr.bf16.mxu1 %v2948_v49  ;;  %vm2949_vm2 = vmmov 0  }
 0x56d   :  { %v1520_v55 = vpop.permute.xlu0 %1519 }
 0x56e   :  { %v1522_v52 = vpop.permute.xlu1 %1521 }
 0x571   :  { %v1524_v63 = vpop.permute.xlu0 %1523 }
 0x572   :  { %v1526_v39 = vpop.permute.xlu1 %1525 }
 0x575   :  { %v1528_v62 = vpop.permute.xlu0 %1527 }
 0x576   :  { %v1530_v14 = vpop.permute.xlu1 %1529 }
 0x579   :  { %v1532_v3 = vpop.permute.xlu0 %1531 }
 0x57a   :  { %v1534_v38 = vpop.permute.xlu1 %1533 }
 0x57d   :  { %v1536_v30 = vpop.permute.xlu0 %1535 }
 0x57e   :  { %v1538_v27 = vpop.permute.xlu1 %1537 }
 0x581   :  { %v1540_v46 = vpop.permute.xlu0 %1539 }
 0x582   :  { %v1542_v12 = vpop.permute.xlu1 %1541 }
 0x621   :  { %v2580_v57 = vpop.f32.mrb[32].mxu1 }
 0x622   :  { %v1560_v58 = vmul.f32 %v2580_v57, %v1514_v20  ;;  %v1416_v29 = vpop.f32.mrb[33].mxu1  ;;  %v2950_v20 = vmov 0.0   ;;  %v1696_v57 = vld [vmem:[%s3710_s8] sm:$0xff] }
 0x623   :  { %v1559_v21 = vmul.f32 %v1512_v23, %v1416_v29  ;;  %2662 = vmatprep.mubr.msk.f32.mxu1 %vm2949_vm2, %v2950_v20 }
 0x625   :  { %v2790_v56 = vpack.c.bf16 %v1560_v58, %v1559_v21  ;;  %v2583_v61 = vpop.f32.mrb[34].mxu1 }
 0x626   :  { %v1562_v0 = vmul.f32 %v2583_v61, %v1518_v50  ;;  %v1426_v53 = vpop.f32.mrb[35].mxu1 }
 0x627   :  { %v1561_v4 = vmul.f32 %v1516_v51, %v1426_v53  ;;  %2791 = vmatprep.subr.bf16.mxu0 %v2790_v56  ;;  %v1800_v53 = vld [vmem:[%s3711_s11] sm:$0xff] }
 0x628   :  { %2793 = vmatpush3.bf16.msra.mxu0 %v2790_v56 }
 0x629   :  { %v2794_v19 = vpack.c.bf16 %v1562_v0, %v1561_v4  ;;  %v2586_v6 = vpop.f32.mrb[36].mxu1  ;;  %v1801_v4 = vld [vmem:[%s3711_s11 + $0x8] sm:$0xff] }
 0x62a   :  { %v1564_v7 = vmul.f32 %v2586_v6, %v1522_v52  ;;  %v1436_v9 = vpop.f32.mrb[37].mxu1  ;;  %v2835_v6 = vpack.c.bf16 %v1801_v4, %v1800_v53 }
 0x62b   :  { %v1563_v17 = vmul.f32 %v1520_v55, %v1436_v9  ;;  %2795 = vmatprep.subr.bf16.mxu0 %v2794_v19 }
 0x62c   :  { %2797 = vmatpush3.bf16.msra.mxu0 %v2794_v19  ;;  %v1802_v19 = vld [vmem:[%s3711_s11 + $0x10] sm:$0xff] }
 0x62d   :  { %v2798_v22 = vpack.c.bf16 %v1564_v7, %v1563_v17  ;;  %v2589_v59 = vpop.f32.mrb[38].mxu1  ;;  %v1803_v7 = vld [vmem:[%s3711_s11 + $0x18] sm:$0xff] }
 0x62e   :  { %v1566_v24 = vmul.f32 %v2589_v59, %v1526_v39  ;;  %v1446_v60 = vpop.f32.mrb[39].mxu1  ;;  %v2838_v9 = vpack.c.bf16 %v1803_v7, %v1802_v19  ;;  %v2160_v59 = vld [vmem:[%s3712_s9] ss:$0 sm:$0xff] }
 0x62f   :  { %v1565_v54 = vmul.f32 %v1524_v63, %v1446_v60  ;;  %2799 = vmatprep.subr.bf16.mxu0 %v2798_v22  ;;  %v2161_v60 = vld [vmem:[%s3713_s10] ss:$0 sm:$0xff] }
 0x630   :  { %2801 = vmatpush3.bf16.msra.mxu0 %v2798_v22 }
 0x631   :  { %v2802_v40 = vpack.c.bf16 %v1566_v24, %v1565_v54  ;;  %v2592_v5 = vpop.f32.mrb[40].mxu1 }
 0x632   :  { %v1568_v2 = vmul.f32 %v2592_v5, %v1530_v14  ;;  %v1456_v1 = vpop.f32.mrb[41].mxu1  ;;  %v1886_v5 = vld [vmem:[%s3714_s13 + $0x8] sm:$0xff] }
 0x633   :  { %v1567_v13 = vmul.f32 %v1528_v62, %v1456_v1  ;;  %2803 = vmatprep.subr.bf16.mxu0 %v2802_v40  ;;  %v1888_v1 = vld [vmem:[%s3714_s13 + $0x18] sm:$0xff] }
 0x634   :  { %2805 = vmatpush3.bf16.msra.mxu0 %v2802_v40  ;;  %v1885_v40 = vld [vmem:[%s3714_s13] sm:$0xff] }
 0x635   :  { %v2806_v34 = vpack.c.bf16 %v1568_v2, %v1567_v13  ;;  %v2595_v37 = vpop.f32.mrb[42].mxu1  ;;  %v2841_v2 = vpack.c.bf16 %v1886_v5, %v1885_v40 }
 0x636   :  { %v1570_v11 = vmul.f32 %v2595_v37, %v1534_v38  ;;  %v1466_v10 = vpop.f32.mrb[43].mxu1 }
 0x637   :  { %v1569_v8 = vmul.f32 %v1532_v3, %v1466_v10  ;;  %2807 = vmatprep.subr.bf16.mxu0 %v2806_v34  ;;  %v1887_v3 = vld [vmem:[%s3714_s13 + $0x10] sm:$0xff] }
 0x638   :  { %2809 = vmatpush3.bf16.msra.mxu0 %v2806_v34  ;;  %v2844_v13 = vpack.c.bf16 %v1888_v1, %v1887_v3  ;;  %v2162_v34 = vld [vmem:[%s3715_s12] ss:$0 sm:$0xff] }
 0x639   :  { %v2810_v31 = vpack.c.bf16 %v1570_v11, %v1569_v8  ;;  %v2598_v41 = vpop.f32.mrb[44].mxu1  ;;  %v1970_v8 = vld [vmem:[%s3716_s15] sm:$0xff] }
 0x63a   :  { %v1572_v42 = vmul.f32 %v2598_v41, %v1538_v27  ;;  %v1476_v43 = vpop.f32.mrb[45].mxu1  ;;  %v24_v41 = vstv %s3717_s16 }
 0x63b   :  { %v1571_v15 = vmul.f32 %v1536_v30, %v1476_v43  ;;  %2811 = vmatprep.subr.bf16.mxu0 %v2810_v31  ;;  %v1971_v30 = vld [vmem:[%s3716_s15 + $0x8] sm:$0xff]  ;;  %25 = vst [vmem:[#allocation2] sm:$0x1] %v24_v41 }
 0x63c   :  { %2813 = vmatpush3.bf16.msra.mxu0 %v2810_v31  ;;  %v2847_v31 = vpack.c.bf16 %v1971_v30, %v1970_v8 }
 0x63d   :  { %v2814_v44 = vpack.c.bf16 %v1572_v42, %v1571_v15  ;;  %v2601_v45 = vpop.f32.mrb[46].mxu1  ;;  %v2164_v42 = vld [vmem:[%s3718_s14] ss:$0 sm:$0xff] }
 0x63e   :  { %v1574_v47 = vmul.f32 %v2601_v45, %v1542_v12  ;;  %v1486_v18 = vpop.f32.mrb[47].mxu1 }
 0x63f   :  { %v1573_v16 = vmul.f32 %v1540_v46, %v1486_v18  ;;  %2815 = vmatprep.subr.bf16.mxu0 %v2814_v44 }
 0x640   :  { %2817 = vmatpush3.bf16.msra.mxu0 %v2814_v44 }
 0x641   :  { %v2818_v48 = vpack.c.bf16 %v1574_v47, %v1573_v16 }
 0x642   :  { %v2166_v45 = vld [vmem:[#allocation2] ss:$0 sm:$0xff] }
 0x643   :  { %2819 = vmatprep.subr.bf16.mxu0 %v2818_v48 }
 0x644   :  { %2821 = vmatpush3.bf16.msra.mxu0 %v2818_v48 }
 0x645   :  { %2834 = vmatprep.subr.bf16.mxu0 %v2948_v49 }
 0x647   :  { %2635 = vmatmul.mubr.f32.vlgmr.msra.gmra.mrb[48].mxu0 %v3454_v25 }
 0x648   :  { %2637 = vmatprep.mubr.f32.mxu0 %v3459_v26  ;;  %2836 = vmatpush3.bf16.msra.mxu0 %v2835_v6 }
 0x649   :  { %2837 = vmatprep.subr.bf16.mxu0 %v2948_v49 }
 0x64b   :  { %2638 = vmatmul.mubr.f32.gmra.mrb[50].mxu0 %v3466_v28 }
 0x64c   :  { %2640 = vmatprep.mubr.f32.mxu0 %v3471_v32  ;;  %2839 = vmatpush3.bf16.msra.mxu0 %v2838_v9 }
 0x64d   :  { %2846 = vmatprep.subr.bf16.mxu0 %v2948_v49 }
 0x64f   :  { %2641 = vmatmul.mubr.f32.gmra.mrb[52].mxu0 %v3478_v36 }
 0x650   :  { %2643 = vmatprep.mubr.f32.mxu0 %v3483_v33 }
 0x653   :  { %2644 = vmatmul.mubr.f32.gmra.mrb[54].mxu0 %v3490_v35 }
 0x654   :  { %2673 = vmatprep.mubr.msk.f32.mxu0 %vm2949_vm2, %v2950_v20 }
 0x71a   :  { %v2636_v25 = vpop.f32.mrb[48].mxu0 }
 0x71b   :  { %v1641_v26 = vpop.f32.mrb[49].mxu0 }
 0x71c   :  { %v2823_v28 = vpack.c.bf16 %v2636_v25, %v1641_v26 }
 0x71e   :  { %v2639_v32 = vpop.f32.mrb[50].mxu0  ;;  %2824 = vmatpush3.bf16.msra.mxu1 %v2823_v28 }
 0x71f   :  { %v1651_v36 = vpop.f32.mrb[51].mxu0  ;;  %2825 = vmatprep.subr.bf16.mxu1 %v2948_v49 }
 0x720   :  { %v2826_v33 = vpack.c.bf16 %v2639_v32, %v1651_v36 }
 0x722   :  { %v2642_v35 = vpop.f32.mrb[52].mxu0  ;;  %2827 = vmatpush3.bf16.msra.mxu1 %v2826_v33 }
 0x723   :  { %v1661_v23 = vpop.f32.mrb[53].mxu0  ;;  %2828 = vmatprep.subr.bf16.mxu1 %v2948_v49 }
 0x724   :  { %v2829_v50 = vpack.c.bf16 %v2642_v35, %v1661_v23 }
 0x726   :  { %v2645_v51 = vpop.f32.mrb[54].mxu0  ;;  %2830 = vmatpush3.bf16.msra.mxu1 %v2829_v50 }
 0x727   :  { %v1671_v52 = vpop.f32.mrb[55].mxu0  ;;  %2831 = vmatprep.subr.bf16.mxu1 %v2948_v49 }
 0x728   :  { %v2832_v55 = vpack.c.bf16 %v2645_v51, %v1671_v52 }
 0x72a   :  { %2833 = vmatpush3.bf16.msra.mxu1 %v2832_v55 }
 0x72b   :  { %2840 = vmatprep.subr.bf16.mxu1 %v2948_v49 }
 0x72d   :  { %2663 = vmatmul.mubr.msk.f32.vlgmr.msra.gmra.mrb[48].mxu1 %vm254_vm1, %v1696_v57  ;;  %vm2059_vm1 = vcmask 7168  }
 0x72e   :  { %2684 = vmatprep.mubr.msk.f32.mxu1 %vm2949_vm2, %v2950_v20  ;;  %2842 = vmatpush3.bf16.msra.mxu1 %v2841_v2 }
 0x72f   :  { %2843 = vmatprep.subr.bf16.mxu1 %v2948_v49 }
 0x732   :  { %2845 = vmatpush3.bf16.msra.mxu1 %v2844_v13 }
 0x800   :  { %v1766_v58 = vpop.f32.mrb[48].mxu1 }
 0x801   :  { %v1772_v29 = vsel %vm124_vm0, %v1766_v58, 0.0  ;;  %v2664_v21 = vpop.f32.mrb[49].mxu1 }
 0x802   :  { %1773 = vadd.xlane.f32.xlu0 %v1772_v29 }
 0x88f   :  { %v1774_v39 = vpop.xlane.xlu0 %1773 }
 0x890   :  { %v1776_v56 = vmul.f32 0.03125, %v1774_v39 }
 0x892   :  { %v1777_v61 = vsub.f32 %v1766_v58, %v1776_v56 }
 0x894   :  { %v1778_v63 = vmul.f32 %v1777_v61, %v1777_v61 }
 0x896   :  { %v1779_v0 = vsel %vm124_vm0, %v1778_v63, 0.0 }
 0x897   :  { %1780 = vadd.xlane.f32.xlu1 %v1779_v0 }
 0x924   :  { %v1781_v14 = vpop.xlane.xlu1 %1780 }
 0x925   :  { %v1782_v17 = vmul.f32 0.03125, %v1781_v14 }
 0x927   :  { %v1783_v62 = vadd.f32 1e-05, %v1782_v17 }
 0x929   :  { %2937 = vrsqrt.f32 %v1783_v62 }
 0x933   :  { %v2938_v22 = vpop.eup %2937 }
 0x934   :  { %v1785_v24 = vmul.f32 %v2938_v22, %v1777_v61 }
 0x936   :  { %v1792_v54 = vmul.f32 %v2160_v59, %v1785_v24 }
 0x938   :  { %v1799_v38 = vadd.f32 %v2161_v60, %v1792_v54 }
 0x93a   :  { %2674 = vmatmul.mubr.msk.f32.vlgmr.msra.gmra.mrb[56].mxu0 %vm124_vm0, %v1799_v38 }
 0x93b   :  { %2691 = vmatprep.mubr.msk.f32.mxu0 %vm2949_vm2, %v2950_v20  ;;  %2848 = vmatpush3.bf16.msra.mxu0 %v2847_v31 }
 0xa0d   :  { %v1880_v37 = vpop.f32.mrb[56].mxu0 }
 0xa0e   :  { %v1881_v11 = vadd.f32 %v2162_v34, %v1880_v37  ;;  %v2675_v10 = vpop.f32.mrb[57].mxu0 }
 0xa10   :  { %2939 = vtanh.f32 %v1881_v11 }
 0xa1a   :  { %v2940_v27 = vpop.eup %2939 }
 0xa1b   :  { %2685 = vmatmul.mubr.msk.f32.vlgmr.msra.gmra.mrb[50].mxu1 %vm124_vm0, %v2940_v27  ;;  %vm1979_vm0 = vcmask 130048  }
 0xaee   :  { %v1965_v43 = vpop.f32.mrb[50].mxu1 }
 0xaef   :  { %v1966_v15 = vadd.f32 %v2164_v42, %v1965_v43  ;;  %v2686_v12 = vpop.f32.mrb[51].mxu1 }
 0xaf1   :  { %2941 = vtanh.f32 %v1966_v15 }
 0xafb   :  { %v2942_v44 = vpop.eup %2941 }
 0xafc   :  { %2692 = vmatmul.mubr.msk.f32.vlgmr.msra.gmra.mrb[58].mxu0 %vm1979_vm0, %v2942_v44 }
 0xbcf   :  { %v2049_v46 = vpop.f32.mrb[58].mxu0 }
 0xbd0   :  { %v2050_v47 = vadd.f32 %v2166_v45, %v2049_v46  ;;  %v2693_v18 = vpop.f32.mrb[59].mxu0 }
 0xbd2   :  { %v2168_v16 = vmul.f32 -1.442695, %v2050_v47 }
 0xbd4   :  { %2943 = vpow2.f32 %v2168_v16 }
 0xbde   :  { %v2944_v48 = vpop.eup %2943 }
 0xbdf   :  { %v2056_v49 = vadd.f32 1.0, %v2944_v48 }
 0xbe1   :  { %2945 = vrcp.f32 %v2056_v49 }
 0xbeb   :  { %v2946_v20 = vpop.eup %2945 }
 0xbec   :  { %2060 = vst.msk [vmem:[%s3719_s17] sm:$0xff] %vm2059_vm1, %v2946_v20 }

</bundles_post_ra>
